<compile_context>
chip_gen: v6e
topology: v6e:2x2x1
jax: 0.10.0
libtpu: 0.0.40
codegen_flags: <defaults>
</compile_context>

<pallas_src>
import functools

import jax
import jax.numpy as jnp
import numpy as np
from jax.experimental import pallas as pl
from jax.experimental.pallas import tpu as pltpu


def _mm(a, b):  # a @ b, f32 accumulation, default (fast, bf16-native MXU) precision
    return jax.lax.dot_general(
        a, b, (((1,), (0,)), ((), ())), preferred_element_type=jnp.float32)


def _mm_t(a, b):  # a @ b.T (contract last dims, no explicit transpose)
    return jax.lax.dot_general(
        a, b, (((1,), (1,)), ((), ())), preferred_element_type=jnp.float32)


def _msa_kernel(num_heads, head_dim,
                q_tok_ref, x_ref, wq_ref, wk_ref, wv_ref, wp_ref, bp_ref,
                rh_ref, rw_ref, mh_ref, mw_ref, fh_ref, fw_ref, eh_ref, ew_ref,
                o_ref, oacc_ref):
    bf16 = jnp.bfloat16
    q_tok = q_tok_ref[0]            # (q_N, dim)   bf16, pre-pooled query tokens
    x = x_ref[0]                    # (k_N, dim)   bf16, full-resolution tokens

    # Fused projections (lane-dense, contraction = dim): one MXU pass each instead
    # of num_heads head_dim-wide passes.  Wk is pre-scaled by 1/sqrt(head_dim).
    qf = _mm(q_tok, wq_ref[...])                 # (q_N, dim_out) f32, UNscaled
    kf = _mm(x, wk_ref[...]).astype(bf16)        # (k_N, dim_out) pre-scaled keys
    vf = _mm(x, wv_ref[...]).astype(bf16)        # (k_N, dim_out)

    rh = rh_ref[...]; rw = rw_ref[...]           # (q_h*k_h, hd) / (q_w*k_w, hd)
    mh = mh_ref[...]; mw = mw_ref[...]           # 0/1 bf16 row-group masks
    fh = fh_ref[...]; fw = fw_ref[...]           # 0/1 bf16 fold matrices
    eh = eh_ref[...]; ew = ew_ref[...]           # 0/1 bf16 expand-to-k_N matrices

    # TODO(synk): for production LLaVA sizes, move heads (and a flash-style k_N
    # tile with online-softmax) onto the grid so the (q_N, k_N) scores and the
    # (k_N, dim_out) K/V never have to be fully resident (v7x 64 MiB VMEM).
    for h in range(num_heads):                   # small num_heads; per-head work is
        c0 = h * head_dim                        # attention only (no weights here)
        qh = qf[:, c0:c0 + head_dim]             # (q_N, hd) f32 (rel-pos + residual)
        qh_b = qh.astype(bf16)
        kh = kf[:, c0:c0 + head_dim]
        vh = vf[:, c0:c0 + head_dim]

        s = _mm_t(qh_b, kh)                      # (q_N, k_N) already-scaled scores

        # rel-pos: mask -> fold to compact (q_N, k_h)/(q_N, k_w) -> expand to k_N
        relh = _mm((_mm_t(qh_b, rh) * mh).astype(bf16), fh)   # (q_N, k_h)
        relw = _mm((_mm_t(qh_b, rw) * mw).astype(bf16), fw)   # (q_N, k_w)
        s = s + _mm(relh.astype(bf16), eh) + _mm(relw.astype(bf16), ew)

        # softmax with deferred normalization: normalize the (q_N, hd) attention
        # output with an EUP reciprocal, not the (q_N, k_N) probability matrix.
        m = jnp.max(s, axis=-1, keepdims=True)
        e = jnp.exp(s - m)
        l = jnp.sum(e, axis=-1, keepdims=True)
        oh_un = _mm(e.astype(bf16), vh)          # (q_N, hd) unnormalized attn @ v
        inv_l = pl.reciprocal(l, approx=True)
        # residual pooling (+ qh) is added AFTER the 1/l scaling.
        oacc_ref[:, c0:c0 + head_dim] = oh_un * inv_l + qh

    # Fused output projection across heads (contraction = dim_out) + bias;
    # lane-dense (dim_pad) unmasked store.
    o_ref[0] = _mm(oacc_ref[...].astype(bf16), wp_ref[...]) + bp_ref[...]


def prepare_msa_params(params, *, num_heads, hw_shape):
    """One-time (per-module) prep of weights / rel-pos tables / mask constants.

    Call once and reuse across forward calls so the reshape/pad/transpose HBM
    traffic stays out of the per-call path.
    """
    bf16 = jnp.bfloat16
    H, W = hw_shape
    Wq, Wk, Wv, Wp, bp = (params["Wq"], params["Wk"], params["Wv"],
                          params["Wp"], params["bp"])
    rel_pos_h, rel_pos_w = params["rel_pos_h"], params["rel_pos_w"]

    dim = Wq.shape[1]
    dim_out = Wq.shape[0]
    head_dim = dim_out // num_heads
    scale = head_dim ** (-0.5)

    # AvgPool2d(kernel=3, stride=2, padding=1, ceil_mode=False) output size.
    q_h = (H + 2 - 3) // 2 + 1
    q_w = (W + 2 - 3) // 2 + 1
    k_h, k_w = H, W
    q_N, k_N = q_h * q_w, k_h * k_w

    # lane-dense output: pad dim_out up to a multiple of 128 for an unmasked store.
    dim_pad = ((dim_out + 127) // 128) * 128

    # relative-position index tables (matches cal_rel_pos_spatial)
    q_h_ratio = max(k_h / q_h, 1.0); k_h_ratio = max(q_h / k_h, 1.0)
    dist_h = (jnp.arange(q_h)[:, None] * q_h_ratio
              - jnp.arange(k_h)[None, :] * k_h_ratio
              + (k_h - 1) * k_h_ratio).astype(jnp.int32)
    q_w_ratio = max(k_w / q_w, 1.0); k_w_ratio = max(q_w / k_w, 1.0)
    dist_w = (jnp.arange(q_w)[:, None] * q_w_ratio
              - jnp.arange(k_w)[None, :] * k_w_ratio
              + (k_w - 1) * k_w_ratio).astype(jnp.int32)
    RhF = rel_pos_h[dist_h].reshape(q_h * k_h, head_dim).astype(bf16)
    RwF = rel_pos_w[dist_w].reshape(q_w * k_w, head_dim).astype(bf16)

    hn = jnp.arange(q_N) // q_w
    wn = jnp.arange(q_N) % q_w
    jH = jnp.arange(q_h * k_h)
    jW = jnp.arange(q_w * k_w)
    MaskH = (hn[:, None] == (jH // k_h)[None, :]).astype(bf16)   # 0/1 exact in bf16
    MaskW = (wn[:, None] == (jW // k_w)[None, :]).astype(bf16)
    FoldH = ((jH % k_h)[:, None] == jnp.arange(k_h)[None, :]).astype(bf16)
    FoldW = ((jW % k_w)[:, None] == jnp.arange(k_w)[None, :]).astype(bf16)
    ExpandH = (jnp.arange(k_h)[:, None] == (jnp.arange(k_N) // k_w)[None, :]).astype(bf16)
    ExpandW = (jnp.arange(k_w)[:, None] == (jnp.arange(k_N) % k_w)[None, :]).astype(bf16)

    # Fused projection weights.  The softmax scale is folded into Wk (only the
    # score matmul consumes K) so q stays unscaled for rel-pos and the residual.
    Wq_f = Wq.T.astype(bf16)                                     # (dim, dim_out)
    Wk_f = (Wk * scale).T.astype(bf16)
    Wv_f = Wv.T.astype(bf16)
    Wp_f = jnp.pad(Wp.T, ((0, 0), (0, dim_pad - dim_out))).astype(bf16)
    bp_f = jnp.pad(bp, (0, dim_pad - dim_out)).reshape(1, dim_pad).astype(jnp.float32)

    return dict(num_heads=num_heads, head_dim=head_dim, dim=dim, dim_out=dim_out,
                dim_pad=dim_pad, hw_shape=(H, W), q_hw=(q_h, q_w),
                Wq=Wq_f, Wk=Wk_f, Wv=Wv_f, Wp=Wp_f, bp=bp_f,
                Rh=RhF, Rw=RwF, MaskH=MaskH, MaskW=MaskW,
                FoldH=FoldH, FoldW=FoldW, ExpandH=ExpandH, ExpandW=ExpandW)


def multiscale_attention_pallas(x, prep):
    B, C, H, W = x.shape
    assert (H, W) == prep["hw_shape"]
    dim = prep["dim"]
    assert C == dim
    num_heads, head_dim = prep["num_heads"], prep["head_dim"]
    dim_out, dim_pad = prep["dim_out"], prep["dim_pad"]
    q_h, q_w = prep["q_hw"]
    N, q_N = H * W, q_h * q_w
    bf16 = jnp.bfloat16

    # NCHW -> NHWC once (needed for the pooling anyway); the token stream is a
    # free contiguous reshape of the same tensor (no extra transpose round trip).
    x_nhwc = jnp.transpose(x, (0, 2, 3, 1))
    x_tok = x_nhwc.reshape(B, N, C).astype(bf16)

    # AvgPool2d(kernel=3, stride=2, pad=1, count_include_pad=True) on the query path.
    pooled = jax.lax.reduce_window(
        x_nhwc.astype(jnp.float32), 0.0, jax.lax.add,
        (1, 3, 3, 1), (1, 2, 2, 1), ((0, 0), (1, 1), (1, 1), (0, 0))) / 9.0
    assert pooled.shape[1] == q_h and pooled.shape[2] == q_w
    q_tok = pooled.reshape(B, q_N, C).astype(bf16)

    kernel = functools.partial(_msa_kernel, num_heads, head_dim)

    consts = [prep["Wq"], prep["Wk"], prep["Wv"], prep["Wp"], prep["bp"],
              prep["Rh"], prep["Rw"], prep["MaskH"], prep["MaskW"],
              prep["FoldH"], prep["FoldW"], prep["ExpandH"], prep["ExpandW"]]

    def const_spec(arr):
        nd = arr.ndim
        return pl.BlockSpec(arr.shape, lambda b, _nd=nd: (0,) * _nd)

    in_specs = ([pl.BlockSpec((1, q_N, dim), lambda b: (b, 0, 0)),
                 pl.BlockSpec((1, N, dim), lambda b: (b, 0, 0))]
                + [const_spec(a) for a in consts])

    # TODO(synk): for B == 1 on v7x, add a q_N-tile (or head) grid axis marked
    # "parallel" so the second TensorCore is not idle.
    out_pad = pl.pallas_call(
        kernel,
        out_shape=jax.ShapeDtypeStruct((B, q_N, dim_pad), jnp.float32),
        grid=(B,),
        in_specs=in_specs,
        out_specs=pl.BlockSpec((1, q_N, dim_pad), lambda b: (b, 0, 0)),
        scratch_shapes=[pltpu.VMEM((q_N, dim_out), jnp.float32)],
        compiler_params=pltpu.CompilerParams(
            dimension_semantics=("parallel",),
            vmem_limit_bytes=48 * 1024 * 1024),
    )(q_tok, x_tok, *consts)

    out_tok = out_pad[..., :dim_out]
    # x_dim == 4 path of the PyTorch module: back to NCHW on the pooled grid.
    return jnp.transpose(out_tok.reshape(B, q_h, q_w, dim_out), (0, 3, 1, 2))


def multiscale_attention_ref(x, params, *, num_heads, hw_shape):
    """Pure-JAX reference mirroring the PyTorch forward (for verification)."""
    B, C, H, W = x.shape
    Wq, Wk, Wv, Wp, bp = params["Wq"], params["Wk"], params["Wv"], params["Wp"], params["bp"]
    rel_pos_h, rel_pos_w = params["rel_pos_h"], params["rel_pos_w"]
    dim_out = Wq.shape[0]
    head_dim = dim_out // num_heads
    scale = head_dim ** (-0.5)
    N = H * W
    x_tok = jnp.transpose(x.reshape(B, C, N), (0, 2, 1))

    xs = x_tok.reshape(B, H, W, C)
    pooled = jax.lax.reduce_window(
        xs, 0.0, jax.lax.add, (1, 3, 3, 1), (1, 2, 2, 1),
        ((0, 0), (1, 1), (1, 1), (0, 0))) / 9.0       # AvgPool2d count_include_pad=True
    q_h, q_w = pooled.shape[1], pooled.shape[2]
    q_N = q_h * q_w

    q = pooled.reshape(B, q_N, C) @ Wq.T
    k = x_tok @ Wk.T
    v = x_tok @ Wv.T

    def heads(t):
        return jnp.transpose(t.reshape(B, t.shape[1], num_heads, head_dim), (0, 2, 1, 3))

    q, k, v = heads(q), heads(k), heads(v)
    attn = jnp.einsum('bhqd,bhkd->bhqk', q * scale, k)

    k_h, k_w = H, W
    q_h_ratio = max(k_h / q_h, 1.0); k_h_ratio = max(q_h / k_h, 1.0)
    dist_h = (jnp.arange(q_h)[:, None] * q_h_ratio
              - jnp.arange(k_h)[None, :] * k_h_ratio + (k_h - 1) * k_h_ratio).astype(jnp.int32)
    q_w_ratio = max(k_w / q_w, 1.0); k_w_ratio = max(q_w / k_w, 1.0)
    dist_w = (jnp.arange(q_w)[:, None] * q_w_ratio
              - jnp.arange(k_w)[None, :] * k_w_ratio + (k_w - 1) * k_w_ratio).astype(jnp.int32)
    Rh = rel_pos_h[dist_h]
    Rw = rel_pos_w[dist_w]
    r_q = q.reshape(B, num_heads, q_h, q_w, head_dim)
    rel_h = jnp.einsum('byhwc,hkc->byhwk', r_q, Rh)
    rel_w = jnp.einsum('byhwc,wkc->byhwk', r_q, Rw)
    attn = (attn.reshape(B, num_heads, q_h, q_w, k_h, k_w)
            + rel_h[..., None] + rel_w[..., None, :]).reshape(B, num_heads, q_N, k_h * k_w)
    attn = jax.nn.softmax(attn, axis=-1)

    o = jnp.einsum('bhqk,bhkd->bhqd', attn, v) + q
    o = jnp.transpose(o, (0, 2, 1, 3)).reshape(B, q_N, dim_out)
    o = o @ Wp.T + bp
    return jnp.transpose(o.reshape(B, q_h, q_w, dim_out), (0, 3, 1, 2))


if __name__ == "__main__":
    key = jax.random.PRNGKey(0)
    B, dim, dim_out, num_heads, H, W = 2, 64, 64, 4, 16, 16
    head_dim = dim_out // num_heads
    # stride_q=(2,2), stride_kv=(1,1): q_size=H//2, kv_size=H, rel_sp_dim=2*max-1
    rel_sp_dim = 2 * max(H // 2, H) - 1

    ks = jax.random.split(key, 8)
    params = dict(
        Wq=jax.random.normal(ks[0], (dim_out, dim), jnp.float32) / jnp.sqrt(dim),
        Wk=jax.random.normal(ks[1], (dim_out, dim), jnp.float32) / jnp.sqrt(dim),
        Wv=jax.random.normal(ks[2], (dim_out, dim), jnp.float32) / jnp.sqrt(dim),
        Wp=jax.random.normal(ks[3], (dim_out, dim_out), jnp.float32) / jnp.sqrt(dim_out),
        bp=jax.random.normal(ks[4], (dim_out,), jnp.float32) * 0.02,
        # trunc_normal_(std=0.02) approximated by a plain scaled normal (init only)
        rel_pos_h=jax.random.normal(ks[5], (rel_sp_dim, head_dim), jnp.float32) * 0.02,
        rel_pos_w=jax.random.normal(ks[6], (rel_sp_dim, head_dim), jnp.float32) * 0.02,
    )
    x = jax.random.normal(ks[7], (B, dim, H, W), jnp.float32)   # NCHW, like PyTorch

    prep = prepare_msa_params(params, num_heads=num_heads, hw_shape=(H, W))
    out = multiscale_attention_pallas(x, prep)
    out = jax.block_until_ready(out)

    ref = multiscale_attention_ref(x, params, num_heads=num_heads, hw_shape=(H, W))
    # bf16 MXU operands in the kernel (f32 accumulation) vs f32 reference.
    np.testing.assert_allclose(np.asarray(out), np.asarray(ref), rtol=5e-2, atol=5e-2)
    print("KERNEL_OK")
</pallas_src>

<mosaic_0001>
module attributes {stable_mosaic.version = 11 : i64} {
  func.func @_msa_kernel(%arg0: i32, %arg1: memref<1x64x64xbf16, #tpu.memory_space<vmem>>, %arg2: memref<1x256x64xbf16, #tpu.memory_space<vmem>>, %arg3: memref<64x64xbf16, #tpu.memory_space<vmem>>, %arg4: memref<64x64xbf16, #tpu.memory_space<vmem>>, %arg5: memref<64x64xbf16, #tpu.memory_space<vmem>>, %arg6: memref<64x128xbf16, #tpu.memory_space<vmem>>, %arg7: memref<1x128xf32, #tpu.memory_space<vmem>>, %arg8: memref<128x16xbf16, #tpu.memory_space<vmem>>, %arg9: memref<128x16xbf16, #tpu.memory_space<vmem>>, %arg10: memref<64x128xbf16, #tpu.memory_space<vmem>>, %arg11: memref<64x128xbf16, #tpu.memory_space<vmem>>, %arg12: memref<128x16xbf16, #tpu.memory_space<vmem>>, %arg13: memref<128x16xbf16, #tpu.memory_space<vmem>>, %arg14: memref<16x256xbf16, #tpu.memory_space<vmem>>, %arg15: memref<16x256xbf16, #tpu.memory_space<vmem>>, %arg16: memref<1x64x128xf32, #tpu.memory_space<vmem>>, %arg17: memref<64x64xf32, #tpu.memory_space<vmem>>) attributes {dimension_semantics = [#tpu.dimension_semantics<parallel>], iteration_bounds = array<i64: 2>, scalar_prefetch = 0 : i64, scratch_operands = 1 : i64, tpu.core_type = #tpu.core_type<tc>, window_params = [{transform_indices = @transform_0, window_bounds = array<i64: 1, 64, 64>}, {transform_indices = @transform_1, window_bounds = array<i64: 1, 256, 64>}, {pipeline_mode = #tpu.pipeline_mode<synchronous>, transform_indices = @transform_2, window_bounds = array<i64: 64, 64>}, {pipeline_mode = #tpu.pipeline_mode<synchronous>, transform_indices = @transform_3, window_bounds = array<i64: 64, 64>}, {pipeline_mode = #tpu.pipeline_mode<synchronous>, transform_indices = @transform_4, window_bounds = array<i64: 64, 64>}, {pipeline_mode = #tpu.pipeline_mode<synchronous>, transform_indices = @transform_5, window_bounds = array<i64: 64, 128>}, {pipeline_mode = #tpu.pipeline_mode<synchronous>, transform_indices = @transform_6, window_bounds = array<i64: 1, 128>}, {pipeline_mode = #tpu.pipeline_mode<synchronous>, transform_indices = @transform_7, window_bounds = array<i64: 128, 16>}, {pipeline_mode = #tpu.pipeline_mode<synchronous>, transform_indices = @transform_8, window_bounds = array<i64: 128, 16>}, {pipeline_mode = #tpu.pipeline_mode<synchronous>, transform_indices = @transform_9, window_bounds = array<i64: 64, 128>}, {pipeline_mode = #tpu.pipeline_mode<synchronous>, transform_indices = @transform_10, window_bounds = array<i64: 64, 128>}, {pipeline_mode = #tpu.pipeline_mode<synchronous>, transform_indices = @transform_11, window_bounds = array<i64: 128, 16>}, {pipeline_mode = #tpu.pipeline_mode<synchronous>, transform_indices = @transform_12, window_bounds = array<i64: 128, 16>}, {pipeline_mode = #tpu.pipeline_mode<synchronous>, transform_indices = @transform_13, window_bounds = array<i64: 16, 256>}, {pipeline_mode = #tpu.pipeline_mode<synchronous>, transform_indices = @transform_14, window_bounds = array<i64: 16, 256>}, {transform_indices = @transform_15, window_bounds = array<i64: 1, 64, 128>}]} {
    %c0 = arith.constant 0 : index
    %c0_0 = arith.constant 0 : index
    %c0_1 = arith.constant 0 : index
    %0 = vector.load %arg1[%c0, %c0_0, %c0_1] : memref<1x64x64xbf16, #tpu.memory_space<vmem>>, vector<1x64x64xbf16>
    %1 = vector.shape_cast %0 : vector<1x64x64xbf16> to vector<64x64xbf16>
    %c0_2 = arith.constant 0 : index
    %c0_3 = arith.constant 0 : index
    %c0_4 = arith.constant 0 : index
    %2 = vector.load %arg2[%c0_2, %c0_3, %c0_4] : memref<1x256x64xbf16, #tpu.memory_space<vmem>>, vector<1x256x64xbf16>
    %3 = vector.shape_cast %2 : vector<1x256x64xbf16> to vector<256x64xbf16>
    %c0_5 = arith.constant 0 : index
    %c0_6 = arith.constant 0 : index
    %4 = vector.load %arg3[%c0_5, %c0_6] : memref<64x64xbf16, #tpu.memory_space<vmem>>, vector<64x64xbf16>
    %cst = arith.constant dense<0.000000e+00> : vector<64x64xf32>
    %5 = tpu.matmul %1, %4, %cst {dimension_numbers = #tpu.dot_dimension_numbers<[1], [0], [0], [1], [0, 0, 1, 1], [], []>} : vector<64x64xbf16>, vector<64x64xbf16>, vector<64x64xf32> -> vector<64x64xf32>
    %c0_7 = arith.constant 0 : index
    %c0_8 = arith.constant 0 : index
    %6 = vector.load %arg4[%c0_7, %c0_8] : memref<64x64xbf16, #tpu.memory_space<vmem>>, vector<64x64xbf16>
    %cst_9 = arith.constant dense<0.000000e+00> : vector<256x64xf32>
    %7 = tpu.matmul %3, %6, %cst_9 {dimension_numbers = #tpu.dot_dimension_numbers<[1], [0], [0], [1], [0, 0, 1, 1], [], []>} : vector<256x64xbf16>, vector<64x64xbf16>, vector<256x64xf32> -> vector<256x64xf32>
    %8 = arith.truncf %7 : vector<256x64xf32> to vector<256x64xbf16>
    %c0_10 = arith.constant 0 : index
    %c0_11 = arith.constant 0 : index
    %9 = vector.load %arg5[%c0_10, %c0_11] : memref<64x64xbf16, #tpu.memory_space<vmem>>, vector<64x64xbf16>
    %cst_12 = arith.constant dense<0.000000e+00> : vector<256x64xf32>
    %10 = tpu.matmul %3, %9, %cst_12 {dimension_numbers = #tpu.dot_dimension_numbers<[1], [0], [0], [1], [0, 0, 1, 1], [], []>} : vector<256x64xbf16>, vector<64x64xbf16>, vector<256x64xf32> -> vector<256x64xf32>
    %11 = arith.truncf %10 : vector<256x64xf32> to vector<256x64xbf16>
    %c0_13 = arith.constant 0 : index
    %c0_14 = arith.constant 0 : index
    %12 = vector.load %arg8[%c0_13, %c0_14] : memref<128x16xbf16, #tpu.memory_space<vmem>>, vector<128x16xbf16>
    %c0_15 = arith.constant 0 : index
    %c0_16 = arith.constant 0 : index
    %13 = vector.load %arg9[%c0_15, %c0_16] : memref<128x16xbf16, #tpu.memory_space<vmem>>, vector<128x16xbf16>
    %c0_17 = arith.constant 0 : index
    %c0_18 = arith.constant 0 : index
    %14 = vector.load %arg10[%c0_17, %c0_18] : memref<64x128xbf16, #tpu.memory_space<vmem>>, vector<64x128xbf16>
    %c0_19 = arith.constant 0 : index
    %c0_20 = arith.constant 0 : index
    %15 = vector.load %arg11[%c0_19, %c0_20] : memref<64x128xbf16, #tpu.memory_space<vmem>>, vector<64x128xbf16>
    %c0_21 = arith.constant 0 : index
    %c0_22 = arith.constant 0 : index
    %16 = vector.load %arg12[%c0_21, %c0_22] : memref<128x16xbf16, #tpu.memory_space<vmem>>, vector<128x16xbf16>
    %c0_23 = arith.constant 0 : index
    %c0_24 = arith.constant 0 : index
    %17 = vector.load %arg13[%c0_23, %c0_24] : memref<128x16xbf16, #tpu.memory_space<vmem>>, vector<128x16xbf16>
    %c0_25 = arith.constant 0 : index
    %c0_26 = arith.constant 0 : index
    %18 = vector.load %arg14[%c0_25, %c0_26] : memref<16x256xbf16, #tpu.memory_space<vmem>>, vector<16x256xbf16>
    %c0_27 = arith.constant 0 : index
    %c0_28 = arith.constant 0 : index
    %19 = vector.load %arg15[%c0_27, %c0_28] : memref<16x256xbf16, #tpu.memory_space<vmem>>, vector<16x256xbf16>
    %20 = vector.extract_strided_slice %5 {offsets = [0, 0], sizes = [64, 16], strides = [1, 1]} : vector<64x64xf32> to vector<64x16xf32>
    %21 = arith.truncf %20 : vector<64x16xf32> to vector<64x16xbf16>
    %22 = vector.extract_strided_slice %8 {offsets = [0, 0], sizes = [256, 16], strides = [1, 1]} : vector<256x64xbf16> to vector<256x16xbf16>
    %23 = vector.extract_strided_slice %11 {offsets = [0, 0], sizes = [256, 16], strides = [1, 1]} : vector<256x64xbf16> to vector<256x16xbf16>
    %cst_29 = arith.constant dense<0.000000e+00> : vector<64x256xf32>
    %24 = tpu.matmul %21, %22, %cst_29 {dimension_numbers = #tpu.dot_dimension_numbers<[1], [1], [0], [0], [0, 0, 1, 0], [], []>} : vector<64x16xbf16>, vector<256x16xbf16>, vector<64x256xf32> -> vector<64x256xf32>
    %cst_30 = arith.constant dense<0.000000e+00> : vector<64x128xf32>
    %25 = tpu.matmul %21, %12, %cst_30 {dimension_numbers = #tpu.dot_dimension_numbers<[1], [1], [0], [0], [0, 0, 1, 0], [], []>} : vector<64x16xbf16>, vector<128x16xbf16>, vector<64x128xf32> -> vector<64x128xf32>
    %26 = arith.extf %14 : vector<64x128xbf16> to vector<64x128xf32>
    %27 = arith.mulf %25, %26 : vector<64x128xf32>
    %28 = arith.truncf %27 : vector<64x128xf32> to vector<64x128xbf16>
    %cst_31 = arith.constant dense<0.000000e+00> : vector<64x16xf32>
    %29 = tpu.matmul %28, %16, %cst_31 {dimension_numbers = #tpu.dot_dimension_numbers<[1], [0], [0], [1], [0, 0, 1, 1], [], []>} : vector<64x128xbf16>, vector<128x16xbf16>, vector<64x16xf32> -> vector<64x16xf32>
    %cst_32 = arith.constant dense<0.000000e+00> : vector<64x128xf32>
    %30 = tpu.matmul %21, %13, %cst_32 {dimension_numbers = #tpu.dot_dimension_numbers<[1], [1], [0], [0], [0, 0, 1, 0], [], []>} : vector<64x16xbf16>, vector<128x16xbf16>, vector<64x128xf32> -> vector<64x128xf32>
    %31 = arith.extf %15 : vector<64x128xbf16> to vector<64x128xf32>
    %32 = arith.mulf %30, %31 : vector<64x128xf32>
    %33 = arith.truncf %32 : vector<64x128xf32> to vector<64x128xbf16>
    %cst_33 = arith.constant dense<0.000000e+00> : vector<64x16xf32>
    %34 = tpu.matmul %33, %17, %cst_33 {dimension_numbers = #tpu.dot_dimension_numbers<[1], [0], [0], [1], [0, 0, 1, 1], [], []>} : vector<64x128xbf16>, vector<128x16xbf16>, vector<64x16xf32> -> vector<64x16xf32>
    %35 = arith.truncf %29 : vector<64x16xf32> to vector<64x16xbf16>
    %cst_34 = arith.constant dense<0.000000e+00> : vector<64x256xf32>
    %36 = tpu.matmul %35, %18, %cst_34 {dimension_numbers = #tpu.dot_dimension_numbers<[1], [0], [0], [1], [0, 0, 1, 1], [], []>} : vector<64x16xbf16>, vector<16x256xbf16>, vector<64x256xf32> -> vector<64x256xf32>
    %37 = arith.addf %24, %36 : vector<64x256xf32>
    %38 = arith.truncf %34 : vector<64x16xf32> to vector<64x16xbf16>
    %cst_35 = arith.constant dense<0.000000e+00> : vector<64x256xf32>
    %39 = tpu.matmul %38, %19, %cst_35 {dimension_numbers = #tpu.dot_dimension_numbers<[1], [0], [0], [1], [0, 0, 1, 1], [], []>} : vector<64x16xbf16>, vector<16x256xbf16>, vector<64x256xf32> -> vector<64x256xf32>
    %40 = arith.addf %37, %39 : vector<64x256xf32>
    %cst_36 = arith.constant dense<0xFF800000> : vector<64xf32>
    %41 = vector.multi_reduction <maximumf>, %40, %cst_36 [1] : vector<64x256xf32> to vector<64xf32>
    %42 = vector.shape_cast %41 : vector<64xf32> to vector<64x1xf32>
    %43 = vector.broadcast %42 : vector<64x1xf32> to vector<64x256xf32>
    %44 = arith.subf %40, %43 : vector<64x256xf32>
    %45 = math.exp %44 : vector<64x256xf32>
    %cst_37 = arith.constant dense<0.000000e+00> : vector<64xf32>
    %46 = vector.multi_reduction <add>, %45, %cst_37 [1] : vector<64x256xf32> to vector<64xf32>
    %47 = vector.shape_cast %46 : vector<64xf32> to vector<64x1xf32>
    %48 = arith.truncf %45 : vector<64x256xf32> to vector<64x256xbf16>
    %cst_38 = arith.constant dense<0.000000e+00> : vector<64x16xf32>
    %49 = tpu.matmul %48, %23, %cst_38 {dimension_numbers = #tpu.dot_dimension_numbers<[1], [0], [0], [1], [0, 0, 1, 1], [], []>} : vector<64x256xbf16>, vector<256x16xbf16>, vector<64x16xf32> -> vector<64x16xf32>
    %50 = tpu.reciprocal %47 {approx = true} : vector<64x1xf32> -> vector<64x1xf32>
    %51 = vector.broadcast %50 : vector<64x1xf32> to vector<64x16xf32>
    %52 = arith.mulf %49, %51 : vector<64x16xf32>
    %53 = arith.addf %52, %20 : vector<64x16xf32>
    %c0_39 = arith.constant 0 : index
    %c0_40 = arith.constant 0 : index
    %54 = vector.load %arg17[%c0_39, %c0_40] : memref<64x64xf32, #tpu.memory_space<vmem>>, vector<64x16xf32>
    tpu.vector_store %arg17[%c0_39, %c0_40], %53 {strides = array<i32>} : memref<64x64xf32, #tpu.memory_space<vmem>>, vector<64x16xf32>,
    %55 = vector.extract_strided_slice %5 {offsets = [0, 16], sizes = [64, 16], strides = [1, 1]} : vector<64x64xf32> to vector<64x16xf32>
    %56 = arith.truncf %55 : vector<64x16xf32> to vector<64x16xbf16>
    %57 = vector.extract_strided_slice %8 {offsets = [0, 16], sizes = [256, 16], strides = [1, 1]} : vector<256x64xbf16> to vector<256x16xbf16>
    %58 = vector.extract_strided_slice %11 {offsets = [0, 16], sizes = [256, 16], strides = [1, 1]} : vector<256x64xbf16> to vector<256x16xbf16>
    %cst_41 = arith.constant dense<0.000000e+00> : vector<64x256xf32>
    %59 = tpu.matmul %56, %57, %cst_41 {dimension_numbers = #tpu.dot_dimension_numbers<[1], [1], [0], [0], [0, 0, 1, 0], [], []>} : vector<64x16xbf16>, vector<256x16xbf16>, vector<64x256xf32> -> vector<64x256xf32>
    %cst_42 = arith.constant dense<0.000000e+00> : vector<64x128xf32>
    %60 = tpu.matmul %56, %12, %cst_42 {dimension_numbers = #tpu.dot_dimension_numbers<[1], [1], [0], [0], [0, 0, 1, 0], [], []>} : vector<64x16xbf16>, vector<128x16xbf16>, vector<64x128xf32> -> vector<64x128xf32>
    %61 = arith.extf %14 : vector<64x128xbf16> to vector<64x128xf32>
    %62 = arith.mulf %60, %61 : vector<64x128xf32>
    %63 = arith.truncf %62 : vector<64x128xf32> to vector<64x128xbf16>
    %cst_43 = arith.constant dense<0.000000e+00> : vector<64x16xf32>
    %64 = tpu.matmul %63, %16, %cst_43 {dimension_numbers = #tpu.dot_dimension_numbers<[1], [0], [0], [1], [0, 0, 1, 1], [], []>} : vector<64x128xbf16>, vector<128x16xbf16>, vector<64x16xf32> -> vector<64x16xf32>
    %cst_44 = arith.constant dense<0.000000e+00> : vector<64x128xf32>
    %65 = tpu.matmul %56, %13, %cst_44 {dimension_numbers = #tpu.dot_dimension_numbers<[1], [1], [0], [0], [0, 0, 1, 0], [], []>} : vector<64x16xbf16>, vector<128x16xbf16>, vector<64x128xf32> -> vector<64x128xf32>
    %66 = arith.extf %15 : vector<64x128xbf16> to vector<64x128xf32>
    %67 = arith.mulf %65, %66 : vector<64x128xf32>
    %68 = arith.truncf %67 : vector<64x128xf32> to vector<64x128xbf16>
    %cst_45 = arith.constant dense<0.000000e+00> : vector<64x16xf32>
    %69 = tpu.matmul %68, %17, %cst_45 {dimension_numbers = #tpu.dot_dimension_numbers<[1], [0], [0], [1], [0, 0, 1, 1], [], []>} : vector<64x128xbf16>, vector<128x16xbf16>, vector<64x16xf32> -> vector<64x16xf32>
    %70 = arith.truncf %64 : vector<64x16xf32> to vector<64x16xbf16>
    %cst_46 = arith.constant dense<0.000000e+00> : vector<64x256xf32>
    %71 = tpu.matmul %70, %18, %cst_46 {dimension_numbers = #tpu.dot_dimension_numbers<[1], [0], [0], [1], [0, 0, 1, 1], [], []>} : vector<64x16xbf16>, vector<16x256xbf16>, vector<64x256xf32> -> vector<64x256xf32>
    %72 = arith.addf %59, %71 : vector<64x256xf32>
    %73 = arith.truncf %69 : vector<64x16xf32> to vector<64x16xbf16>
    %cst_47 = arith.constant dense<0.000000e+00> : vector<64x256xf32>
    %74 = tpu.matmul %73, %19, %cst_47 {dimension_numbers = #tpu.dot_dimension_numbers<[1], [0], [0], [1], [0, 0, 1, 1], [], []>} : vector<64x16xbf16>, vector<16x256xbf16>, vector<64x256xf32> -> vector<64x256xf32>
    %75 = arith.addf %72, %74 : vector<64x256xf32>
    %cst_48 = arith.constant dense<0xFF800000> : vector<64xf32>
    %76 = vector.multi_reduction <maximumf>, %75, %cst_48 [1] : vector<64x256xf32> to vector<64xf32>
    %77 = vector.shape_cast %76 : vector<64xf32> to vector<64x1xf32>
    %78 = vector.broadcast %77 : vector<64x1xf32> to vector<64x256xf32>
    %79 = arith.subf %75, %78 : vector<64x256xf32>
    %80 = math.exp %79 : vector<64x256xf32>
    %cst_49 = arith.constant dense<0.000000e+00> : vector<64xf32>
    %81 = vector.multi_reduction <add>, %80, %cst_49 [1] : vector<64x256xf32> to vector<64xf32>
    %82 = vector.shape_cast %81 : vector<64xf32> to vector<64x1xf32>
    %83 = arith.truncf %80 : vector<64x256xf32> to vector<64x256xbf16>
    %cst_50 = arith.constant dense<0.000000e+00> : vector<64x16xf32>
    %84 = tpu.matmul %83, %58, %cst_50 {dimension_numbers = #tpu.dot_dimension_numbers<[1], [0], [0], [1], [0, 0, 1, 1], [], []>} : vector<64x256xbf16>, vector<256x16xbf16>, vector<64x16xf32> -> vector<64x16xf32>
    %85 = tpu.reciprocal %82 {approx = true} : vector<64x1xf32> -> vector<64x1xf32>
    %86 = vector.broadcast %85 : vector<64x1xf32> to vector<64x16xf32>
    %87 = arith.mulf %84, %86 : vector<64x16xf32>
    %88 = arith.addf %87, %55 : vector<64x16xf32>
    %c0_51 = arith.constant 0 : index
    %c16 = arith.constant 16 : index
    %89 = vector.load %arg17[%c0_51, %c16] : memref<64x64xf32, #tpu.memory_space<vmem>>, vector<64x16xf32>
    tpu.vector_store %arg17[%c0_51, %c16], %88 {strides = array<i32>} : memref<64x64xf32, #tpu.memory_space<vmem>>, vector<64x16xf32>,
    %90 = vector.extract_strided_slice %5 {offsets = [0, 32], sizes = [64, 16], strides = [1, 1]} : vector<64x64xf32> to vector<64x16xf32>
    %91 = arith.truncf %90 : vector<64x16xf32> to vector<64x16xbf16>
    %92 = vector.extract_strided_slice %8 {offsets = [0, 32], sizes = [256, 16], strides = [1, 1]} : vector<256x64xbf16> to vector<256x16xbf16>
    %93 = vector.extract_strided_slice %11 {offsets = [0, 32], sizes = [256, 16], strides = [1, 1]} : vector<256x64xbf16> to vector<256x16xbf16>
    %cst_52 = arith.constant dense<0.000000e+00> : vector<64x256xf32>
    %94 = tpu.matmul %91, %92, %cst_52 {dimension_numbers = #tpu.dot_dimension_numbers<[1], [1], [0], [0], [0, 0, 1, 0], [], []>} : vector<64x16xbf16>, vector<256x16xbf16>, vector<64x256xf32> -> vector<64x256xf32>
    %cst_53 = arith.constant dense<0.000000e+00> : vector<64x128xf32>
    %95 = tpu.matmul %91, %12, %cst_53 {dimension_numbers = #tpu.dot_dimension_numbers<[1], [1], [0], [0], [0, 0, 1, 0], [], []>} : vector<64x16xbf16>, vector<128x16xbf16>, vector<64x128xf32> -> vector<64x128xf32>
    %96 = arith.extf %14 : vector<64x128xbf16> to vector<64x128xf32>
    %97 = arith.mulf %95, %96 : vector<64x128xf32>
    %98 = arith.truncf %97 : vector<64x128xf32> to vector<64x128xbf16>
    %cst_54 = arith.constant dense<0.000000e+00> : vector<64x16xf32>
    %99 = tpu.matmul %98, %16, %cst_54 {dimension_numbers = #tpu.dot_dimension_numbers<[1], [0], [0], [1], [0, 0, 1, 1], [], []>} : vector<64x128xbf16>, vector<128x16xbf16>, vector<64x16xf32> -> vector<64x16xf32>
    %cst_55 = arith.constant dense<0.000000e+00> : vector<64x128xf32>
    %100 = tpu.matmul %91, %13, %cst_55 {dimension_numbers = #tpu.dot_dimension_numbers<[1], [1], [0], [0], [0, 0, 1, 0], [], []>} : vector<64x16xbf16>, vector<128x16xbf16>, vector<64x128xf32> -> vector<64x128xf32>
    %101 = arith.extf %15 : vector<64x128xbf16> to vector<64x128xf32>
    %102 = arith.mulf %100, %101 : vector<64x128xf32>
    %103 = arith.truncf %102 : vector<64x128xf32> to vector<64x128xbf16>
    %cst_56 = arith.constant dense<0.000000e+00> : vector<64x16xf32>
    %104 = tpu.matmul %103, %17, %cst_56 {dimension_numbers = #tpu.dot_dimension_numbers<[1], [0], [0], [1], [0, 0, 1, 1], [], []>} : vector<64x128xbf16>, vector<128x16xbf16>, vector<64x16xf32> -> vector<64x16xf32>
    %105 = arith.truncf %99 : vector<64x16xf32> to vector<64x16xbf16>
    %cst_57 = arith.constant dense<0.000000e+00> : vector<64x256xf32>
    %106 = tpu.matmul %105, %18, %cst_57 {dimension_numbers = #tpu.dot_dimension_numbers<[1], [0], [0], [1], [0, 0, 1, 1], [], []>} : vector<64x16xbf16>, vector<16x256xbf16>, vector<64x256xf32> -> vector<64x256xf32>
    %107 = arith.addf %94, %106 : vector<64x256xf32>
    %108 = arith.truncf %104 : vector<64x16xf32> to vector<64x16xbf16>
    %cst_58 = arith.constant dense<0.000000e+00> : vector<64x256xf32>
    %109 = tpu.matmul %108, %19, %cst_58 {dimension_numbers = #tpu.dot_dimension_numbers<[1], [0], [0], [1], [0, 0, 1, 1], [], []>} : vector<64x16xbf16>, vector<16x256xbf16>, vector<64x256xf32> -> vector<64x256xf32>
    %110 = arith.addf %107, %109 : vector<64x256xf32>
    %cst_59 = arith.constant dense<0xFF800000> : vector<64xf32>
    %111 = vector.multi_reduction <maximumf>, %110, %cst_59 [1] : vector<64x256xf32> to vector<64xf32>
    %112 = vector.shape_cast %111 : vector<64xf32> to vector<64x1xf32>
    %113 = vector.broadcast %112 : vector<64x1xf32> to vector<64x256xf32>
    %114 = arith.subf %110, %113 : vector<64x256xf32>
    %115 = math.exp %114 : vector<64x256xf32>
    %cst_60 = arith.constant dense<0.000000e+00> : vector<64xf32>
    %116 = vector.multi_reduction <add>, %115, %cst_60 [1] : vector<64x256xf32> to vector<64xf32>
    %117 = vector.shape_cast %116 : vector<64xf32> to vector<64x1xf32>
    %118 = arith.truncf %115 : vector<64x256xf32> to vector<64x256xbf16>
    %cst_61 = arith.constant dense<0.000000e+00> : vector<64x16xf32>
    %119 = tpu.matmul %118, %93, %cst_61 {dimension_numbers = #tpu.dot_dimension_numbers<[1], [0], [0], [1], [0, 0, 1, 1], [], []>} : vector<64x256xbf16>, vector<256x16xbf16>, vector<64x16xf32> -> vector<64x16xf32>
    %120 = tpu.reciprocal %117 {approx = true} : vector<64x1xf32> -> vector<64x1xf32>
    %121 = vector.broadcast %120 : vector<64x1xf32> to vector<64x16xf32>
    %122 = arith.mulf %119, %121 : vector<64x16xf32>
    %123 = arith.addf %122, %90 : vector<64x16xf32>
    %c0_62 = arith.constant 0 : index
    %c32 = arith.constant 32 : index
    %124 = vector.load %arg17[%c0_62, %c32] : memref<64x64xf32, #tpu.memory_space<vmem>>, vector<64x16xf32>
    tpu.vector_store %arg17[%c0_62, %c32], %123 {strides = array<i32>} : memref<64x64xf32, #tpu.memory_space<vmem>>, vector<64x16xf32>,
    %125 = vector.extract_strided_slice %5 {offsets = [0, 48], sizes = [64, 16], strides = [1, 1]} : vector<64x64xf32> to vector<64x16xf32>
    %126 = arith.truncf %125 : vector<64x16xf32> to vector<64x16xbf16>
    %127 = vector.extract_strided_slice %8 {offsets = [0, 48], sizes = [256, 16], strides = [1, 1]} : vector<256x64xbf16> to vector<256x16xbf16>
    %128 = vector.extract_strided_slice %11 {offsets = [0, 48], sizes = [256, 16], strides = [1, 1]} : vector<256x64xbf16> to vector<256x16xbf16>
    %cst_63 = arith.constant dense<0.000000e+00> : vector<64x256xf32>
    %129 = tpu.matmul %126, %127, %cst_63 {dimension_numbers = #tpu.dot_dimension_numbers<[1], [1], [0], [0], [0, 0, 1, 0], [], []>} : vector<64x16xbf16>, vector<256x16xbf16>, vector<64x256xf32> -> vector<64x256xf32>
    %cst_64 = arith.constant dense<0.000000e+00> : vector<64x128xf32>
    %130 = tpu.matmul %126, %12, %cst_64 {dimension_numbers = #tpu.dot_dimension_numbers<[1], [1], [0], [0], [0, 0, 1, 0], [], []>} : vector<64x16xbf16>, vector<128x16xbf16>, vector<64x128xf32> -> vector<64x128xf32>
    %131 = arith.extf %14 : vector<64x128xbf16> to vector<64x128xf32>
    %132 = arith.mulf %130, %131 : vector<64x128xf32>
    %133 = arith.truncf %132 : vector<64x128xf32> to vector<64x128xbf16>
    %cst_65 = arith.constant dense<0.000000e+00> : vector<64x16xf32>
    %134 = tpu.matmul %133, %16, %cst_65 {dimension_numbers = #tpu.dot_dimension_numbers<[1], [0], [0], [1], [0, 0, 1, 1], [], []>} : vector<64x128xbf16>, vector<128x16xbf16>, vector<64x16xf32> -> vector<64x16xf32>
    %cst_66 = arith.constant dense<0.000000e+00> : vector<64x128xf32>
    %135 = tpu.matmul %126, %13, %cst_66 {dimension_numbers = #tpu.dot_dimension_numbers<[1], [1], [0], [0], [0, 0, 1, 0], [], []>} : vector<64x16xbf16>, vector<128x16xbf16>, vector<64x128xf32> -> vector<64x128xf32>
    %136 = arith.extf %15 : vector<64x128xbf16> to vector<64x128xf32>
    %137 = arith.mulf %135, %136 : vector<64x128xf32>
    %138 = arith.truncf %137 : vector<64x128xf32> to vector<64x128xbf16>
    %cst_67 = arith.constant dense<0.000000e+00> : vector<64x16xf32>
    %139 = tpu.matmul %138, %17, %cst_67 {dimension_numbers = #tpu.dot_dimension_numbers<[1], [0], [0], [1], [0, 0, 1, 1], [], []>} : vector<64x128xbf16>, vector<128x16xbf16>, vector<64x16xf32> -> vector<64x16xf32>
    %140 = arith.truncf %134 : vector<64x16xf32> to vector<64x16xbf16>
    %cst_68 = arith.constant dense<0.000000e+00> : vector<64x256xf32>
    %141 = tpu.matmul %140, %18, %cst_68 {dimension_numbers = #tpu.dot_dimension_numbers<[1], [0], [0], [1], [0, 0, 1, 1], [], []>} : vector<64x16xbf16>, vector<16x256xbf16>, vector<64x256xf32> -> vector<64x256xf32>
    %142 = arith.addf %129, %141 : vector<64x256xf32>
    %143 = arith.truncf %139 : vector<64x16xf32> to vector<64x16xbf16>
    %cst_69 = arith.constant dense<0.000000e+00> : vector<64x256xf32>
    %144 = tpu.matmul %143, %19, %cst_69 {dimension_numbers = #tpu.dot_dimension_numbers<[1], [0], [0], [1], [0, 0, 1, 1], [], []>} : vector<64x16xbf16>, vector<16x256xbf16>, vector<64x256xf32> -> vector<64x256xf32>
    %145 = arith.addf %142, %144 : vector<64x256xf32>
    %cst_70 = arith.constant dense<0xFF800000> : vector<64xf32>
    %146 = vector.multi_reduction <maximumf>, %145, %cst_70 [1] : vector<64x256xf32> to vector<64xf32>
    %147 = vector.shape_cast %146 : vector<64xf32> to vector<64x1xf32>
    %148 = vector.broadcast %147 : vector<64x1xf32> to vector<64x256xf32>
    %149 = arith.subf %145, %148 : vector<64x256xf32>
    %150 = math.exp %149 : vector<64x256xf32>
    %cst_71 = arith.constant dense<0.000000e+00> : vector<64xf32>
    %151 = vector.multi_reduction <add>, %150, %cst_71 [1] : vector<64x256xf32> to vector<64xf32>
    %152 = vector.shape_cast %151 : vector<64xf32> to vector<64x1xf32>
    %153 = arith.truncf %150 : vector<64x256xf32> to vector<64x256xbf16>
    %cst_72 = arith.constant dense<0.000000e+00> : vector<64x16xf32>
    %154 = tpu.matmul %153, %128, %cst_72 {dimension_numbers = #tpu.dot_dimension_numbers<[1], [0], [0], [1], [0, 0, 1, 1], [], []>} : vector<64x256xbf16>, vector<256x16xbf16>, vector<64x16xf32> -> vector<64x16xf32>
    %155 = tpu.reciprocal %152 {approx = true} : vector<64x1xf32> -> vector<64x1xf32>
    %156 = vector.broadcast %155 : vector<64x1xf32> to vector<64x16xf32>
    %157 = arith.mulf %154, %156 : vector<64x16xf32>
    %158 = arith.addf %157, %125 : vector<64x16xf32>
    %c0_73 = arith.constant 0 : index
    %c48 = arith.constant 48 : index
    %159 = vector.load %arg17[%c0_73, %c48] : memref<64x64xf32, #tpu.memory_space<vmem>>, vector<64x16xf32>
    tpu.vector_store %arg17[%c0_73, %c48], %158 {strides = array<i32>} : memref<64x64xf32, #tpu.memory_space<vmem>>, vector<64x16xf32>,
    %c0_74 = arith.constant 0 : index
    %c0_75 = arith.constant 0 : index
    %160 = vector.load %arg17[%c0_74, %c0_75] : memref<64x64xf32, #tpu.memory_space<vmem>>, vector<64x64xf32>
    %161 = arith.truncf %160 : vector<64x64xf32> to vector<64x64xbf16>
    %c0_76 = arith.constant 0 : index
    %c0_77 = arith.constant 0 : index
    %162 = vector.load %arg6[%c0_76, %c0_77] : memref<64x128xbf16, #tpu.memory_space<vmem>>, vector<64x128xbf16>
    %cst_78 = arith.constant dense<0.000000e+00> : vector<64x128xf32>
    %163 = tpu.matmul %161, %162, %cst_78 {dimension_numbers = #tpu.dot_dimension_numbers<[1], [0], [0], [1], [0, 0, 1, 1], [], []>} : vector<64x64xbf16>, vector<64x128xbf16>, vector<64x128xf32> -> vector<64x128xf32>
    %c0_79 = arith.constant 0 : index
    %c0_80 = arith.constant 0 : index
    %164 = vector.load %arg7[%c0_79, %c0_80] : memref<1x128xf32, #tpu.memory_space<vmem>>, vector<1x128xf32>
    %165 = vector.broadcast %164 : vector<1x128xf32> to vector<64x128xf32>
    %166 = arith.addf %163, %165 : vector<64x128xf32>
    %c0_81 = arith.constant 0 : index
    %c0_82 = arith.constant 0 : index
    %c0_83 = arith.constant 0 : index
    %167 = vector.load %arg16[%c0_81, %c0_82, %c0_83] : memref<1x64x128xf32, #tpu.memory_space<vmem>>, vector<1x64x128xf32>
    %168 = vector.shape_cast %167 : vector<1x64x128xf32> to vector<64x128xf32>
    %169 = vector.shape_cast %166 : vector<64x128xf32> to vector<1x64x128xf32>
    tpu.vector_store %arg16[%c0_81, %c0_82, %c0_83], %169 {strides = array<i32>} : memref<1x64x128xf32, #tpu.memory_space<vmem>>, vector<1x64x128xf32>,
    return
  }
  func.func @transform_0(%arg0: i32) -> (i32, i32, i32) {
    %c0_i32 = arith.constant 0 : i32
    %c0_i32_0 = arith.constant 0 : i32
    %c0_i32_1 = arith.constant 0 : i32
    return %arg0, %c0_i32, %c0_i32_0 : i32, i32, i32
  }
  func.func @transform_1(%arg0: i32) -> (i32, i32, i32) {
    %c0_i32 = arith.constant 0 : i32
    %c0_i32_0 = arith.constant 0 : i32
    %c0_i32_1 = arith.constant 0 : i32
    return %arg0, %c0_i32, %c0_i32_0 : i32, i32, i32
  }
  func.func @transform_2(%arg0: i32) -> (i32, i32) {
    %c0_i32 = arith.constant 0 : i32
    %c0_i32_0 = arith.constant 0 : i32
    %c0_i32_1 = arith.constant 0 : i32
    return %c0_i32, %c0_i32_0 : i32, i32
  }
  func.func @transform_3(%arg0: i32) -> (i32, i32) {
    %c0_i32 = arith.constant 0 : i32
    %c0_i32_0 = arith.constant 0 : i32
    %c0_i32_1 = arith.constant 0 : i32
    return %c0_i32, %c0_i32_0 : i32, i32
  }
  func.func @transform_4(%arg0: i32) -> (i32, i32) {
    %c0_i32 = arith.constant 0 : i32
    %c0_i32_0 = arith.constant 0 : i32
    %c0_i32_1 = arith.constant 0 : i32
    return %c0_i32, %c0_i32_0 : i32, i32
  }
  func.func @transform_5(%arg0: i32) -> (i32, i32) {
    %c0_i32 = arith.constant 0 : i32
    %c0_i32_0 = arith.constant 0 : i32
    %c0_i32_1 = arith.constant 0 : i32
    return %c0_i32, %c0_i32_0 : i32, i32
  }
  func.func @transform_6(%arg0: i32) -> (i32, i32) {
    %c0_i32 = arith.constant 0 : i32
    %c0_i32_0 = arith.constant 0 : i32
    %c0_i32_1 = arith.constant 0 : i32
    return %c0_i32, %c0_i32_0 : i32, i32
  }
  func.func @transform_7(%arg0: i32) -> (i32, i32) {
    %c0_i32 = arith.constant 0 : i32
    %c0_i32_0 = arith.constant 0 : i32
    %c0_i32_1 = arith.constant 0 : i32
    return %c0_i32, %c0_i32_0 : i32, i32
  }
  func.func @transform_8(%arg0: i32) -> (i32, i32) {
    %c0_i32 = arith.constant 0 : i32
    %c0_i32_0 = arith.constant 0 : i32
    %c0_i32_1 = arith.constant 0 : i32
    return %c0_i32, %c0_i32_0 : i32, i32
  }
  func.func @transform_9(%arg0: i32) -> (i32, i32) {
    %c0_i32 = arith.constant 0 : i32
    %c0_i32_0 = arith.constant 0 : i32
    %c0_i32_1 = arith.constant 0 : i32
    return %c0_i32, %c0_i32_0 : i32, i32
  }
  func.func @transform_10(%arg0: i32) -> (i32, i32) {
    %c0_i32 = arith.constant 0 : i32
    %c0_i32_0 = arith.constant 0 : i32
    %c0_i32_1 = arith.constant 0 : i32
    return %c0_i32, %c0_i32_0 : i32, i32
  }
  func.func @transform_11(%arg0: i32) -> (i32, i32) {
    %c0_i32 = arith.constant 0 : i32
    %c0_i32_0 = arith.constant 0 : i32
    %c0_i32_1 = arith.constant 0 : i32
    return %c0_i32, %c0_i32_0 : i32, i32
  }
  func.func @transform_12(%arg0: i32) -> (i32, i32) {
    %c0_i32 = arith.constant 0 : i32
    %c0_i32_0 = arith.constant 0 : i32
    %c0_i32_1 = arith.constant 0 : i32
    return %c0_i32, %c0_i32_0 : i32, i32
  }
  func.func @transform_13(%arg0: i32) -> (i32, i32) {
    %c0_i32 = arith.constant 0 : i32
    %c0_i32_0 = arith.constant 0 : i32
    %c0_i32_1 = arith.constant 0 : i32
    return %c0_i32, %c0_i32_0 : i32, i32
  }
  func.func @transform_14(%arg0: i32) -> (i32, i32) {
    %c0_i32 = arith.constant 0 : i32
    %c0_i32_0 = arith.constant 0 : i32
    %c0_i32_1 = arith.constant 0 : i32
    return %c0_i32, %c0_i32_0 : i32, i32
  }
  func.func @transform_15(%arg0: i32) -> (i32, i32, i32) {
    %c0_i32 = arith.constant 0 : i32
    %c0_i32_0 = arith.constant 0 : i32
    %c0_i32_1 = arith.constant 0 : i32
    return %arg0, %c0_i32, %c0_i32_0 : i32, i32, i32
  }
}

</mosaic_0001>

<bundles_post_ra>
// kernel: tpu_custom_call.1
= control target key start
LH: loop header
LB: loop body
LE: loop exit
PB: predicated region body
PF: predicated region fallthrough
CT: control target
= control target key end

     0   :  { %s9842_s0 = inlined_call_operand.vmem [shape: bf16[2,64,64], index: 0, kind: input, shape index: {}]   ;;  %s9843_s1 = inlined_call_operand.vmem [shape: bf16[2,256,64], index: 1, kind: input, shape index: {}]   ;;  %s9844_s2 = inlined_call_operand.vmem [shape: bf16[64,64], index: 2, kind: input, shape index: {}]   ;;  %s9845_s3 = inlined_call_operand.vmem [shape: bf16[64,64], index: 3, kind: input, shape index: {}]   ;;  %s9846_s4 = inlined_call_operand.vmem [shape: bf16[64,64], index: 4, kind: input, shape index: {}]   ;;  %s9847_s5 = inlined_call_operand.vmem [shape: bf16[64,128], index: 5, kind: input, shape index: {}]   ;;  %s9848_s6 = inlined_call_operand.vmem [shape: f32[1,128], index: 6, kind: input, shape index: {}]   ;;  %s9849_s7 = inlined_call_operand.vmem [shape: bf16[128,16], index: 7, kind: input, shape index: {}]   ;;  %s9850_s8 = inlined_call_operand.vmem [shape: bf16[128,16], index: 8, kind: input, shape index: {}]   ;;  %s9851_s9 = inlined_call_operand.vmem [shape: bf16[64,128], index: 9, kind: input, shape index: {}]   ;;  %s9852_s10 = inlined_call_operand.vmem [shape: bf16[64,128], index: 10, kind: input, shape index: {}]   ;;  %s9853_s11 = inlined_call_operand.vmem [shape: bf16[128,16], index: 11, kind: input, shape index: {}]   ;;  %s9854_s12 = inlined_call_operand.vmem [shape: bf16[128,16], index: 12, kind: input, shape index: {}]   ;;  %s9855_s13 = inlined_call_operand.vmem [shape: bf16[16,256], index: 13, kind: input, shape index: {}]   ;;  %s9856_s14 = inlined_call_operand.vmem [shape: bf16[16,256], index: 14, kind: input, shape index: {}]   ;;  %s9857_s15 = inlined_call_operand.hbm [shape: f32[2,64,128], index: 15, kind: output, shape index: {}]  }
   0x1   :  { %10068 = sst [smem:[#allocation116_spill]] %s9842_s0 }
   0x2   :  { %20 = vsyncpa [#allocation4], 0 }
   0x3   :  { %22 = vsyncpa [#allocation4 + $0x1], 0  ;;  %s7403_s18 = smov 0   ;;  %s7405_s19 = smov 0  }
   0x4   :  { %s7407_s20 = smov 0   ;;  %s7409_s21 = smov 0  }
   0x5 LB: > { %10069 = sst [smem:[#allocation6_spill]] %s7307_s20  ;;  %s7424_s22 = sadd.s32 4294967295, %s7311_s21   ;;  %s7311_s21 = sphi %s7409_s21, %s10439_s21   ;;  %s7307_s20 = sphi %s7407_s20, %s10441_s20   ;;  %s7303_s19 = sphi %s7405_s19, %s10443_s19   ;;  %s7299_s18 = sphi %s7403_s18, %s10442_s18  }
   0x6   : > { %s5530_s23 = sadd.s32 4294967294, %s7311_s21   ;;  %s7428_s24 = sadd.s32 1, %s7311_s21  }
   0x7   : > { %10070 = sst [smem:[#allocation7_spill]] %s7428_s24  ;;  %s360_s25 = sadd.s32 1, %s7307_s20 }
   0x8   : > { %s357_s26 = ssub.s32 %s7311_s21, %s7428_s24  ;;  %p370_p0 = scmp.ne.s32.totalorder %s7307_s20, %s7303_s19 }
   0x9   : > { %p358_p1 = scmp.eq.s32.totalorder %s357_s26, 0  ;;  %p371_p2 = scmp.eq.s32.totalorder %s7424_s22, 1 }
   0xa   : > { %p376_p3 = scmp.ne.s32.totalorder %s7303_s19, %s7299_s18  ;;  %p377_p4 = scmp.eq.s32.totalorder %s5530_s23, 1 }
   0xb   : > { %s7439_s27 = scalar_select %p358_p1, %s7307_s20, %s360_s25  }
   0xc   : > { %p7441_p5 = por %p371_p2, %p370_p0  ;;  %p7445_p6 = por %p377_p4, %p376_p3 }
   0xd   : > { %10071 = sst [smem:[#allocation8_spill]] %s7439_s27  ;;  %p5533_p7 = scmp.ge.s32.totalorder %s7311_s21, 1 }
   0xe   : > { %s10073_s29 = scalar_select %p7445_p6, 1, 0 }
   0xf   : > { %p450_p8 = scmp.lt.s32.totalorder %s7311_s21, 3 }
  0x10   : > { %10074 = sst [smem:[#allocation9_spill]] %s10073_s29 }
  0x11   : > { %p451_p9 = pnand %p5533_p7, %p450_p8 }
  0x13   : > { %454 = sbr.rel (%p451_p9) target bundleno = 4501 (0x1195), region = 80 }
  0x18   : > { %v6930_v0 = vld [vmem:[%s9844_s2 + $0x18] sm:$0xff]   ;;  %p503_p10 = scmp.lt.s32.totalorder %s7424_s22, 1  ;;  %v6931_v1 = vld [vmem:[%s9844_s2 + $0x10] sm:$0xff]   ;;  %v6932_v2 = vld [vmem:[%s9844_s2 + $0x8] sm:$0xff]   ;;  %s10075_s0 = sld [smem:[#allocation116_spill]]  ;;  %vm606_vm0 = vcmask 523264  }
  0x19   : > { %6282 = vmatprep.subr.bf16.mxu0 %v6930_v0  ;;  %v6938_v3 = vld [vmem:[%s9845_s3 + $0x18] sm:$0xff]   ;;  %v6933_v5 = vld [vmem:[%s9844_s2] sm:$0xff]   ;;  %v6939_v6 = vld [vmem:[%s9845_s3 + $0x10] sm:$0xff]   ;;  %vm1358_vm1 = vcmask 130048   ;;  %s7315_s26 = smov 96   ;;  %vm3383_vm2 = vcmask 261248  }
  0x1a   : > { %s504_s25 = scalar_select %p503_p10, %s7424_s22, 1  ;;  %6283 = vmatpush3.bf16.msra.mxu0 %v6930_v0  ;;  %6298 = vmatprep.subr.bf16.mxu1 %v6938_v3  ;;  %v6940_v7 = vld [vmem:[%s9845_s3 + $0x8] sm:$0xff]   ;;  %v6941_v10 = vld [vmem:[%s9845_s3] sm:$0xff]   ;;  %v6944_v12 = vld [vmem:[%s9849_s7 + $0x38] sm:$0xff]   ;;  %vm4340_vm3 = vcmask 392448   ;;  %vm5297_vm4 = vcmask 523648  }
  0x1b   : > { %6284 = vmatprep.subr.bf16.mxu0 %v6931_v1  ;;  %6299 = vmatpush3.bf16.msra.mxu1 %v6938_v3  ;;  %v7507_v16 = vsel %vm1358_vm1, %v6944_v12, 0  ;;  %v6947_v17 = vld [vmem:[%s9849_s7 + $0x30] sm:$0xff]   ;;  %v6950_v21 = vld [vmem:[%s9849_s7 + $0x28] sm:$0xff]   ;;  %v6953_v22 = vld [vmem:[%s9849_s7 + $0x20] sm:$0xff]   ;;  %s7319_s17 = smov 48   ;;  %s5739_s24 = sshll.u32 %s7424_s22, 10 }
  0x1c   : > { %s5737_s20 = sshll.u32 %s504_s25, 5  ;;  %s5738_s23 = sshll.u32 %s504_s25, 7  ;;  %6300 = vmatprep.subr.bf16.mxu1 %v6939_v6  ;;  %10076 = vst [vmem:[#allocation10_spill] sm:$0xff] %v7507_v16  ;;  %v7527_v20 = vsel %vm1358_vm1, %v6947_v17, 0  ;;  %v7545_v24 = vsel %vm1358_vm1, %v6950_v21, 0  ;;  %v7551_v26 = vsel %vm1358_vm1, %v6953_v22, 0 }
  0x1d   : > { %s7478_s29 = scalar_lea.vmem %s9843_s1, %s5738_s23  ;;  %10077 = vst [vmem:[#allocation11_spill] sm:$0xff] %v7527_v20  ;;  %10078 = vst [vmem:[#allocation12_spill] sm:$0xff] %v7545_v24  ;;  %v6956_v29 = vld [vmem:[%s9849_s7 + $0x18] sm:$0xff]   ;;  %v6959_v32 = vld [vmem:[%s9849_s7 + $0x10] sm:$0xff]   ;;  %s7316_s23 = smov 80  }
  0x1e   : > { %s7465_s30 = scalar_lea.vmem %s10075_s0, %s5737_s20  ;;  %6285 = vmatpush3.bf16.msra.mxu0 %v6931_v1  ;;  %v6942_v9 = vld [vmem:[%s7478_s29] sm:$0xff]   ;;  %v7500_v14 = vld [vmem:[%s7478_s29 + $0x8] sm:$0xff]   ;;  %v7503_v15 = vld [vmem:[%s7478_s29 + $0x10] sm:$0xff]   ;;  %10079 = vst [vmem:[#allocation13_spill] sm:$0xff] %v7551_v26  ;;  %v7584_v33 = vsel %vm1358_vm1, %v6956_v29, 0  ;;  %v7599_v36 = vsel %vm1358_vm1, %v6959_v32, 0  ;;  %s9796_s25 = scalar_lea.hbm %s9857_s15, %s5739_s24 }
  0x1f   : > { %v6934_v4 = vld [vmem:[%s7465_s30] sm:$0xff]   ;;  %6286 = vmatprep.subr.bf16.mxu0 %v6932_v2  ;;  %v6935_v8 = vld [vmem:[%s7465_s30 + $0x8] sm:$0xff]   ;;  %6301 = vmatpush3.bf16.msra.mxu1 %v6939_v6  ;;  %v6936_v11 = vld [vmem:[%s7465_s30 + $0x10] sm:$0xff]   ;;  %10080 = vst [vmem:[#allocation14_spill] sm:$0xff] %v7584_v33  ;;  %s7314_s0 = smov 112  }
  0x20   : > { %6290 = vmatprep.mubr.msk.bf16.mxu0 %vm606_vm0, %v6934_v4  ;;  %6302 = vmatprep.subr.bf16.mxu1 %v6940_v7  ;;  %v6937_v13 = vld [vmem:[%s7465_s30 + $0x18] sm:$0xff]   ;;  %v7524_v19 = vld [vmem:[%s7478_s29 + $0x20] sm:$0xff]   ;;  %v7541_v23 = vld [vmem:[%s7478_s29 + $0x28] sm:$0xff]   ;;  %10081 = vst [vmem:[#allocation15_spill] sm:$0xff] %v7599_v36 }
  0x21   : > { %6306 = vmatprep.mubr.msk.bf16.mxu1 %vm606_vm0, %v6942_v9  ;;  %v7521_v18 = vld [vmem:[%s7478_s29 + $0x18] sm:$0xff]   ;;  %v7548_v25 = vld [vmem:[%s7478_s29 + $0x30] sm:$0xff]   ;;  %v7563_v28 = vld [vmem:[%s7478_s29 + $0x40] sm:$0xff]  }
  0x22   : > { %6287 = vmatpush3.bf16.msra.mxu0 %v6932_v2  ;;  %v7559_v27 = vld [vmem:[%s7478_s29 + $0x38] sm:$0xff]   ;;  %v7574_v30 = vld [vmem:[%s7478_s29 + $0x48] sm:$0xff]   ;;  %v7578_v31 = vld [vmem:[%s7478_s29 + $0x50] sm:$0xff]  }
  0x23   : > { %6288 = vmatprep.subr.bf16.mxu0 %v6933_v5  ;;  %6303 = vmatpush3.bf16.msra.mxu1 %v6940_v7  ;;  %v7593_v34 = vld [vmem:[%s7478_s29 + $0x58] sm:$0xff]   ;;  %v7596_v35 = vld [vmem:[%s7478_s29 + $0x60] sm:$0xff]   ;;  %v6962_v37 = vld [vmem:[%s9849_s7 + $0x8] sm:$0xff]  }
  0x24   : > { %6304 = vmatprep.subr.bf16.mxu1 %v6941_v10  ;;  %v7611_v38 = vld [vmem:[%s7478_s29 + $0x68] sm:$0xff]   ;;  %v7614_v39 = vld [vmem:[%s7478_s29 + $0x70] sm:$0xff]   ;;  %v7617_v40 = vsel %vm1358_vm1, %v6962_v37, 0  ;;  %v7625_v41 = vld [vmem:[%s7478_s29 + $0x78] sm:$0xff]  }
  0x25   : > { %10082 = vst [vmem:[#allocation16_spill] sm:$0xff] %v7617_v40  ;;  %v6965_v42 = vld [vmem:[%s9849_s7] sm:$0xff]   ;;  %v7640_v44 = vld [vmem:[%s9850_s8 + $0x38] sm:$0xff]   ;;  %v6975_v46 = vld [vmem:[%s9846_s4 + $0x10] sm:$0xff]  }
  0x26   : > { %6289 = vmatpush3.bf16.msra.mxu0 %v6933_v5  ;;  %v7634_v43 = vsel %vm1358_vm1, %v6965_v42, 0  ;;  %10084 = vst [vmem:[#allocation18_spill] sm:$0xff] %v7640_v44  ;;  %v6974_v45 = vld [vmem:[%s9846_s4 + $0x18] sm:$0xff]   ;;  %v6976_v47 = vld [vmem:[%s9846_s4 + $0x8] sm:$0xff]   ;;  %v6977_v48 = vld [vmem:[%s9846_s4] sm:$0xff]   ;;  %v7745_v0 = vsel %vm1358_vm1, %v7640_v44, 0 }
  0x27   : > { %6305 = vmatpush3.bf16.msra.mxu1 %v6941_v10  ;;  %10083 = vst [vmem:[#allocation17_spill] sm:$0xff] %v7634_v43  ;;  %6338 = vmatprep.subr.bf16.mxu0 %v6974_v45  ;;  %v7659_v49 = vld [vmem:[%s9853_s11 + $0x38] sm:$0xff]   ;;  %v7665_v50 = vld [vmem:[%s9853_s11 + $0x30] sm:$0xff]   ;;  %v7676_v51 = vld [vmem:[%s9853_s11 + $0x28] sm:$0xff]  }
  0x28   : > { %6786 = vmatprep.subr.msk.bf16.mxu1 %vm1358_vm1, %v6944_v12  ;;  %v7683_v52 = vld [vmem:[%s9853_s11 + $0x20] sm:$0xff]   ;;  %v7694_v53 = vld [vmem:[%s9853_s11 + $0x18] sm:$0xff]   ;;  %v7701_v54 = vld [vmem:[%s9853_s11 + $0x10] sm:$0xff]   ;;  %10093 = vst [vmem:[#allocation27_spill] sm:$0xff] %v7745_v0 }
  0x29   : > { %6291 = vmatmul.mubr.msk.bf16.vlgmr.msra.gmra.mxu0 %vm606_vm0, %v6935_v8  ;;  %10085 = vst [vmem:[#allocation19_spill] sm:$0xff] %v7694_v53  ;;  %10086 = vst [vmem:[#allocation20_spill] sm:$0xff] %v7701_v54  ;;  %v7712_v55 = vld [vmem:[%s9853_s11 + $0x8] sm:$0xff]   ;;  %v6967_v1 = vld [vmem:[%s9850_s8 + $0x30] sm:$0xff]  }
  0x2a   : > { %6294 = vmatprep.mubr.msk.bf16.mxu0 %vm606_vm0, %v6936_v11  ;;  %6307 = vmatmul.mubr.msk.bf16.vlgmr.msra.gmra.mxu1 %vm606_vm0, %v7500_v14  ;;  %10087 = vst [vmem:[#allocation21_spill] sm:$0xff] %v7712_v55  ;;  %v7781_v12 = vsel %vm1358_vm1, %v6967_v1, 0 }
  0x2b   : > { %6379 = vmatpush3.bf16.xpose.msra.mxu1 %v7507_v16  ;;  %6310 = vmatprep.mubr.msk.bf16.mxu1 %vm606_vm0, %v7503_v15  ;;  %10097 = vst [vmem:[#allocation31_spill] sm:$0xff] %v7781_v12 }
  0x2c   : > { %6787 = vmatprep.subr.msk.bf16.mxu1 %vm1358_vm1, %v6947_v17  ;;  %6339 = vmatpush3.bf16.msra.mxu0 %v6974_v45 }
  0x2d   : > { %6340 = vmatprep.subr.bf16.mxu0 %v6975_v46 }
  0x30   : > { %6341 = vmatpush3.bf16.msra.mxu0 %v6975_v46 }
  0x31   : > { %6295 = vmatmul.mubr.msk.bf16.gmra.mxu0 %vm606_vm0, %v6937_v13  ;;  %6342 = vmatprep.subr.bf16.mxu0 %v6976_v47  ;;  %v6968_v13 = vld [vmem:[%s9850_s8 + $0x28] sm:$0xff]  }
  0x32   : > { %6346 = vmatprep.mubr.msk.bf16.mxu0 %vm606_vm0, %v6942_v9  ;;  %6311 = vmatmul.mubr.msk.bf16.gmra.mxu1 %vm606_vm0, %v7521_v18 }
  0x33   : > { %6381 = vmatpush3.bf16.xpose.msra.mxu1 %v7527_v20  ;;  %6314 = vmatprep.mubr.msk.bf16.mxu1 %vm606_vm0, %v7524_v19 }
  0x34   : > { %6788 = vmatprep.subr.msk.bf16.mxu1 %vm1358_vm1, %v6950_v21  ;;  %6343 = vmatpush3.bf16.msra.mxu0 %v6976_v47  ;;  %v7805_v21 = vsel %vm1358_vm1, %v6968_v13, 0 }
  0x35   : > { %6344 = vmatprep.subr.bf16.mxu0 %v6977_v48  ;;  %10098 = vst [vmem:[#allocation32_spill] sm:$0xff] %v7805_v21 }
  0x38   : > { %6345 = vmatpush3.bf16.msra.mxu0 %v6977_v48 }
  0x39   : > { %6402 = vmatprep.subr.bf16.mxu0 %v7659_v49 }
  0x3a   : > { %6315 = vmatmul.mubr.msk.bf16.gmra.mxu1 %vm606_vm0, %v7541_v23 }
  0x3b   : > { %6383 = vmatpush3.bf16.xpose.msra.mxu1 %v7545_v24  ;;  %6318 = vmatprep.mubr.msk.bf16.mxu1 %vm606_vm0, %v7548_v25 }
  0x3c   : > { %6789 = vmatprep.subr.msk.bf16.mxu1 %vm1358_vm1, %v6953_v22  ;;  %6347 = vmatmul.mubr.msk.bf16.vlgmr.msra.gmra.mxu0 %vm606_vm0, %v7500_v14  ;;  %v6969_v22 = vld [vmem:[%s9850_s8 + $0x20] sm:$0xff]  }
  0x3d   : > { %6350 = vmatprep.mubr.msk.bf16.mxu0 %vm606_vm0, %v7503_v15  ;;  %6403 = vmatpush3.bf16.msra.mxu0 %v7659_v49 }
  0x3e   : > { %6404 = vmatprep.subr.bf16.mxu0 %v7665_v50 }
  0x41   : > { %6405 = vmatpush3.bf16.msra.mxu0 %v7665_v50 }
  0x42   : > { %6319 = vmatmul.mubr.msk.bf16.gmra.mxu1 %vm606_vm0, %v7559_v27  ;;  %6406 = vmatprep.subr.bf16.mxu0 %v7676_v51 }
  0x43   : > { %6385 = vmatpush3.bf16.xpose.msra.mxu1 %v7551_v26  ;;  %6322 = vmatprep.mubr.msk.bf16.mxu1 %vm606_vm0, %v7563_v28 }
  0x44   : > { %6790 = vmatprep.subr.msk.bf16.mxu1 %vm1358_vm1, %v6956_v29  ;;  %6351 = vmatmul.mubr.msk.bf16.gmra.mxu0 %vm606_vm0, %v7521_v18 }
  0x45   : > { %6354 = vmatprep.mubr.msk.bf16.mxu0 %vm606_vm0, %v7524_v19  ;;  %6407 = vmatpush3.bf16.msra.mxu0 %v7676_v51 }
  0x46   : > { %6408 = vmatprep.subr.bf16.mxu0 %v7683_v52 }
  0x49   : > { %6409 = vmatpush3.bf16.msra.mxu0 %v7683_v52 }
  0x4a   : > { %6323 = vmatmul.mubr.msk.bf16.gmra.mxu1 %vm606_vm0, %v7574_v30  ;;  %6410 = vmatprep.subr.bf16.mxu0 %v7694_v53 }
  0x4b   : > { %6387 = vmatpush3.bf16.xpose.msra.mxu1 %v7584_v33  ;;  %6326 = vmatprep.mubr.msk.bf16.mxu1 %vm606_vm0, %v7578_v31 }
  0x4c   : > { %6791 = vmatprep.subr.msk.bf16.mxu1 %vm1358_vm1, %v6959_v32  ;;  %6355 = vmatmul.mubr.msk.bf16.gmra.mxu0 %vm606_vm0, %v7541_v23 }
  0x4d   : > { %6358 = vmatprep.mubr.msk.bf16.mxu0 %vm606_vm0, %v7548_v25  ;;  %6411 = vmatpush3.bf16.msra.mxu0 %v7694_v53 }
  0x4e   : > { %6412 = vmatprep.subr.bf16.mxu0 %v7701_v54 }
  0x51   : > { %6413 = vmatpush3.bf16.msra.mxu0 %v7701_v54 }
  0x52   : > { %6327 = vmatmul.mubr.msk.bf16.gmra.mxu1 %vm606_vm0, %v7593_v34  ;;  %6414 = vmatprep.subr.bf16.mxu0 %v7712_v55 }
  0x53   : > { %6389 = vmatpush3.bf16.xpose.msra.mxu1 %v7599_v36  ;;  %6330 = vmatprep.mubr.msk.bf16.mxu1 %vm606_vm0, %v7596_v35 }
  0x54   : > { %6792 = vmatprep.subr.msk.bf16.mxu1 %vm1358_vm1, %v6962_v37  ;;  %6359 = vmatmul.mubr.msk.bf16.gmra.mxu0 %vm606_vm0, %v7559_v27 }
  0x55   : > { %6362 = vmatprep.mubr.msk.bf16.mxu0 %vm606_vm0, %v7563_v28  ;;  %6415 = vmatpush3.bf16.msra.mxu0 %v7712_v55 }
  0x5a   : > { %6331 = vmatmul.mubr.msk.bf16.gmra.mxu1 %vm606_vm0, %v7611_v38 }
  0x5b   : > { %6391 = vmatpush3.bf16.xpose.msra.mxu1 %v7617_v40  ;;  %6334 = vmatprep.mubr.msk.bf16.mxu1 %vm606_vm0, %v7614_v39 }
  0x5c   : > { %6793 = vmatprep.subr.msk.bf16.mxu1 %vm1358_vm1, %v6965_v42  ;;  %6363 = vmatmul.mubr.msk.bf16.gmra.mxu0 %vm606_vm0, %v7574_v30  ;;  %v7821_v30 = vsel %vm1358_vm1, %v6969_v22, 0 }
  0x5d   : > { %6366 = vmatprep.mubr.msk.bf16.mxu0 %vm606_vm0, %v7578_v31  ;;  %10099 = vst [vmem:[#allocation33_spill] sm:$0xff] %v7821_v30  ;;  %v6970_v31 = vld [vmem:[%s9850_s8 + $0x18] sm:$0xff]  }
  0x62   : > { %6335 = vmatmul.mubr.msk.bf16.gmra.mxu1 %vm606_vm0, %v7625_v41 }
  0x63   : > { %6393 = vmatpush3.bf16.xpose.msra.mxu1 %v7634_v43 }
  0x64   : > { %6794 = vmatprep.subr.msk.bf16.mxu1 %vm1358_vm1, %v7640_v44  ;;  %6367 = vmatmul.mubr.msk.bf16.gmra.mxu0 %vm606_vm0, %v7593_v34  ;;  %v5774_v44 = vld [vmem:[%s9851_s9 + $0x18] sm:$0xff]  }
  0x65   : > { %6370 = vmatprep.mubr.msk.bf16.mxu0 %vm606_vm0, %v7596_v35  ;;  %v7975_v53 = vunpack.c.h.bf16 %v5774_v44 }
  0x67   : > { %10123 = vst [vmem:[#allocation57_spill] sm:$0xff] %v7975_v53 }
  0x6c   : > { %6371 = vmatmul.mubr.msk.bf16.gmra.mxu0 %vm606_vm0, %v7611_v38 }
  0x6d   : > { %6374 = vmatprep.mubr.msk.bf16.mxu0 %vm606_vm0, %v7614_v39  ;;  %v7835_v39 = vsel %vm1358_vm1, %v6970_v31, 0 }
  0x6e   : > { %10100 = vst [vmem:[#allocation34_spill] sm:$0xff] %v7835_v39 }
  0x74   : > { %6375 = vmatmul.mubr.msk.bf16.gmra.mxu0 %vm606_vm0, %v7625_v41  ;;  %v6971_v41 = vld [vmem:[%s9850_s8 + $0x10] sm:$0xff]  }
  0xe9   : > { %v7721_v56 = vpop.f32.mrf.mxu0 }
  0xea   : > { %10088 = vst [vmem:[#allocation22_spill] sm:$0xff] %v7721_v56  ;;  %v6308_v60 = vpop.f32.mrf.mxu1 }
  0xeb   : > { %v7723_v57 = vpop.f32.mrf.mxu0 }
  0xec   : > { %10089 = vst [vmem:[#allocation23_spill] sm:$0xff] %v7723_v57  ;;  %v7750_v2 = vpop.f32.mrf.mxu1 }
  0xed   : > { %v7725_v58 = vpop.f32.mrf.mxu0 }
  0xee   : > { %10090 = vst [vmem:[#allocation24_spill] sm:$0xff] %v7725_v58  ;;  %v7739_v62 = vpack.c.bf16 %v7725_v58, %v7721_v56  ;;  %v6309_v4 = vpop.f32.mrf.mxu1 }
  0xef   : > { %v7731_v59 = vpop.f32.mrf.mxu0  ;;  %v7759_v5 = vpack.c.bf16 %v6309_v4, %v6308_v60  ;;  %v7849_v60 = vsel %vm1358_vm1, %v6971_v41, 0 }
  0xf0   : > { %10091 = vst [vmem:[#allocation25_spill] sm:$0xff] %v7731_v59  ;;  %v7735_v61 = vpack.c.bf16 %v7731_v59, %v7723_v57  ;;  %v7764_v7 = vpop.f32.mrf.mxu1  ;;  %10101 = vst [vmem:[#allocation35_spill] sm:$0xff] %v7849_v60 }
  0xf1   : > { %v7741_v63 = vpop.f32.mrf.mxu0 }
  0xf2   : > { %10092 = vst [vmem:[#allocation26_spill] sm:$0xff] %v7741_v63  ;;  %6394 = vmatprep.mubr.msk.bf16.mxu1 %vm1358_vm1, %v7735_v61  ;;  %v6312_v10 = vpop.f32.mrf.mxu1 }
  0xf3   : > { %v7754_v3 = vpop.f32.mrf.mxu0  ;;  %6395 = vmatmul.mubr.msk.bf16.vlgmr.msra.gmra.mxu1 %vm1358_vm1, %v7739_v62 }
  0xf4   : > { %10094 = vst [vmem:[#allocation28_spill] sm:$0xff] %v7754_v3  ;;  %6427 = vmatpush3.bf16.xpose.msra.mxu1 %v7745_v0  ;;  %v7786_v14 = vpop.f32.mrf.mxu1 }
  0xf5   : > { %v7761_v6 = vpop.f32.mrf.mxu0  ;;  %6795 = vmatprep.subr.msk.bf16.mxu1 %vm1358_vm1, %v6967_v1  ;;  %v6972_v1 = vld [vmem:[%s9850_s8 + $0x8] sm:$0xff]  }
  0xf6   : > { %10095 = vst [vmem:[#allocation29_spill] sm:$0xff] %v7761_v6  ;;  %v7772_v8 = vpack.c.bf16 %v7761_v6, %v7741_v63  ;;  %v6313_v15 = vpop.f32.mrf.mxu1 }
  0xf7   : > { %v7774_v9 = vpop.f32.mrf.mxu0  ;;  %v7795_v17 = vpack.c.bf16 %v6313_v15, %v6312_v10 }
  0xf8   : > { %10096 = vst [vmem:[#allocation30_spill] sm:$0xff] %v7774_v9  ;;  %v7778_v11 = vpack.c.bf16 %v7774_v9, %v7754_v3  ;;  %v7798_v18 = vpop.f32.mrf.mxu1 }
  0xfa   : > { %6398 = vmatprep.mubr.msk.bf16.mxu1 %vm1358_vm1, %v7778_v11  ;;  %v6316_v19 = vpop.f32.mrf.mxu1 }
  0xfb   : > { %6399 = vmatmul.mubr.msk.bf16.gmra.mxu1 %vm1358_vm1, %v7772_v8 }
  0xfc   : > { %6429 = vmatpush3.bf16.xpose.msra.mxu1 %v7781_v12  ;;  %6442 = vmatprep.mubr.msk.bf16.mxu1 %vm1358_vm1, %v7735_v61  ;;  %v7810_v23 = vpop.f32.mrf.mxu1 }
  0xfd   : > { %6796 = vmatprep.subr.msk.bf16.mxu1 %vm1358_vm1, %v6968_v13 }
  0xfe   : > { %v6317_v25 = vpop.f32.mrf.mxu1 }
  0xff   : > { %v7813_v27 = vpack.c.bf16 %v6317_v25, %v6316_v19  ;;  %v6973_v25 = vld [vmem:[%s9850_s8] sm:$0xff]  }
 0x100   : > { %v7816_v28 = vpop.f32.mrf.mxu1 }
 0x102   : > { %v6320_v29 = vpop.f32.mrf.mxu1 }
 0x104   : > { %6431 = vmatpush3.bf16.xpose.msra.mxu1 %v7805_v21  ;;  %v7826_v32 = vpop.f32.mrf.mxu1 }
 0x105   : > { %6797 = vmatprep.subr.msk.bf16.mxu1 %vm1358_vm1, %v6969_v22  ;;  %v7863_v22 = vsel %vm1358_vm1, %v6972_v1, 0 }
 0x106   : > { %v6321_v34 = vpop.f32.mrf.mxu1  ;;  %10102 = vst [vmem:[#allocation36_spill] sm:$0xff] %v7863_v22 }
 0x107   : > { %v7829_v35 = vpack.c.bf16 %v6321_v34, %v6320_v29 }
 0x108   : > { %v7832_v37 = vpop.f32.mrf.mxu1 }
 0x10a   : > { %v6324_v38 = vpop.f32.mrf.mxu1 }
 0x10c   : > { %6433 = vmatpush3.bf16.xpose.msra.mxu1 %v7821_v30  ;;  %v7840_v42 = vpop.f32.mrf.mxu1 }
 0x10d   : > { %6798 = vmatprep.subr.msk.bf16.mxu1 %vm1358_vm1, %v6970_v31 }
 0x10e   : > { %v6325_v45 = vpop.f32.mrf.mxu1 }
 0x10f   : > { %v7843_v46 = vpack.c.bf16 %v6325_v45, %v6324_v38  ;;  %v7877_v45 = vsel %vm1358_vm1, %v6973_v25, 0 }
 0x110   : > { %v7846_v47 = vpop.f32.mrf.mxu1  ;;  %10103 = vst [vmem:[#allocation37_spill] sm:$0xff] %v7877_v45 }
 0x112   : > { %v6328_v48 = vpop.f32.mrf.mxu1 }
 0x114   : > { %6435 = vmatpush3.bf16.xpose.msra.mxu1 %v7835_v39  ;;  %v7854_v4 = vpop.f32.mrf.mxu1 }
 0x115   : > { %6799 = vmatprep.subr.msk.bf16.mxu1 %vm1358_vm1, %v6971_v41 }
 0x116   : > { %v6329_v10 = vpop.f32.mrf.mxu1 }
 0x117   : > { %v7857_v13 = vpack.c.bf16 %v6329_v10, %v6328_v48 }
 0x118   : > { %v7860_v15 = vpop.f32.mrf.mxu1 }
 0x11a   : > { %v6332_v19 = vpop.f32.mrf.mxu1 }
 0x11c   : > { %6437 = vmatpush3.bf16.xpose.msra.mxu1 %v7849_v60  ;;  %v7868_v29 = vpop.f32.mrf.mxu1 }
 0x11d   : > { %6800 = vmatprep.subr.msk.bf16.mxu1 %vm1358_vm1, %v6972_v1 }
 0x11e   : > { %v6333_v31 = vpop.f32.mrf.mxu1 }
 0x11f   : > { %v7871_v34 = vpack.c.bf16 %v6333_v31, %v6332_v19  ;;  %v7891_v19 = vld [vmem:[%s9853_s11] sm:$0xff]  }
 0x120   : > { %v7874_v38 = vpop.f32.mrf.mxu1  ;;  %10105 = vst [vmem:[#allocation39_spill] sm:$0xff] %v7891_v19  ;;  %6416 = vmatprep.subr.bf16.mxu0 %v7891_v19  ;;  %v6997_v31 = vld [vmem:[%s9856_s14 + $0x4] ss:$8 sps:$4 sm:$0xff]  }
 0x121   : > { %6417 = vmatpush3.bf16.msra.mxu0 %v7891_v19 }
 0x122   : > { %v6336_v41 = vpop.f32.mrf.mxu1 }
 0x124   : > { %6439 = vmatpush3.bf16.xpose.msra.mxu1 %v7863_v22  ;;  %v7879_v48 = vpop.f32.mrf.mxu1 }
 0x125   : > { %6801 = vmatprep.subr.msk.bf16.mxu1 %vm1358_vm1, %v6973_v25  ;;  %v7900_v25 = vld [vmem:[%s9854_s12 + $0x38] sm:$0xff]  }
 0x126   : > { %v6337_v1 = vpop.f32.mrf.mxu1  ;;  %6450 = vmatprep.subr.bf16.mxu0 %v7900_v25 }
 0x127   : > { %v7882_v10 = vpack.c.bf16 %v6337_v1, %v6336_v41  ;;  %v6999_v41 = vld [vmem:[%s9856_s14] ss:$8 sps:$4 sm:$0xff]   ;;  %v6348_v1 = vpop.f32.mrf.mxu0 }
 0x128   : > { %v7935_v0 = vpop.f32.mrf.mxu1 }
 0x129   : > { %10104 = vst [vmem:[#allocation38_spill] sm:$0xff] %v7882_v10  ;;  %v7909_v63 = vpop.f32.mrf.mxu0 }
 0x12a   : > { %10106 = vst [vmem:[#allocation40_spill] sm:$0xff] %v7909_v63 }
 0x12b   : > { %v6349_v6 = vpop.f32.mrf.mxu0 }
 0x12c   : > { %6441 = vmatpush3.bf16.xpose.msra.mxu1 %v7877_v45  ;;  %v7911_v56 = vpack.c.bf16 %v6349_v6, %v6348_v1 }
 0x12d   : > { %2115 = vmatprep.subr.bf16.mxu1 %v6997_v31  ;;  %v7913_v58 = vpop.f32.mrf.mxu0 }
 0x12e   : > { %10107 = vst [vmem:[#allocation41_spill] sm:$0xff] %v7911_v56  ;;  %10108 = vst [vmem:[#allocation42_spill] sm:$0xff] %v7913_v58  ;;  %v5773_v58 = vld [vmem:[%s9851_s9 + $0x10] sm:$0xff]  }
 0x12f   : > { %v6352_v57 = vpop.f32.mrf.mxu0 }
 0x131   : > { %v7915_v9 = vpop.f32.mrf.mxu0 }
 0x132   : > { %10109 = vst [vmem:[#allocation43_spill] sm:$0xff] %v7915_v9 }
 0x133   : > { %6443 = vmatmul.mubr.msk.bf16.vlgmr.msra.gmra.mxu1 %vm1358_vm1, %v7739_v62  ;;  %v6353_v3 = vpop.f32.mrf.mxu0 }
 0x134   : > { %6446 = vmatprep.mubr.msk.bf16.mxu1 %vm1358_vm1, %v7778_v11  ;;  %2116 = vmatpush1.bf16.msra.mxu1 %v6999_v41  ;;  %v7917_v59 = vpack.c.bf16 %v6353_v3, %v6352_v57 }
 0x135   : > { %v7919_v45 = vpop.f32.mrf.mxu0 }
 0x136   : > { %10110 = vst [vmem:[#allocation44_spill] sm:$0xff] %v7917_v59  ;;  %10111 = vst [vmem:[#allocation45_spill] sm:$0xff] %v7919_v45 }
 0x137   : > { %v6356_v22 = vpop.f32.mrf.mxu0 }
 0x139   : > { %v7921_v60 = vpop.f32.mrf.mxu0 }
 0x13b   : > { %6447 = vmatmul.mubr.msk.bf16.gmra.mxu1 %vm1358_vm1, %v7772_v8  ;;  %v6357_v31 = vpop.f32.mrf.mxu0 }
 0x13c   : > { %v7923_v41 = vpack.c.bf16 %v6357_v31, %v6356_v22  ;;  %v5741_v31 = vld [vmem:[%s9851_s9] sm:$0xff]  }
 0x13d   : > { %v7925_v39 = vpop.f32.mrf.mxu0  ;;  %v7949_v24 = vunpack.c.l.bf16 %v5741_v31  ;;  %v7951_v20 = vunpack.c.h.bf16 %v5741_v31 }
 0x13e   : > { %10112 = vst [vmem:[#allocation46_spill] sm:$0xff] %v7923_v41 }
 0x13f   : > { %v6360_v6 = vpop.f32.mrf.mxu0  ;;  %10117 = vst [vmem:[#allocation51_spill] sm:$0xff] %v7949_v24  ;;  %10118 = vst [vmem:[#allocation52_spill] sm:$0xff] %v7951_v20 }
 0x141   : > { %v7927_v1 = vpop.f32.mrf.mxu0 }
 0x143   : > { %v6361_v30 = vpop.f32.mrf.mxu0 }
 0x144   : > { %v7929_v21 = vpack.c.bf16 %v6361_v30, %v6360_v6  ;;  %v5772_v30 = vld [vmem:[%s9851_s9 + $0x8] sm:$0xff]  }
 0x145   : > { %v7931_v12 = vpop.f32.mrf.mxu0  ;;  %v7947_v33 = vunpack.c.h.bf16 %v5772_v30 }
 0x147   : > { %v6364_v57 = vpop.f32.mrf.mxu0  ;;  %10116 = vst [vmem:[#allocation50_spill] sm:$0xff] %v7947_v33 }
 0x149   : > { %v7933_v3 = vpop.f32.mrf.mxu0 }
 0x14a   : > { %10113 = vst [vmem:[#allocation47_spill] sm:$0xff] %v7933_v3 }
 0x14b   : > { %v6365_v43 = vpop.f32.mrf.mxu0 }
 0x14c   : > { %v7937_v40 = vpack.c.bf16 %v6365_v43, %v6364_v57  ;;  %v7953_v43 = vunpack.c.l.bf16 %v5772_v30 }
 0x14d   : > { %v7942_v36 = vpop.f32.mrf.mxu0 }
 0x14e   : > { %10114 = vst [vmem:[#allocation48_spill] sm:$0xff] %v7937_v40  ;;  %10115 = vst [vmem:[#allocation49_spill] sm:$0xff] %v7942_v36  ;;  %v7969_v36 = vunpack.c.l.bf16 %v5774_v44 }
 0x14f   : > { %v6368_v26 = vpop.f32.mrf.mxu0  ;;  %10119 = vst [vmem:[#allocation53_spill] sm:$0xff] %v7953_v43 }
 0x150   : > { %10121 = vst [vmem:[#allocation55_spill] sm:$0xff] %v7969_v36 }
 0x151   : > { %v7955_v16 = vpop.f32.mrf.mxu0 }
 0x153   : > { %v6369_v63 = vpop.f32.mrf.mxu0 }
 0x154   : > { %v7966_v54 = vpack.c.bf16 %v6369_v63, %v6368_v26  ;;  %v7982_v63 = vunpack.c.h.bf16 %v5773_v58 }
 0x155   : > { %v7971_v40 = vpop.f32.mrf.mxu0 }
 0x156   : > { %10120 = vst [vmem:[#allocation54_spill] sm:$0xff] %v7966_v54  ;;  %10125 = vst [vmem:[#allocation59_spill] sm:$0xff] %v7982_v63 }
 0x157   : > { %v6372_v26 = vpop.f32.mrf.mxu0 }
 0x1b3   : > { %v6396_v22 = vpop.f32.mrf.mxu1 }
 0x1b4   : > { %v1470_v56 = vmul.f32 %v6396_v22, %v7953_v43 }
 0x1b5   : > { %v1429_v6 = vpop.f32.mrf.mxu1 }
 0x1b6   : > { %v1468_v31 = vmul.f32 %v7949_v24, %v1429_v6 }
 0x1b7   : > { %v6397_v57 = vpop.f32.mrf.mxu1 }
 0x1b8   : > { %v1471_v19 = vmul.f32 %v6397_v57, %v7947_v33  ;;  %v7973_v33 = vunpack.c.l.bf16 %v5773_v58  ;;  %v7994_v58 = vld [vmem:[%s9854_s12 + $0x28] sm:$0xff]  }
 0x1b9   : > { %v1432_v55 = vpop.f32.mrf.mxu1  ;;  %10126 = vst [vmem:[#allocation60_spill] sm:$0xff] %v7994_v58 }
 0x1ba   : > { %v1469_v30 = vmul.f32 %v7951_v20, %v1432_v55  ;;  %10122 = vst [vmem:[#allocation56_spill] sm:$0xff] %v7973_v33  ;;  %v1477_v45 = vpack.c.bf16 %v1471_v19, %v1470_v56  ;;  %v7980_v55 = vld [vmem:[%s9854_s12 + $0x30] sm:$0xff]  }
 0x1bb   : > { %v6400_v3 = vpop.f32.mrf.mxu1  ;;  %10124 = vst [vmem:[#allocation58_spill] sm:$0xff] %v7980_v55 }
 0x1bc   : > { %v1476_v57 = vpack.c.bf16 %v1469_v30, %v1468_v31  ;;  %v1474_v22 = vmul.f32 %v6400_v3, %v7969_v36  ;;  %v7985_v31 = vpop.f32.mrf.mxu0 }
 0x1bd   : > { %v1445_v9 = vpop.f32.mrf.mxu1 }
 0x1be   : > { %6418 = vmatprep.mubr.bf16.mxu0 %v1476_v57  ;;  %v1472_v44 = vmul.f32 %v7973_v33, %v1445_v9 }
 0x1bf   : > { %6419 = vmatmul.mubr.bf16.vlgmr.msra.gmra.mxu0 %v1477_v45  ;;  %v6401_v6 = vpop.f32.mrf.mxu1  ;;  %v6373_v45 = vpop.f32.mrf.mxu0 }
 0x1c0   : > { %v1475_v56 = vmul.f32 %v6401_v6, %v7975_v53  ;;  %6451 = vmatpush3.bf16.msra.mxu0 %v7900_v25  ;;  %v7997_v30 = vpack.c.bf16 %v6373_v45, %v6372_v26  ;;  %v8006_v25 = vld [vmem:[%s9854_s12 + $0x20] sm:$0xff]   ;;  %v8015_v26 = vld [vmem:[%s9854_s12 + $0x18] sm:$0xff]  }
 0x1c1   : > { %v1448_v19 = vpop.f32.mrf.mxu1  ;;  %6452 = vmatprep.subr.bf16.mxu0 %v7980_v55  ;;  %v7999_v36 = vpop.f32.mrf.mxu0  ;;  %10128 = vst [vmem:[#allocation62_spill] sm:$0xff] %v8006_v25  ;;  %10129 = vst [vmem:[#allocation63_spill] sm:$0xff] %v8015_v26  ;;  %v8039_v45 = vld [vmem:[%s9854_s12] sm:$0xff]  }
 0x1c2   : > { %v1473_v3 = vmul.f32 %v7982_v63, %v1448_v19  ;;  %10127 = vst [vmem:[#allocation61_spill] sm:$0xff] %v7997_v30  ;;  %v1479_v57 = vpack.c.bf16 %v1475_v56, %v1474_v22  ;;  %v8025_v56 = vld [vmem:[%s9854_s12 + $0x10] sm:$0xff]   ;;  %v8032_v19 = vld [vmem:[%s9854_s12 + $0x8] sm:$0xff]   ;;  %10133 = vst [vmem:[#allocation67_spill] sm:$0xff] %v8039_v45 }
 0x1c3   : > { %v6376_v6 = vpop.f32.mrf.mxu0  ;;  %10131 = vst [vmem:[#allocation65_spill] sm:$0xff] %v8025_v56  ;;  %10132 = vst [vmem:[#allocation66_spill] sm:$0xff] %v8032_v19 }
 0x1c4   : > { %v1478_v9 = vpack.c.bf16 %v1473_v3, %v1472_v44  ;;  %6453 = vmatpush3.bf16.msra.mxu0 %v7980_v55  ;;  %v8046_v3 = vld [vmem:[%s9855_s13 + $0x4] ss:$8 sps:$4 sm:$0xff]  }
 0x1c5   : > { %6454 = vmatprep.subr.bf16.mxu0 %v7994_v58  ;;  %v8008_v33 = vpop.f32.mrf.mxu0  ;;  %10134 = vst [vmem:[#allocation68_spill] sm:$0xff] %v8046_v3 }
 0x1c6   : > { %6422 = vmatprep.mubr.bf16.mxu0 %v1478_v9  ;;  %v5757_v9 = vld [vmem:[%s9852_s10] sm:$0xff]  }
 0x1c7   : > { %6423 = vmatmul.mubr.bf16.gmra.mxu0 %v1479_v57  ;;  %v6377_v22 = vpop.f32.mrf.mxu0  ;;  %v8058_v53 = vunpack.c.l.bf16 %v5757_v9  ;;  %v8060_v43 = vunpack.c.h.bf16 %v5757_v9  ;;  %v5777_v9 = vld [vmem:[%s9852_s10 + $0x18] sm:$0xff]  }
 0x1c8   : > { %6455 = vmatpush3.bf16.msra.mxu0 %v7994_v58  ;;  %v8017_v44 = vpack.c.bf16 %v6377_v22, %v6376_v6  ;;  %v5775_v6 = vld [vmem:[%s9852_s10 + $0x8] sm:$0xff]   ;;  %v5776_v58 = vld [vmem:[%s9852_s10 + $0x10] sm:$0xff]  }
 0x1c9   : > { %6456 = vmatprep.subr.bf16.mxu0 %v8006_v25  ;;  %v8056_v63 = vunpack.c.h.bf16 %v5775_v6  ;;  %10136 = vst [vmem:[#allocation70_spill] sm:$0xff] %v8058_v53  ;;  %10137 = vst [vmem:[#allocation71_spill] sm:$0xff] %v8060_v43  ;;  %v8062_v20 = vunpack.c.l.bf16 %v5775_v6 }
 0x1ca   : > { %10130 = vst [vmem:[#allocation64_spill] sm:$0xff] %v8017_v44  ;;  %5898 = vmatprep.subr.bf16.mxu1 %v8017_v44 }
 0x1cb   : > { %10135 = vst [vmem:[#allocation69_spill] sm:$0xff] %v8056_v63  ;;  %10138 = vst [vmem:[#allocation72_spill] sm:$0xff] %v8062_v20 }
 0x1cc   : > { %6457 = vmatpush3.bf16.msra.mxu0 %v8006_v25 }
 0x1cd   : > { %6458 = vmatprep.subr.bf16.mxu0 %v8015_v26 }
 0x1d0   : > { %6459 = vmatpush3.bf16.msra.mxu0 %v8015_v26 }
 0x1d1   : > { %6460 = vmatprep.subr.bf16.mxu0 %v8025_v56 }
 0x1d4   : > { %6461 = vmatpush3.bf16.msra.mxu0 %v8025_v56 }
 0x1d5   : > { %6462 = vmatprep.subr.bf16.mxu0 %v8032_v19 }
 0x1d8   : > { %6463 = vmatpush3.bf16.msra.mxu0 %v8032_v19 }
 0x1d9   : > { %6464 = vmatprep.subr.bf16.mxu0 %v8039_v45 }
 0x1dc   : > { %6465 = vmatpush3.bf16.msra.mxu0 %v8039_v45 }
 0x1dd   : > { %1895 = vmatprep.subr.bf16.mxu0 %v8046_v3 }
 0x1f3   : > { %v6444_v57 = vpop.f32.mrf.mxu1 }
 0x1f4   : > { %v1732_v26 = vmul.f32 %v6444_v57, %v8062_v20  ;;  %v8081_v57 = vunpack.c.h.bf16 %v5776_v58  ;;  %v8083_v20 = vunpack.c.l.bf16 %v5777_v9 }
 0x1f5   : > { %v1691_v22 = vpop.f32.mrf.mxu1 }
 0x1f6   : > { %v1730_v19 = vmul.f32 %v8058_v53, %v1691_v22  ;;  %v8077_v53 = vunpack.c.h.bf16 %v5777_v9  ;;  %10141 = vst [vmem:[#allocation75_spill] sm:$0xff] %v8081_v57  ;;  %10142 = vst [vmem:[#allocation76_spill] sm:$0xff] %v8083_v20  ;;  %v9966_v9 = vmov 0  }
 0x1f7   : > { %v6445_v24 = vpop.f32.mrf.mxu1  ;;  %2133 = vmatprep.mubr.bf16.mxu1 %v9966_v9 }
 0x1f8   : > { %v1733_v3 = vmul.f32 %v6445_v24, %v8056_v63  ;;  %v6996_v24 = vld [vmem:[%s9855_s13] ss:$8 sps:$4 sm:$0xff]   ;;  %10139 = vst [vmem:[#allocation73_spill] sm:$0xff] %v8077_v53 }
 0x1f9   : > { %v1694_v45 = vpop.f32.mrf.mxu1 }
 0x1fa   : > { %v1731_v56 = vmul.f32 %v8060_v43, %v1694_v45  ;;  %v1739_v6 = vpack.c.bf16 %v1733_v3, %v1732_v26  ;;  %v8079_v45 = vunpack.c.l.bf16 %v5776_v58 }
 0x1fb   : > { %v6448_v25 = vpop.f32.mrf.mxu1 }
 0x1fc   : > { %v1738_v55 = vpack.c.bf16 %v1731_v56, %v1730_v19  ;;  %10140 = vst [vmem:[#allocation74_spill] sm:$0xff] %v8079_v45  ;;  %v1736_v63 = vmul.f32 %v6448_v25, %v8083_v20 }
 0x1fd   : > { %v1707_v22 = vpop.f32.mrf.mxu1 }
 0x1fe   : > { %6466 = vmatprep.mubr.bf16.mxu0 %v1738_v55  ;;  %v1734_v26 = vmul.f32 %v8079_v45, %v1707_v22 }
 0x1ff   : > { %v6449_v56 = vpop.f32.mrf.mxu1  ;;  %6467 = vmatmul.mubr.bf16.vlgmr.msra.gmra.mxu0 %v1739_v6 }
 0x200   : > { %1896 = vmatpush1.bf16.msra.mxu0 %v6996_v24  ;;  %v1737_v19 = vmul.f32 %v6449_v56, %v8077_v53  ;;  %v1202_v24 = vpop.f32.mrf.mxu0 }
 0x201   : > { %6802 = vmatprep.subr.msk.bf16.mxu0 %vm1358_vm1, %v7882_v10  ;;  %v1710_v43 = vpop.f32.mrf.mxu1 }
 0x202   : > { %v1735_v3 = vmul.f32 %v8081_v57, %v1710_v43  ;;  %v1741_v58 = vpack.c.bf16 %v1737_v19, %v1736_v63  ;;  %v8095_v43 = vpack.c.bf16 %v7935_v0, %v7879_v48  ;;  %v1976_v63 = vsel %vm1358_vm1, %v7829_v35, 0 }
 0x204   : > { %v1740_v55 = vpack.c.bf16 %v1735_v3, %v1734_v26  ;;  %v8115_v3 = vpack.c.bf16 %v7874_v38, %v7868_v29  ;;  %v8136_v38 = vpack.c.bf16 %v7860_v15, %v7854_v4  ;;  %v8152_v4 = vpack.c.bf16 %v7846_v47, %v7840_v42 }
 0x205   : > { %v1958_v15 = vsel %vm1358_vm1, %v7759_v5, 0 }
 0x206   : > { %6470 = vmatprep.mubr.bf16.mxu0 %v1740_v55 }
 0x207   : > { %6471 = vmatmul.mubr.bf16.gmra.mxu0 %v1741_v58 }
 0x208   : > { %1913 = vmatprep.mubr.bf16.mxu0 %v9966_v9 }
 0x27f   : > { %v6420_v6 = vpop.f32.mrf.mxu0 }
 0x281   : > { %v1562_v56 = vpop.f32.mrf.mxu0 }
 0x283   : > { %v6421_v53 = vpop.f32.mrf.mxu0 }
 0x284   : > { %v1856_v26 = vpack.c.bf16 %v6421_v53, %v6420_v6  ;;  %v1970_v53 = vsel %vm1358_vm1, %v7813_v27, 0 }
 0x285   : > { %v1565_v44 = vpop.f32.mrf.mxu0 }
 0x286   : > { %v1855_v10 = vpack.c.bf16 %v1565_v44, %v1562_v56  ;;  %v8105_v44 = vpack.c.bf16 %v7832_v37, %v7826_v32  ;;  %v8125_v32 = vpack.c.bf16 %v7816_v28, %v7810_v23  ;;  %v1964_v23 = vsel %vm1358_vm1, %v7795_v17, 0 }
 0x287   : > { %v6424_v22 = vpop.f32.mrf.mxu0  ;;  %v8144_v28 = vpack.c.bf16 %v7798_v18, %v7786_v14  ;;  %v8160_v14 = vpack.c.bf16 %v7764_v7, %v7750_v2  ;;  %v8178_v2 = vpack.c.bf16 %v7931_v12, %v7927_v1  ;;  %v8208_v12 = vpack.c.bf16 %v7971_v40, %v7955_v16  ;;  %v10150_v16 = vld [vmem:[#allocation19_spill] sm:$0xff]  ;;  %v10151_v1 = vld [vmem:[#allocation48_spill] sm:$0xff] }
 0x288   : > { %5649 = vmatmul.mubr.msk.bf16.vlgmr.msra.gmra.mxu0 %vm1358_vm1, %v1855_v10  ;;  %v1973_v0 = vsel %vm1358_vm1, %v8105_v44, 0  ;;  %v1967_v29 = vsel %vm1358_vm1, %v8125_v32, 0 }
 0x289   : > { %5875 = vmatpush3.bf16.xpose.msra.mxu0 %v1976_v63  ;;  %1923 = vmatprep.mubr.bf16.mxu0 %v9966_v9  ;;  %v1578_v25 = vpop.f32.mrf.mxu0  ;;  %v1961_v55 = vsel %vm1358_vm1, %v8144_v28, 0  ;;  %v1955_v58 = vsel %vm1358_vm1, %v8160_v14, 0  ;;  %v8166_v63 = vpack.c.bf16 %v1202_v24, %v8008_v33  ;;  %10146 = vst [vmem:[#allocation80_spill] sm:$0xff] %v8208_v12 }
 0x28a   : > { %6803 = vmatprep.subr.msk.bf16.mxu0 %vm1358_vm1, %v8095_v43 }
 0x28b   : > { %v6425_v19 = vpop.f32.mrf.mxu0  ;;  %10143 = vst [vmem:[#allocation77_spill] sm:$0xff] %v8166_v63 }
 0x28c   : > { %v1858_v37 = vpack.c.bf16 %v6425_v19, %v6424_v22  ;;  %v10153_v19 = vld [vmem:[#allocation49_spill] sm:$0xff] }
 0x28d   : > { %v1581_v48 = vpop.f32.mrf.mxu0 }
 0x28e   : > { %v1857_v10 = vpack.c.bf16 %v1581_v48, %v1578_v25  ;;  %v8187_v25 = vpack.c.bf16 %v7999_v36, %v7985_v31  ;;  %v10152_v31 = vld [vmem:[#allocation47_spill] sm:$0xff]  ;;  %v10157_v48 = vld [vmem:[#allocation40_spill] sm:$0xff] }
 0x290   : > { %5650 = vmatmul.mubr.msk.bf16.gmra.mxu0 %vm1358_vm1, %v1856_v26  ;;  %10144 = vst [vmem:[#allocation78_spill] sm:$0xff] %v8187_v25  ;;  %v8229_v26 = vpack.c.bf16 %v10153_v19, %v10152_v31 }
 0x291   : > { %5877 = vmatpush3.bf16.xpose.msra.mxu0 %v1973_v0  ;;  %1933 = vmatprep.mubr.bf16.mxu0 %v9966_v9  ;;  %v10155_v0 = vld [vmem:[#allocation41_spill] sm:$0xff] }
 0x292   : > { %6804 = vmatprep.subr.msk.bf16.mxu0 %vm1358_vm1, %v7871_v34 }
 0x298   : > { %5651 = vmatmul.mubr.msk.bf16.gmra.mxu0 %vm1358_vm1, %v1857_v10  ;;  %v10158_v10 = vld [vmem:[#allocation42_spill] sm:$0xff] }
 0x299   : > { %5879 = vmatpush3.bf16.xpose.msra.mxu0 %v1970_v53  ;;  %1943 = vmatprep.mubr.bf16.mxu0 %v9966_v9  ;;  %v8239_v53 = vpack.c.bf16 %v10158_v10, %v10157_v48 }
 0x29a   : > { %6805 = vmatprep.subr.msk.bf16.mxu0 %vm1358_vm1, %v8115_v3 }
 0x29b   : > { %10159 = vst [vmem:[#allocation19_spill] sm:$0xff] %v8239_v53 }
 0x2a0   : > { %5652 = vmatmul.mubr.msk.bf16.gmra.mxu0 %vm1358_vm1, %v1858_v37  ;;  %v10160_v37 = vld [vmem:[#allocation21_spill] sm:$0xff] }
 0x2a1   : > { %5881 = vmatpush3.bf16.xpose.msra.mxu0 %v1967_v29  ;;  %5890 = vmatprep.mubr.msk.bf16.mxu0 %vm1358_vm1, %v7735_v61  ;;  %v8247_v29 = vld [vmem:[%s9849_s7 + $0x38] sm:$0xff]  }
 0x2a2   : > { %6806 = vmatprep.subr.msk.bf16.mxu0 %vm1358_vm1, %v7857_v13  ;;  %10161 = vst [vmem:[#allocation47_spill] sm:$0xff] %v8247_v29 }
 0x2a9   : > { %5883 = vmatpush3.bf16.xpose.msra.mxu0 %v1964_v23  ;;  %v10162_v23 = vld [vmem:[#allocation39_spill] sm:$0xff] }
 0x2aa   : > { %6807 = vmatprep.subr.msk.bf16.mxu0 %vm1358_vm1, %v8136_v38 }
 0x2b1   : > { %5885 = vmatpush3.bf16.xpose.msra.mxu0 %v1961_v55  ;;  %v10163_v55 = vld [vmem:[#allocation18_spill] sm:$0xff] }
 0x2b2   : > { %6808 = vmatprep.subr.msk.bf16.mxu0 %vm1358_vm1, %v7843_v46 }
 0x2b9   : > { %5887 = vmatpush3.bf16.xpose.msra.mxu0 %v1958_v15 }
 0x2ba   : > { %6809 = vmatprep.subr.msk.bf16.mxu0 %vm1358_vm1, %v8152_v4 }
 0x2bf   : > { %v6468_v18 = vpop.f32.mrf.mxu0 }
 0x2c1   : > { %v1824_v6 = vpop.f32.mrf.mxu0  ;;  %5889 = vmatpush3.bf16.xpose.msra.mxu0 %v1955_v58 }
 0x2c2   : > { %6498 = vmatprep.subr.bf16.mxu0 %v7659_v49 }
 0x2c3   : > { %v6469_v42 = vpop.f32.mrf.mxu0 }
 0x2c4   : > { %v2076_v7 = vpack.c.bf16 %v6469_v42, %v6468_v18 }
 0x2c5   : > { %v1827_v47 = vpop.f32.mrf.mxu0 }
 0x2c6   : > { %v2075_v56 = vpack.c.bf16 %v1827_v47, %v1824_v6 }
 0x2c7   : > { %v6472_v22 = vpop.f32.mrf.mxu0 }
 0x2c8   : > { %5891 = vmatmul.mubr.msk.bf16.vlgmr.msra.gmra.mxu0 %vm1358_vm1, %v7735_v61  ;;  %5659 = vmatmul.mubr.msk.bf16.vlgmr.msra.gmra.mxu1 %vm1358_vm1, %v2075_v56 }
 0x2c9   : > { %5899 = vmatpush3.bf16.msra.mxu1 %v7929_v21  ;;  %5892 = vmatprep.mubr.msk.bf16.mxu0 %vm1358_vm1, %v7739_v62  ;;  %v1840_v33 = vpop.f32.mrf.mxu0 }
 0x2ca   : > { %5900 = vmatprep.subr.bf16.mxu1 %v8166_v63  ;;  %2143 = vmatprep.mubr.bf16.mxu1 %v9966_v9 }
 0x2cb   : > { %6499 = vmatpush3.bf16.msra.mxu0 %v7659_v49  ;;  %v6473_v24 = vpop.f32.mrf.mxu0  ;;  %v8199_v49 = vpack.c.bf16 %v7925_v39, %v7921_v60  ;;  %v10148_v39 = vld [vmem:[#allocation45_spill] sm:$0xff] }
 0x2cc   : > { %6500 = vmatprep.subr.bf16.mxu0 %v7665_v50  ;;  %v2078_v40 = vpack.c.bf16 %v6473_v24, %v6472_v22  ;;  %10154 = vst [vmem:[#allocation45_spill] sm:$0xff] %v8229_v26 }
 0x2cd   : > { %5901 = vmatpush3.bf16.msra.mxu1 %v8178_v2  ;;  %10145 = vst [vmem:[#allocation79_spill] sm:$0xff] %v8199_v49  ;;  %v1843_v36 = vpop.f32.mrf.mxu0 }
 0x2ce   : > { %5902 = vmatprep.subr.bf16.mxu1 %v7997_v30 }
 0x2cf   : > { %6501 = vmatpush3.bf16.msra.mxu0 %v7665_v50  ;;  %v2077_v50 = vpack.c.bf16 %v1843_v36, %v1840_v33 }
 0x2d0   : > { %5893 = vmatmul.mubr.msk.bf16.gmra.mxu0 %vm1358_vm1, %v7739_v62  ;;  %5660 = vmatmul.mubr.msk.bf16.gmra.mxu1 %vm1358_vm1, %v2076_v7 }
 0x2d1   : > { %5903 = vmatpush3.bf16.msra.mxu1 %v7923_v41  ;;  %5894 = vmatprep.mubr.msk.bf16.mxu0 %vm1358_vm1, %v7778_v11 }
 0x2d2   : > { %5904 = vmatprep.subr.bf16.mxu1 %v8187_v25  ;;  %2153 = vmatprep.mubr.bf16.mxu1 %v9966_v9 }
 0x2d3   : > { %6502 = vmatprep.subr.bf16.mxu0 %v7676_v51 }
 0x2d4   : > { %6503 = vmatpush3.bf16.msra.mxu0 %v7676_v51  ;;  %v10147_v51 = vld [vmem:[#allocation43_spill] sm:$0xff] }
 0x2d5   : > { %5905 = vmatpush3.bf16.msra.mxu1 %v8199_v49  ;;  %6504 = vmatprep.subr.bf16.mxu0 %v7683_v52  ;;  %v8220_v60 = vpack.c.bf16 %v10148_v39, %v10147_v51 }
 0x2d6   : > { %5906 = vmatprep.subr.bf16.mxu1 %v7966_v54 }
 0x2d7   : > { %10149 = vst [vmem:[#allocation43_spill] sm:$0xff] %v8220_v60 }
 0x2d8   : > { %5895 = vmatmul.mubr.msk.bf16.gmra.mxu0 %vm1358_vm1, %v7778_v11  ;;  %5661 = vmatmul.mubr.msk.bf16.gmra.mxu1 %vm1358_vm1, %v2077_v50 }
 0x2d9   : > { %5907 = vmatpush3.bf16.msra.mxu1 %v7917_v59  ;;  %5896 = vmatprep.mubr.msk.bf16.mxu0 %vm1358_vm1, %v7772_v8 }
 0x2da   : > { %5908 = vmatprep.subr.bf16.mxu1 %v8208_v12  ;;  %2163 = vmatprep.mubr.bf16.mxu1 %v9966_v9 }
 0x2db   : > { %6505 = vmatpush3.bf16.msra.mxu0 %v7683_v52  ;;  %v10156_v52 = vld [vmem:[#allocation20_spill] sm:$0xff] }
 0x2dc   : > { %6506 = vmatprep.subr.bf16.mxu0 %v10150_v16 }
 0x2dd   : > { %5909 = vmatpush3.bf16.msra.mxu1 %v8220_v60 }
 0x2de   : > { %5910 = vmatprep.subr.bf16.mxu1 %v10151_v1 }
 0x2df   : > { %6507 = vmatpush3.bf16.msra.mxu0 %v10150_v16 }
 0x2e0   : > { %5897 = vmatmul.mubr.msk.bf16.gmra.mxu0 %vm1358_vm1, %v7772_v8  ;;  %5662 = vmatmul.mubr.msk.bf16.gmra.mxu1 %vm1358_vm1, %v2078_v40 }
 0x2e1   : > { %5911 = vmatpush3.bf16.msra.mxu1 %v10155_v0  ;;  %6508 = vmatprep.subr.bf16.mxu0 %v10156_v52 }
 0x2e2   : > { %5912 = vmatprep.subr.bf16.mxu1 %v8229_v26 }
 0x2e3   : > { %6509 = vmatpush3.bf16.msra.mxu0 %v10156_v52 }
 0x2e4   : > { %6510 = vmatprep.subr.bf16.mxu0 %v10160_v37 }
 0x2e5   : > { %5913 = vmatpush3.bf16.msra.mxu1 %v8239_v53 }
 0x2e6   : > { %6810 = vmatprep.subr.msk.bf16.mxu1 %vm1358_vm1, %v8247_v29 }
 0x2e7   : > { %6511 = vmatpush3.bf16.msra.mxu0 %v10160_v37 }
 0x2e8   : > { %6512 = vmatprep.subr.bf16.mxu0 %v10162_v23 }
 0x2eb   : > { %6513 = vmatpush3.bf16.msra.mxu0 %v10162_v23 }
 0x2ec   : > { %6818 = vmatprep.subr.msk.bf16.mxu0 %vm1358_vm1, %v10163_v55 }
 0x348   : > { %v1915_v15 = vpop.f32.mrf.mxu0 }
 0x34a   : > { %v1917_v18 = vpop.f32.mrf.mxu0 }
 0x34c   : > { %v1919_v58 = vpop.f32.mrf.mxu0 }
 0x34e   : > { %v1921_v6 = vpop.f32.mrf.mxu0 }
 0x350   : > { %v1925_v42 = vpop.f32.mrf.mxu0 }
 0x352   : > { %v1927_v47 = vpop.f32.mrf.mxu0 }
 0x354   : > { %v1929_v56 = vpop.f32.mrf.mxu0 }
 0x356   : > { %v1931_v22 = vpop.f32.mrf.mxu0 }
 0x358   : > { %v1935_v33 = vpop.f32.mrf.mxu0 }
 0x35a   : > { %v1937_v7 = vpop.f32.mrf.mxu0 }
 0x35c   : > { %v1939_v24 = vpop.f32.mrf.mxu0 }
 0x35e   : > { %v1941_v36 = vpop.f32.mrf.mxu0 }
 0x360   : > { %v8256_v50 = vpop.f32.mrf.mxu0 }
 0x362   : > { %v8258_v51 = vpop.f32.mrf.mxu0 }
 0x364   : > { %v8260_v39 = vpop.f32.mrf.mxu0 }
 0x366   : > { %v8262_v16 = vpop.f32.mrf.mxu0 }
 0x388   : > { %v2036_v40 = vpop.f32.mrf.mxu0  ;;  %v2135_v31 = vpop.f32.mrf.mxu1 }
 0x389   : > { %v2037_v19 = vadd.f32 %v2036_v40, %v1915_v15 }
 0x38a   : > { %v2038_v52 = vpop.f32.mrf.mxu0  ;;  %v2137_v48 = vpop.f32.mrf.mxu1 }
 0x38b   : > { %v2039_v10 = vadd.f32 %v2038_v52, %v1917_v18  ;;  %v8264_v55 = vadd.f32 %v2135_v31, %v2037_v19 }
 0x38c   : > { %v2040_v37 = vpop.f32.mrf.mxu0  ;;  %v2139_v23 = vpop.f32.mrf.mxu1 }
 0x38d   : > { %v8266_v9 = vadd.f32 %v2137_v48, %v2039_v10  ;;  %v2041_v26 = vadd.f32 %v2040_v37, %v1919_v58 }
 0x38e   : > { %v2042_v53 = vpop.f32.mrf.mxu0  ;;  %v2141_v20 = vpop.f32.mrf.mxu1 }
 0x38f   : > { %v2043_v57 = vadd.f32 %v2042_v53, %v1921_v6  ;;  %v2190_v45 = vmax.f32 %v8264_v55, %v8266_v9  ;;  %v8270_v60 = vadd.f32 %v2139_v23, %v2041_v26 }
 0x390   : > { %v2046_v29 = vpop.f32.mrf.mxu0  ;;  %v2145_v0 = vpop.f32.mrf.mxu1 }
 0x391   : > { %v8272_v15 = vadd.f32 %v2141_v20, %v2043_v57  ;;  %v2047_v18 = vadd.f32 %v2046_v29, %v1925_v42  ;;  %2191 = vmax.xlane.f32.xlu0 %v2190_v45 }
 0x392   : > { %v2048_v40 = vpop.f32.mrf.mxu0  ;;  %v2147_v31 = vpop.f32.mrf.mxu1 }
 0x393   : > { %v2049_v19 = vadd.f32 %v2048_v40, %v1927_v47  ;;  %v2193_v58 = vmax.f32 %v8270_v60, %v8272_v15  ;;  %v8276_v53 = vadd.f32 %v2145_v0, %v2047_v18 }
 0x394   : > { %v2050_v52 = vpop.f32.mrf.mxu0  ;;  %v2149_v48 = vpop.f32.mrf.mxu1 }
 0x395   : > { %v8278_v6 = vadd.f32 %v2147_v31, %v2049_v19  ;;  %v2051_v10 = vadd.f32 %v2050_v52, %v1929_v56  ;;  %2194 = vmax.xlane.f32.xlu0 %v2193_v58 }
 0x396   : > { %v2052_v26 = vpop.f32.mrf.mxu0  ;;  %v2151_v37 = vpop.f32.mrf.mxu1 }
 0x397   : > { %v2053_v20 = vadd.f32 %v2052_v26, %v1931_v22  ;;  %v2196_v45 = vmax.f32 %v8276_v53, %v8278_v6  ;;  %v8282_v42 = vadd.f32 %v2149_v48, %v2051_v10 }
 0x398   : > { %v2056_v57 = vpop.f32.mrf.mxu0  ;;  %v2155_v29 = vpop.f32.mrf.mxu1 }
 0x399   : > { %v8284_v47 = vadd.f32 %v2151_v37, %v2053_v20  ;;  %v2057_v23 = vadd.f32 %v2056_v57, %v1935_v33  ;;  %2197 = vmax.xlane.f32.xlu1 %v2196_v45 }
 0x39a   : > { %v2058_v0 = vpop.f32.mrf.mxu0  ;;  %v2157_v18 = vpop.f32.mrf.mxu1 }
 0x39b   : > { %v2059_v40 = vadd.f32 %v2058_v0, %v1937_v7  ;;  %v2199_v56 = vmax.f32 %v8282_v42, %v8284_v47  ;;  %v8288_v22 = vadd.f32 %v2155_v29, %v2057_v23 }
 0x39c   : > { %v2060_v31 = vpop.f32.mrf.mxu0  ;;  %v2159_v19 = vpop.f32.mrf.mxu1 }
 0x39d   : > { %v8290_v58 = vadd.f32 %v2157_v18, %v2059_v40  ;;  %v2061_v52 = vadd.f32 %v2060_v31, %v1939_v24  ;;  %2200 = vmax.xlane.f32.xlu1 %v2199_v56 }
 0x39e   : > { %v2062_v48 = vpop.f32.mrf.mxu0  ;;  %v2161_v10 = vpop.f32.mrf.mxu1 }
 0x39f   : > { %v2063_v26 = vadd.f32 %v2062_v48, %v1941_v36  ;;  %v2202_v33 = vmax.f32 %v8288_v22, %v8290_v58  ;;  %v8294_v7 = vadd.f32 %v2159_v19, %v2061_v52 }
 0x3a0   : > { %v2066_v37 = vpop.f32.mrf.mxu0  ;;  %v2165_v20 = vpop.f32.mrf.mxu1 }
 0x3a1   : > { %v8296_v45 = vadd.f32 %v2161_v10, %v2063_v26  ;;  %v2067_v57 = vadd.f32 %v2066_v37, %v8256_v50  ;;  %2203 = vmax.xlane.f32.xlu0 %v2202_v33  ;;  %v10166_v33 = vld [vmem:[#allocation43_spill] sm:$0xff]  ;;  %v10167_v37 = vld [vmem:[#allocation41_spill] sm:$0xff] }
 0x3a2   : > { %v2068_v29 = vpop.f32.mrf.mxu0  ;;  %v2167_v23 = vpop.f32.mrf.mxu1 }
 0x3a3   : > { %v2069_v24 = vadd.f32 %v2068_v29, %v8258_v51  ;;  %v2205_v0 = vmax.f32 %v8294_v7, %v8296_v45  ;;  %v8302_v40 = vadd.f32 %v2165_v20, %v2067_v57 }
 0x3a4   : > { %v2070_v36 = vpop.f32.mrf.mxu0  ;;  %v2169_v18 = vpop.f32.mrf.mxu1 }
 0x3a5   : > { %v8304_v56 = vadd.f32 %v2167_v23, %v2069_v24  ;;  %v2071_v31 = vadd.f32 %v2070_v36, %v8260_v39  ;;  %2206 = vmax.xlane.f32.xlu1 %v2205_v0  ;;  %v10164_v39 = vld [vmem:[#allocation38_spill] sm:$0xff] }
 0x3a6   : > { %v2072_v19 = vpop.f32.mrf.mxu0  ;;  %v2171_v48 = vpop.f32.mrf.mxu1 }
 0x3a7   : > { %v2073_v50 = vadd.f32 %v2072_v19, %v8262_v16  ;;  %v2208_v52 = vmax.f32 %v8302_v40, %v8304_v56  ;;  %v8310_v51 = vadd.f32 %v2169_v18, %v2071_v31  ;;  %v10165_v16 = vld [vmem:[#allocation64_spill] sm:$0xff] }
 0x3a9   : > { %v8312_v10 = vadd.f32 %v2171_v48, %v2073_v50  ;;  %2209 = vmax.xlane.f32.xlu0 %v2208_v52 }
 0x3ab   : > { %v2211_v26 = vmax.f32 %v8310_v51, %v8312_v10 }
 0x3ad   : > { %2212 = vmax.xlane.f32.xlu1 %v2211_v26 }
 0x3be   : > { %2397 = vrot.lane.b32.xlu1 %v7739_v62, %s7314_s0 }
 0x3bf   : > { %2395 = vrot.lane.b32.xlu0 %v7735_v61, %s7314_s0 }
 0x3c2   : > { %2399 = vrot.lane.b32.xlu1 %v7778_v11, %s7314_s0 }
 0x3c3   : > { %2818 = vrot.lane.b32.xlu0 %v7829_v35, %s7314_s0 }
 0x3c6   : > { %2401 = vrot.lane.b32.xlu1 %v7772_v8, %s7314_s0 }
 0x3c7   : > { %2816 = vrot.lane.b32.xlu0 %v8105_v44, %s7314_s0 }
 0x3ca   : > { %2834 = vrot.lane.b32.xlu1 %v10164_v39, %s7314_s0 }
 0x3cb   : > { %2814 = vrot.lane.b32.xlu0 %v7813_v27, %s7314_s0 }
 0x3ce   : > { %2832 = vrot.lane.b32.xlu1 %v8095_v43, %s7314_s0 }
 0x3cf   : > { %2812 = vrot.lane.b32.xlu0 %v8125_v32, %s7314_s0 }
 0x3d2   : > { %2830 = vrot.lane.b32.xlu1 %v7871_v34, %s7314_s0 }
 0x3d3   : > { %2810 = vrot.lane.b32.xlu0 %v7795_v17, %s7314_s0 }
 0x3d6   : > { %2828 = vrot.lane.b32.xlu1 %v8115_v3, %s7314_s0 }
 0x3d7   : > { %2808 = vrot.lane.b32.xlu0 %v8144_v28, %s7314_s0 }
 0x3da   : > { %2826 = vrot.lane.b32.xlu1 %v7857_v13, %s7314_s0 }
 0x3db   : > { %2806 = vrot.lane.b32.xlu0 %v7759_v5, %s7314_s0 }
 0x3de   : > { %2824 = vrot.lane.b32.xlu1 %v8136_v38, %s7314_s0 }
 0x3df   : > { %2804 = vrot.lane.b32.xlu0 %v8160_v14, %s7314_s0 }
 0x3e2   : > { %2822 = vrot.lane.b32.xlu1 %v7843_v46, %s7314_s0 }
 0x3e3   : > { %3392 = vrot.lane.b32.xlu0 %v7735_v61, %s7315_s26 }
 0x3e6   : > { %2820 = vrot.lane.b32.xlu1 %v8152_v4, %s7314_s0 }
 0x3e7   : > { %3396 = vrot.lane.b32.xlu0 %v7778_v11, %s7315_s26 }
 0x3ea   : > { %3394 = vrot.lane.b32.xlu1 %v7739_v62, %s7315_s26 }
 0x3eb   : > { %3212 = vrot.lane.b32.xlu0 %v10165_v16, %s7314_s0 }
 0x3ee   : > { %3398 = vrot.lane.b32.xlu1 %v7772_v8, %s7315_s26 }
 0x3ef   : > { %3210 = vrot.lane.b32.xlu0 %v8166_v63, %s7314_s0 }
 0x3f2   : > { %3196 = vrot.lane.b32.xlu1 %v7929_v21, %s7314_s0 }
 0x3f3   : > { %3208 = vrot.lane.b32.xlu0 %v7997_v30, %s7314_s0 }
 0x3f6   : > { %3194 = vrot.lane.b32.xlu1 %v8178_v2, %s7314_s0 }
 0x3f7   : > { %3206 = vrot.lane.b32.xlu0 %v8187_v25, %s7314_s0  ;;  %v10207_v25 = vld [vmem:[#allocation53_spill] sm:$0xff] }
 0x3fa   : > { %3192 = vrot.lane.b32.xlu1 %v7923_v41, %s7314_s0 }
 0x3fb   : > { %3204 = vrot.lane.b32.xlu0 %v7966_v54, %s7314_s0 }
 0x3fe   : > { %3190 = vrot.lane.b32.xlu1 %v8199_v49, %s7314_s0 }
 0x3ff   : > { %3202 = vrot.lane.b32.xlu0 %v8208_v12, %s7314_s0 }
 0x402   : > { %3188 = vrot.lane.b32.xlu1 %v7917_v59, %s7314_s0 }
 0x403   : > { %3200 = vrot.lane.b32.xlu0 %v10151_v1, %s7314_s0 }
 0x406   : > { %3186 = vrot.lane.b32.xlu1 %v10166_v33, %s7314_s0 }
 0x40a   : > { %3184 = vrot.lane.b32.xlu1 %v10167_v37, %s7314_s0 }
 0x41a   : > { %v2192_v20 = vpop.xlane.xlu0 %2191 }
 0x41b   : > { %v2214_v57 = vsub.f32 %v8264_v55, %v2192_v20  ;;  %v2215_v29 = vsub.f32 %v8266_v9, %v2192_v20 }
 0x41d   : > { %v2230_v23 = vmul.f32 1.442695, %v2214_v57  ;;  %v2232_v24 = vmul.f32 1.442695, %v2215_v29 }
 0x41e   : > { %v2195_v0 = vpop.xlane.xlu0 %2194 }
 0x41f   : > { %7004 = vpow2.f32 %v2230_v23  ;;  %v2216_v36 = vsub.f32 %v8270_v60, %v2195_v0  ;;  %v2217_v18 = vsub.f32 %v8272_v15, %v2195_v0 }
 0x420   : > { %7006 = vpow2.f32 %v2232_v24 }
 0x421   : > { %v2234_v31 = vmul.f32 1.442695, %v2216_v36  ;;  %v2236_v19 = vmul.f32 1.442695, %v2217_v18 }
 0x422   : > { %v2198_v50 = vpop.xlane.xlu1 %2197 }
 0x423   : > { %7008 = vpow2.f32 %v2234_v31  ;;  %v2218_v52 = vsub.f32 %v8276_v53, %v2198_v50  ;;  %v2219_v48 = vsub.f32 %v8278_v6, %v2198_v50 }
 0x424   : > { %7010 = vpow2.f32 %v2236_v19 }
 0x425   : > { %v2238_v55 = vmul.f32 1.442695, %v2218_v52  ;;  %v2240_v9 = vmul.f32 1.442695, %v2219_v48 }
 0x426   : > { %v2201_v26 = vpop.xlane.xlu1 %2200 }
 0x427   : > { %7012 = vpow2.f32 %v2238_v55  ;;  %v2220_v20 = vsub.f32 %v8282_v42, %v2201_v26  ;;  %v2221_v60 = vsub.f32 %v8284_v47, %v2201_v26 }
 0x428   : > { %7014 = vpow2.f32 %v2240_v9 }
 0x429   : > { %v2242_v15 = vmul.f32 1.442695, %v2220_v20  ;;  %v2244_v57 = vmul.f32 1.442695, %v2221_v60 }
 0x42a   : > { %v2204_v29 = vpop.xlane.xlu0 %2203 }
 0x42b   : > { %7016 = vpow2.f32 %v2242_v15  ;;  %v2222_v23 = vsub.f32 %v8288_v22, %v2204_v29  ;;  %v2223_v53 = vsub.f32 %v8290_v58, %v2204_v29 }
 0x42c   : > { %v7005_v24 = vpop.eup %7004  ;;  %7018 = vpow2.f32 %v2244_v57  ;;  %v10170_v57 = vld [vmem:[#allocation10_spill] sm:$0xff] }
 0x42d   : > { %v7007_v6 = vpop.eup %7006  ;;  %v2246_v0 = vmul.f32 1.442695, %v2222_v23  ;;  %v2248_v36 = vmul.f32 1.442695, %v2223_v53 }
 0x42e   : > { %v2207_v18 = vpop.xlane.xlu1 %2206  ;;  %v8402_v31 = vadd.f32 %v7007_v6, %v7005_v24 }
 0x42f   : > { %7020 = vpow2.f32 %v2246_v0  ;;  %v2224_v42 = vsub.f32 %v8294_v7, %v2207_v18  ;;  %v2225_v47 = vsub.f32 %v8296_v45, %v2207_v18 }
 0x430   : > { %10168 = vst [vmem:[#allocation49_spill] sm:$0xff] %v8402_v31  ;;  %v7009_v19 = vpop.eup %7008  ;;  %7022 = vpow2.f32 %v2248_v36 }
 0x431   : > { %v7011_v50 = vpop.eup %7010  ;;  %v2250_v52 = vmul.f32 1.442695, %v2224_v42  ;;  %v2252_v22 = vmul.f32 1.442695, %v2225_v47  ;;  %v2286_v48 = vpack.c.bf16 %v7009_v19, %v7005_v24 }
 0x432   : > { %v2210_v58 = vpop.xlane.xlu0 %2209  ;;  %v2287_v55 = vpack.c.bf16 %v7011_v50, %v7007_v6  ;;  %v8406_v9 = vadd.f32 %v7011_v50, %v7009_v19  ;;  %v10173_v19 = vld [vmem:[#allocation11_spill] sm:$0xff] }
 0x433   : > { %7024 = vpow2.f32 %v2250_v52  ;;  %v2226_v26 = vsub.f32 %v8302_v40, %v2210_v58  ;;  %v2227_v20 = vsub.f32 %v8304_v56, %v2210_v58  ;;  %v8418_v40 = vld [vmem:[%s9849_s7 + $0x30] sm:$0xff]   ;;  %v8430_v52 = vld [vmem:[%s9849_s7 + $0x28] sm:$0xff]  }
 0x434   : > { %10169 = vst [vmem:[#allocation20_spill] sm:$0xff] %v8406_v9  ;;  %v7013_v60 = vpop.eup %7012  ;;  %7026 = vpow2.f32 %v2252_v22  ;;  %2326 = vmatprep.mubr.bf16.mxu1 %v2287_v55 }
 0x435   : > { %v7015_v7 = vpop.eup %7014  ;;  %v2254_v45 = vmul.f32 1.442695, %v2226_v26  ;;  %v2256_v15 = vmul.f32 1.442695, %v2227_v20  ;;  %2327 = vmatmul.mubr.bf16.vlgmr.msra.gmra.mxu1 %v2286_v48 }
 0x436   : > { %6475 = vmatpush3.bf16.xpose.msra.mxu1 %v10170_v57  ;;  %v2213_v29 = vpop.xlane.xlu1 %2212  ;;  %v8411_v23 = vadd.f32 %v7015_v7, %v7013_v60 }
 0x437   : > { %7028 = vpow2.f32 %v2254_v45  ;;  %v2228_v53 = vsub.f32 %v8310_v51, %v2213_v29  ;;  %v2229_v24 = vsub.f32 %v8312_v10, %v2213_v29  ;;  %6811 = vmatprep.subr.msk.bf16.mxu1 %vm1358_vm1, %v8418_v40 }
 0x438   : > { %10171 = vst [vmem:[#allocation40_spill] sm:$0xff] %v8411_v23  ;;  %v7017_v56 = vpop.eup %7016  ;;  %7030 = vpow2.f32 %v2256_v15  ;;  %v8442_v15 = vld [vmem:[%s9849_s7 + $0x20] sm:$0xff]   ;;  %v10188_v23 = vld [vmem:[#allocation65_spill] sm:$0xff] }
 0x439   : > { %v7019_v6 = vpop.eup %7018  ;;  %v2258_v0 = vmul.f32 1.442695, %v2228_v53  ;;  %v2260_v36 = vmul.f32 1.442695, %v2229_v24  ;;  %v2288_v18 = vpack.c.bf16 %v7017_v56, %v7013_v60 }
 0x43a   : > { %v2289_v42 = vpack.c.bf16 %v7019_v6, %v7015_v7  ;;  %v8422_v47 = vadd.f32 %v7019_v6, %v7017_v56  ;;  %v10176_v7 = vld [vmem:[#allocation12_spill] sm:$0xff] }
 0x43b   : > { %7032 = vpow2.f32 %v2258_v0  ;;  %v8448_v0 = vpop.permute.xlu0 %2395 }
 0x43c   : > { %10172 = vst [vmem:[#allocation42_spill] sm:$0xff] %v8422_v47  ;;  %v7021_v51 = vpop.eup %7020  ;;  %7034 = vpow2.f32 %v2260_v36  ;;  %2334 = vmatprep.mubr.bf16.mxu1 %v2289_v42  ;;  %v10179_v36 = vld [vmem:[#allocation13_spill] sm:$0xff]  ;;  %v10180_v42 = vld [vmem:[#allocation14_spill] sm:$0xff] }
 0x43d   : > { %v7023_v10 = vpop.eup %7022  ;;  %2335 = vmatmul.mubr.bf16.gmra.mxu1 %v2288_v18  ;;  %v8456_v18 = vld [vmem:[%s9849_s7 + $0x18] sm:$0xff]  }
 0x43e   : > { %6477 = vmatpush3.bf16.xpose.msra.mxu1 %v10173_v19  ;;  %v8425_v50 = vadd.f32 %v7023_v10, %v7021_v51 }
 0x43f   : > { %6812 = vmatprep.subr.msk.bf16.mxu1 %vm1358_vm1, %v8430_v52 }
 0x440   : > { %10174 = vst [vmem:[#allocation21_spill] sm:$0xff] %v8425_v50  ;;  %v7025_v22 = vpop.eup %7024 }
 0x441   : > { %v7027_v48 = vpop.eup %7026  ;;  %v2290_v58 = vpack.c.bf16 %v7025_v22, %v7021_v51  ;;  %v8464_v51 = vld [vmem:[%s9849_s7 + $0x10] sm:$0xff]  }
 0x442   : > { %v2291_v55 = vpack.c.bf16 %v7027_v48, %v7023_v10  ;;  %v8434_v26 = vadd.f32 %v7027_v48, %v7025_v22  ;;  %v10181_v10 = vld [vmem:[#allocation15_spill] sm:$0xff]  ;;  %v10182_v48 = vld [vmem:[#allocation16_spill] sm:$0xff] }
 0x443   : > { %v8472_v22 = vld [vmem:[%s9849_s7 + $0x8] sm:$0xff]  }
 0x444   : > { %10175 = vst [vmem:[#allocation39_spill] sm:$0xff] %v8434_v26  ;;  %v7029_v20 = vpop.eup %7028  ;;  %2342 = vmatprep.mubr.bf16.mxu1 %v2291_v55  ;;  %v10183_v55 = vld [vmem:[#allocation17_spill] sm:$0xff]  ;;  %v10190_v26 = vld [vmem:[#allocation67_spill] sm:$0xff] }
 0x445   : > { %v7031_v60 = vpop.eup %7030  ;;  %2343 = vmatmul.mubr.bf16.gmra.mxu1 %v2290_v58  ;;  %v8480_v58 = vld [vmem:[%s9849_s7] sm:$0xff]  }
 0x446   : > { %6479 = vmatpush3.bf16.xpose.msra.mxu1 %v10176_v7  ;;  %v8437_v45 = vadd.f32 %v7031_v60, %v7029_v20 }
 0x447   : > { %6813 = vmatprep.subr.msk.bf16.mxu1 %vm1358_vm1, %v8442_v15 }
 0x448   : > { %10177 = vst [vmem:[#allocation18_spill] sm:$0xff] %v8437_v45  ;;  %v7033_v29 = vpop.eup %7032  ;;  %v10186_v45 = vld [vmem:[#allocation62_spill] sm:$0xff] }
 0x449   : > { %v7035_v53 = vpop.eup %7034  ;;  %v2292_v24 = vpack.c.bf16 %v7033_v29, %v7029_v20  ;;  %v8485_v20 = vpop.permute.xlu1 %2397 }
 0x44a   : > { %v2293_v56 = vpack.c.bf16 %v7035_v53, %v7031_v60  ;;  %v8446_v6 = vadd.f32 %v7035_v53, %v7033_v29  ;;  %v8490_v60 = vld [vmem:[%s9854_s12 + $0x38] sm:$0xff]   ;;  %v10184_v53 = vld [vmem:[#allocation58_spill] sm:$0xff] }
 0x44c   : > { %10178 = vst [vmem:[#allocation38_spill] sm:$0xff] %v8446_v6  ;;  %2350 = vmatprep.mubr.bf16.mxu1 %v2293_v56  ;;  %v10187_v6 = vld [vmem:[#allocation63_spill] sm:$0xff] }
 0x44d   : > { %2351 = vmatmul.mubr.bf16.gmra.mxu1 %v2292_v24  ;;  %v8493_v29 = vpop.permute.xlu1 %2399  ;;  %v10185_v24 = vld [vmem:[#allocation60_spill] sm:$0xff] }
 0x44e   : > { %6481 = vmatpush3.bf16.xpose.msra.mxu1 %v10179_v36  ;;  %6490 = vmatprep.mubr.msk.bf16.mxu1 %vm1358_vm1, %v8448_v0 }
 0x44f   : > { %6814 = vmatprep.subr.msk.bf16.mxu1 %vm1358_vm1, %v8456_v18 }
 0x451   : > { %v8503_v56 = vpop.permute.xlu1 %2401 }
 0x456   : > { %6483 = vmatpush3.bf16.xpose.msra.mxu1 %v10180_v42 }
 0x457   : > { %6815 = vmatprep.subr.msk.bf16.mxu1 %vm1358_vm1, %v8464_v51 }
 0x45e   : > { %6485 = vmatpush3.bf16.xpose.msra.mxu1 %v10181_v10 }
 0x45f   : > { %6816 = vmatprep.subr.msk.bf16.mxu1 %vm1358_vm1, %v8472_v22 }
 0x466   : > { %6487 = vmatpush3.bf16.xpose.msra.mxu1 %v10182_v48 }
 0x467   : > { %6817 = vmatprep.subr.msk.bf16.mxu1 %vm1358_vm1, %v8480_v58 }
 0x46e   : > { %6489 = vmatpush3.bf16.xpose.msra.mxu1 %v10183_v55 }
 0x46f   : > { %6546 = vmatprep.subr.bf16.mxu1 %v8490_v60 }
 0x475   : > { %6491 = vmatmul.mubr.msk.bf16.vlgmr.msra.gmra.mxu1 %vm1358_vm1, %v8485_v20 }
 0x476   : > { %6494 = vmatprep.mubr.msk.bf16.mxu1 %vm1358_vm1, %v8493_v29  ;;  %6547 = vmatpush3.bf16.msra.mxu1 %v8490_v60 }
 0x477   : > { %6548 = vmatprep.subr.bf16.mxu1 %v10184_v53 }
 0x47a   : > { %6549 = vmatpush3.bf16.msra.mxu1 %v10184_v53  ;;  %v10189_v53 = vld [vmem:[#allocation66_spill] sm:$0xff] }
 0x47b   : > { %6550 = vmatprep.subr.bf16.mxu1 %v10185_v24 }
 0x47d   : > { %6495 = vmatmul.mubr.msk.bf16.gmra.mxu1 %vm1358_vm1, %v8503_v56 }
 0x47e   : > { %6551 = vmatpush3.bf16.msra.mxu1 %v10185_v24  ;;  %v10191_v24 = vld [vmem:[#allocation68_spill] sm:$0xff] }
 0x47f   : > { %6552 = vmatprep.subr.bf16.mxu1 %v10186_v45 }
 0x482   : > { %6553 = vmatpush3.bf16.msra.mxu1 %v10186_v45 }
 0x483   : > { %6554 = vmatprep.subr.bf16.mxu1 %v10187_v6 }
 0x486   : > { %6555 = vmatpush3.bf16.msra.mxu1 %v10187_v6 }
 0x487   : > { %6556 = vmatprep.subr.bf16.mxu1 %v10188_v23 }
 0x48a   : > { %6557 = vmatpush3.bf16.msra.mxu1 %v10188_v23 }
 0x48b   : > { %6558 = vmatprep.subr.bf16.mxu1 %v10189_v53 }
 0x48e   : > { %6559 = vmatpush3.bf16.msra.mxu1 %v10189_v53 }
 0x48f   : > { %6560 = vmatprep.subr.bf16.mxu1 %v10190_v26 }
 0x492   : > { %6561 = vmatpush3.bf16.msra.mxu1 %v10190_v26 }
 0x493   : > { %2729 = vmatprep.subr.bf16.mxu1 %v10191_v24 }
 0x4f5   : > { %v5914_v47 = vpop.f32.mrf.mxu1 }
 0x4f7   : > { %v5915_v45 = vpop.f32.mrf.mxu1 }
 0x4f8   : > { %v8519_v50 = vadd.f32 %v5915_v45, %v5914_v47 }
 0x4f9   : > { %v8521_v9 = vpop.f32.mrf.mxu1 }
 0x4fa   : > { %10192 = vst [vmem:[#allocation64_spill] sm:$0xff] %v8519_v50  ;;  %10193 = vst [vmem:[#allocation58_spill] sm:$0xff] %v8521_v9 }
 0x4fb   : > { %v8523_v6 = vpop.f32.mrf.mxu1 }
 0x4fc   : > { %10194 = vst [vmem:[#allocation60_spill] sm:$0xff] %v8523_v6 }
 0x4fd   : > { %v5920_v31 = vpop.f32.mrf.mxu1 }
 0x4ff   : > { %v5921_v23 = vpop.f32.mrf.mxu1 }
 0x500   : > { %v8525_v1 = vadd.f32 %v5921_v23, %v5920_v31 }
 0x501   : > { %v8527_v37 = vpop.f32.mrf.mxu1 }
 0x502   : > { %10195 = vst [vmem:[#allocation62_spill] sm:$0xff] %v8525_v1  ;;  %10196 = vst [vmem:[#allocation63_spill] sm:$0xff] %v8527_v37 }
 0x503   : > { %v8529_v53 = vpop.f32.mrf.mxu1 }
 0x504   : > { %10197 = vst [vmem:[#allocation65_spill] sm:$0xff] %v8529_v53  ;;  %v10204_v53 = vld [vmem:[#allocation50_spill] sm:$0xff] }
 0x505   : > { %v5926_v12 = vpop.f32.mrf.mxu1 }
 0x507   : > { %v5927_v26 = vpop.f32.mrf.mxu1 }
 0x508   : > { %v8531_v33 = vadd.f32 %v5927_v26, %v5926_v12  ;;  %v10205_v12 = vld [vmem:[#allocation51_spill] sm:$0xff] }
 0x509   : > { %v8533_v24 = vpop.f32.mrf.mxu1 }
 0x50a   : > { %10198 = vst [vmem:[#allocation66_spill] sm:$0xff] %v8531_v33  ;;  %10199 = vst [vmem:[#allocation67_spill] sm:$0xff] %v8533_v24  ;;  %v10206_v33 = vld [vmem:[#allocation52_spill] sm:$0xff] }
 0x50b   : > { %v8535_v47 = vpop.f32.mrf.mxu1 }
 0x50c   : > { %10200 = vst [vmem:[#allocation68_spill] sm:$0xff] %v8535_v47 }
 0x50d   : > { %v5932_v45 = vpop.f32.mrf.mxu1 }
 0x50f   : > { %v5933_v50 = vpop.f32.mrf.mxu1 }
 0x510   : > { %v8537_v9 = vadd.f32 %v5933_v50, %v5932_v45 }
 0x511   : > { %v8539_v6 = vpop.f32.mrf.mxu1 }
 0x512   : > { %10201 = vst [vmem:[#allocation81_spill] sm:$0xff] %v8537_v9  ;;  %10202 = vst [vmem:[#allocation82_spill] sm:$0xff] %v8539_v6  ;;  %v10209_v6 = vld [vmem:[#allocation57_spill] sm:$0xff] }
 0x513   : > { %v8541_v31 = vpop.f32.mrf.mxu1 }
 0x514   : > { %10203 = vst [vmem:[#allocation83_spill] sm:$0xff] %v8541_v31  ;;  %v10208_v31 = vld [vmem:[#allocation27_spill] sm:$0xff] }
 0x535   : > { %v6492_v23 = vpop.f32.mrf.mxu1 }
 0x536   : > { %v2482_v47 = vmul.f32 %v6492_v23, %v10207_v25 }
 0x537   : > { %v2449_v1 = vpop.f32.mrf.mxu1 }
 0x538   : > { %v2480_v26 = vmul.f32 %v10205_v12, %v2449_v1  ;;  %v8552_v1 = vld [vmem:[%s9850_s8 + $0x30] sm:$0xff]  }
 0x539   : > { %v6493_v37 = vpop.f32.mrf.mxu1  ;;  %10210 = vst [vmem:[#allocation84_spill] sm:$0xff] %v8552_v1 }
 0x53a   : > { %v2483_v54 = vmul.f32 %v6493_v37, %v10204_v53 }
 0x53b   : > { %v2452_v59 = vpop.f32.mrf.mxu1 }
 0x53c   : > { %v2481_v24 = vmul.f32 %v10206_v33, %v2452_v59  ;;  %v2489_v50 = vpack.c.bf16 %v2483_v54, %v2482_v47  ;;  %v10211_v59 = vld [vmem:[#allocation56_spill] sm:$0xff]  ;;  %v10212_v54 = vld [vmem:[#allocation59_spill] sm:$0xff] }
 0x53d   : > { %v6496_v49 = vpop.f32.mrf.mxu1 }
 0x53e   : > { %v2488_v30 = vpack.c.bf16 %v2481_v24, %v2480_v26 }
 0x53f   : > { %v2465_v45 = vpop.f32.mrf.mxu1 }
 0x540   : > { %6514 = vmatprep.mubr.bf16.mxu0 %v2488_v30  ;;  %v2484_v37 = vmul.f32 %v10211_v59, %v2465_v45  ;;  %v10213_v30 = vld [vmem:[#allocation55_spill] sm:$0xff]  ;;  %v8581_v45 = vld [vmem:[%s9850_s8 + $0x18] sm:$0xff]  }
 0x541   : > { %v6497_v9 = vpop.f32.mrf.mxu1  ;;  %6515 = vmatmul.mubr.bf16.vlgmr.msra.gmra.mxu0 %v2489_v50  ;;  %v2486_v47 = vmul.f32 %v6496_v49, %v10213_v30  ;;  %v8565_v50 = vld [vmem:[%s9850_s8 + $0x28] sm:$0xff]   ;;  %v10218_v49 = vld [vmem:[#allocation33_spill] sm:$0xff]  ;;  %10219 = vst [vmem:[#allocation87_spill] sm:$0xff] %v8581_v45 }
 0x542   : > { %6523 = vmatpush3.bf16.xpose.msra.mxu0 %v10208_v31  ;;  %v2487_v41 = vmul.f32 %v6497_v9, %v10209_v6  ;;  %v10214_v9 = vld [vmem:[#allocation31_spill] sm:$0xff]  ;;  %10215 = vst [vmem:[#allocation85_spill] sm:$0xff] %v8565_v50 }
 0x543   : > { %v2468_v63 = vpop.f32.mrf.mxu1  ;;  %6819 = vmatprep.subr.msk.bf16.mxu0 %vm1358_vm1, %v8552_v1 }
 0x544   : > { %v2485_v24 = vmul.f32 %v10212_v54, %v2468_v63  ;;  %v2491_v26 = vpack.c.bf16 %v2487_v41, %v2486_v47  ;;  %v10216_v63 = vld [vmem:[#allocation32_spill] sm:$0xff]  ;;  %v8573_v41 = vld [vmem:[%s9850_s8 + $0x20] sm:$0xff]   ;;  %v10222_v47 = vld [vmem:[#allocation35_spill] sm:$0xff] }
 0x545   : > { %10217 = vst [vmem:[#allocation86_spill] sm:$0xff] %v8573_v41 }
 0x546   : > { %v2490_v23 = vpack.c.bf16 %v2485_v24, %v2484_v37  ;;  %v10220_v37 = vld [vmem:[#allocation34_spill] sm:$0xff]  ;;  %v8589_v24 = vld [vmem:[%s9850_s8 + $0x10] sm:$0xff]  }
 0x547   : > { %10221 = vst [vmem:[#allocation88_spill] sm:$0xff] %v8589_v24 }
 0x548   : > { %6518 = vmatprep.mubr.bf16.mxu0 %v2490_v23  ;;  %v8597_v23 = vld [vmem:[%s9850_s8 + $0x8] sm:$0xff]  }
 0x549   : > { %6519 = vmatmul.mubr.bf16.gmra.mxu0 %v2491_v26  ;;  %10223 = vst [vmem:[#allocation89_spill] sm:$0xff] %v8597_v23  ;;  %v10224_v26 = vld [vmem:[#allocation36_spill] sm:$0xff] }
 0x54a   : > { %6525 = vmatpush3.bf16.xpose.msra.mxu0 %v10214_v9  ;;  %6538 = vmatprep.mubr.msk.bf16.mxu0 %vm1358_vm1, %v8448_v0 }
 0x54b   : > { %6820 = vmatprep.subr.msk.bf16.mxu0 %vm1358_vm1, %v8565_v50 }
 0x552   : > { %6527 = vmatpush3.bf16.xpose.msra.mxu0 %v10216_v63 }
 0x553   : > { %6821 = vmatprep.subr.msk.bf16.mxu0 %vm1358_vm1, %v8573_v41 }
 0x55a   : > { %6529 = vmatpush3.bf16.xpose.msra.mxu0 %v10218_v49 }
 0x55b   : > { %6822 = vmatprep.subr.msk.bf16.mxu0 %vm1358_vm1, %v8581_v45  ;;  %v2819_v45 = vpop.permute.xlu0 %2818 }
 0x55c   : > { %v2858_v49 = vsel %vm1358_vm1, %v2819_v45, 0 }
 0x562   : > { %6531 = vmatpush3.bf16.xpose.msra.mxu0 %v10220_v37  ;;  %v8605_v37 = vld [vmem:[%s9850_s8] sm:$0xff]  }
 0x563   : > { %6823 = vmatprep.subr.msk.bf16.mxu0 %vm1358_vm1, %v8589_v24  ;;  %10225 = vst [vmem:[#allocation90_spill] sm:$0xff] %v8605_v37  ;;  %v2835_v24 = vpop.permute.xlu1 %2834 }
 0x56a   : > { %6533 = vmatpush3.bf16.xpose.msra.mxu0 %v10222_v47  ;;  %v10226_v47 = vld [vmem:[#allocation37_spill] sm:$0xff] }
 0x56b   : > { %6824 = vmatprep.subr.msk.bf16.mxu0 %vm1358_vm1, %v8597_v23  ;;  %v2817_v23 = vpop.permute.xlu0 %2816 }
 0x56f   : > { %v2815_v45 = vpop.permute.xlu0 %2814 }
 0x572   : > { %6535 = vmatpush3.bf16.xpose.msra.mxu0 %v10224_v26  ;;  %v2833_v26 = vpop.permute.xlu1 %2832 }
 0x573   : > { %6825 = vmatprep.subr.msk.bf16.mxu0 %vm1358_vm1, %v8605_v37  ;;  %v2855_v37 = vsel %vm1358_vm1, %v2817_v23, 0 }
 0x57a   : > { %6537 = vmatpush3.bf16.xpose.msra.mxu0 %v10226_v47  ;;  %v2852_v47 = vsel %vm1358_vm1, %v2815_v45, 0 }
 0x57b   : > { %6826 = vmatprep.subr.msk.bf16.mxu0 %vm1358_vm1, %v2835_v24  ;;  %v2831_v24 = vpop.permute.xlu1 %2830 }
 0x57f   : > { %v2829_v41 = vpop.permute.xlu1 %2828 }
 0x581   : > { %6539 = vmatmul.mubr.msk.bf16.vlgmr.msra.gmra.mxu0 %vm1358_vm1, %v8485_v20 }
 0x582   : > { %6542 = vmatprep.mubr.msk.bf16.mxu0 %vm1358_vm1, %v8493_v29  ;;  %5987 = vmatpush3.bf16.xpose.msra.mxu0 %v2858_v49  ;;  %v2813_v49 = vpop.permute.xlu0 %2812 }
 0x583   : > { %6827 = vmatprep.subr.msk.bf16.mxu0 %vm1358_vm1, %v2833_v26  ;;  %v2849_v23 = vsel %vm1358_vm1, %v2813_v49, 0  ;;  %v2827_v26 = vpop.permute.xlu1 %2826 }
 0x587   : > { %v2825_v50 = vpop.permute.xlu1 %2824 }
 0x589   : > { %6543 = vmatmul.mubr.msk.bf16.gmra.mxu0 %vm1358_vm1, %v8503_v56 }
 0x58a   : > { %5989 = vmatpush3.bf16.xpose.msra.mxu0 %v2855_v37  ;;  %6002 = vmatprep.mubr.msk.bf16.mxu0 %vm1358_vm1, %v8448_v0  ;;  %v2811_v37 = vpop.permute.xlu0 %2810 }
 0x58b   : > { %6828 = vmatprep.subr.msk.bf16.mxu0 %vm1358_vm1, %v2831_v24  ;;  %v2846_v63 = vsel %vm1358_vm1, %v2811_v37, 0 }
 0x58e   : > { %v2809_v24 = vpop.permute.xlu0 %2808 }
 0x58f   : > { %v2843_v45 = vsel %vm1358_vm1, %v2809_v24, 0 }
 0x592   : > { %5991 = vmatpush3.bf16.xpose.msra.mxu0 %v2852_v47  ;;  %v2823_v47 = vpop.permute.xlu1 %2822 }
 0x593   : > { %6829 = vmatprep.subr.msk.bf16.mxu0 %vm1358_vm1, %v2829_v41  ;;  %v2807_v41 = vpop.permute.xlu0 %2806 }
 0x594   : > { %v2840_v49 = vsel %vm1358_vm1, %v2807_v41, 0 }
 0x59a   : > { %5993 = vmatpush3.bf16.xpose.msra.mxu0 %v2849_v23  ;;  %v2821_v23 = vpop.permute.xlu1 %2820 }
 0x59b   : > { %6830 = vmatprep.subr.msk.bf16.mxu0 %vm1358_vm1, %v2827_v26  ;;  %v2805_v26 = vpop.permute.xlu0 %2804 }
 0x59c   : > { %v2837_v37 = vsel %vm1358_vm1, %v2805_v26, 0 }
 0x5a2   : > { %5995 = vmatpush3.bf16.xpose.msra.mxu0 %v2846_v63  ;;  %v10227_v63 = vld [vmem:[#allocation47_spill] sm:$0xff] }
 0x5a3   : > { %6831 = vmatprep.subr.msk.bf16.mxu0 %vm1358_vm1, %v2825_v50 }
 0x5aa   : > { %5997 = vmatpush3.bf16.xpose.msra.mxu0 %v2843_v45 }
 0x5ab   : > { %6832 = vmatprep.subr.msk.bf16.mxu0 %vm1358_vm1, %v2823_v47 }
 0x5b2   : > { %5999 = vmatpush3.bf16.xpose.msra.mxu0 %v2840_v49 }
 0x5b3   : > { %6833 = vmatprep.subr.msk.bf16.mxu0 %vm1358_vm1, %v2821_v23 }
 0x5ba   : > { %6001 = vmatpush3.bf16.xpose.msra.mxu0 %v2837_v37 }
 0x5bb   : > { %6834 = vmatprep.subr.msk.bf16.mxu0 %vm1358_vm1, %v10227_v63 }
 0x5c1   : > { %6003 = vmatmul.mubr.msk.bf16.vlgmr.msra.gmra.mxu0 %vm1358_vm1, %v8448_v0  ;;  %v8689_v0 = vld [vmem:[%s9854_s12 + $0x30] sm:$0xff]  }
 0x5c2   : > { %6004 = vmatprep.mubr.msk.bf16.mxu0 %vm1358_vm1, %v8485_v20  ;;  %6571 = vmatpush3.bf16.xpose.msra.mxu0 %v10170_v57  ;;  %10231 = vst [vmem:[#allocation93_spill] sm:$0xff] %v8689_v0  ;;  %v8752_v57 = vld [vmem:[%s9855_s13] ss:$8 sps:$4 sm:$0xff]  }
 0x5c3   : > { %6835 = vmatprep.subr.msk.bf16.mxu0 %vm1358_vm1, %v8418_v40  ;;  %v8657_v40 = vpop.permute.xlu0 %3392  ;;  %10244 = vst [vmem:[#allocation102_spill] sm:$0xff] %v8752_v57 }
 0x5c4   : > { %10228 = vst [vmem:[#allocation47_spill] sm:$0xff] %v8657_v40 }
 0x5c9   : > { %6005 = vmatmul.mubr.msk.bf16.gmra.mxu0 %vm1358_vm1, %v8485_v20  ;;  %v8721_v20 = vld [vmem:[%s9854_s12 + $0x10] sm:$0xff]  }
 0x5ca   : > { %6006 = vmatprep.mubr.msk.bf16.mxu0 %vm1358_vm1, %v8493_v29  ;;  %6573 = vmatpush3.bf16.xpose.msra.mxu0 %v10173_v19  ;;  %10236 = vst [vmem:[#allocation98_spill] sm:$0xff] %v8721_v20 }
 0x5cb   : > { %6836 = vmatprep.subr.msk.bf16.mxu0 %vm1358_vm1, %v8430_v52  ;;  %v8677_v52 = vpop.permute.xlu1 %3394 }
 0x5cc   : > { %10229 = vst [vmem:[#allocation91_spill] sm:$0xff] %v8677_v52 }
 0x5d1   : > { %6007 = vmatmul.mubr.msk.bf16.gmra.mxu0 %vm1358_vm1, %v8493_v29  ;;  %v8735_v29 = vld [vmem:[%s9854_s12] sm:$0xff]  }
 0x5d2   : > { %6008 = vmatprep.mubr.msk.bf16.mxu0 %vm1358_vm1, %v8503_v56  ;;  %6575 = vmatpush3.bf16.xpose.msra.mxu0 %v10176_v7  ;;  %10238 = vst [vmem:[#allocation100_spill] sm:$0xff] %v8735_v29 }
 0x5d3   : > { %6837 = vmatprep.subr.msk.bf16.mxu0 %vm1358_vm1, %v8442_v15  ;;  %v8679_v15 = vpop.permute.xlu0 %3396 }
 0x5d4   : > { %10230 = vst [vmem:[#allocation92_spill] sm:$0xff] %v8679_v15 }
 0x5d9   : > { %6009 = vmatmul.mubr.msk.bf16.gmra.mxu0 %vm1358_vm1, %v8503_v56  ;;  %v8742_v56 = vld [vmem:[%s9855_s13 + $0x4] ss:$8 sps:$4 sm:$0xff]  }
 0x5da   : > { %6577 = vmatpush3.bf16.xpose.msra.mxu0 %v10179_v36  ;;  %6586 = vmatprep.mubr.msk.bf16.mxu0 %vm1358_vm1, %v8657_v40  ;;  %10239 = vst [vmem:[#allocation101_spill] sm:$0xff] %v8742_v56 }
 0x5db   : > { %6838 = vmatprep.subr.msk.bf16.mxu0 %vm1358_vm1, %v8456_v18  ;;  %v8696_v18 = vld [vmem:[%s9854_s12 + $0x28] sm:$0xff]  }
 0x5dc   : > { %10232 = vst [vmem:[#allocation94_spill] sm:$0xff] %v8696_v18 }
 0x5e2   : > { %6579 = vmatpush3.bf16.xpose.msra.mxu0 %v10180_v42 }
 0x5e3   : > { %6839 = vmatprep.subr.msk.bf16.mxu0 %vm1358_vm1, %v8464_v51  ;;  %v8699_v51 = vpop.permute.xlu1 %3398 }
 0x5e4   : > { %10233 = vst [vmem:[#allocation95_spill] sm:$0xff] %v8699_v51 }
 0x5ea   : > { %6581 = vmatpush3.bf16.xpose.msra.mxu0 %v10181_v10 }
 0x5eb   : > { %6840 = vmatprep.subr.msk.bf16.mxu0 %vm1358_vm1, %v8472_v22  ;;  %v8707_v22 = vld [vmem:[%s9854_s12 + $0x20] sm:$0xff]  }
 0x5ec   : > { %10234 = vst [vmem:[#allocation96_spill] sm:$0xff] %v8707_v22 }
 0x5f2   : > { %6583 = vmatpush3.bf16.xpose.msra.mxu0 %v10182_v48  ;;  %v10243_v48 = vld [vmem:[#allocation72_spill] sm:$0xff] }
 0x5f3   : > { %6841 = vmatprep.subr.msk.bf16.mxu0 %vm1358_vm1, %v8480_v58  ;;  %v8714_v58 = vld [vmem:[%s9854_s12 + $0x18] sm:$0xff]  }
 0x5f4   : > { %10235 = vst [vmem:[#allocation97_spill] sm:$0xff] %v8714_v58 }
 0x5fa   : > { %6585 = vmatpush3.bf16.xpose.msra.mxu0 %v10183_v55 }
 0x5fb   : > { %6642 = vmatprep.subr.bf16.mxu0 %v8490_v60 }
 0x601   : > { %6587 = vmatmul.mubr.msk.bf16.vlgmr.msra.gmra.mxu0 %vm1358_vm1, %v8677_v52  ;;  %v6516_v50 = vpop.f32.mrf.mxu0 }
 0x602   : > { %6590 = vmatprep.mubr.msk.bf16.mxu0 %vm1358_vm1, %v8679_v15  ;;  %6643 = vmatpush3.bf16.msra.mxu0 %v8490_v60  ;;  %v8728_v60 = vld [vmem:[%s9854_s12 + $0x8] sm:$0xff]  }
 0x603   : > { %6644 = vmatprep.subr.bf16.mxu0 %v8689_v0  ;;  %10237 = vst [vmem:[#allocation99_spill] sm:$0xff] %v8728_v60  ;;  %v2526_v24 = vpop.f32.mrf.mxu0 }
 0x605   : > { %v6517_v45 = vpop.f32.mrf.mxu0 }
 0x606   : > { %6645 = vmatpush3.bf16.msra.mxu0 %v8689_v0  ;;  %v10242_v0 = vld [vmem:[#allocation71_spill] sm:$0xff] }
 0x607   : > { %6646 = vmatprep.subr.bf16.mxu0 %v8696_v18  ;;  %v2529_v47 = vpop.f32.mrf.mxu0 }
 0x609   : > { %6591 = vmatmul.mubr.msk.bf16.gmra.mxu0 %vm1358_vm1, %v8699_v51  ;;  %v6520_v41 = vpop.f32.mrf.mxu0 }
 0x60a   : > { %6647 = vmatpush3.bf16.msra.mxu0 %v8696_v18 }
 0x60b   : > { %6648 = vmatprep.subr.bf16.mxu0 %v8707_v22  ;;  %v2542_v49 = vpop.f32.mrf.mxu0 }
 0x60d   : > { %v6521_v23 = vpop.f32.mrf.mxu0 }
 0x60e   : > { %6649 = vmatpush3.bf16.msra.mxu0 %v8707_v22  ;;  %v10241_v22 = vld [vmem:[#allocation70_spill] sm:$0xff] }
 0x60f   : > { %6650 = vmatprep.subr.bf16.mxu0 %v8714_v58  ;;  %v2545_v26 = vpop.f32.mrf.mxu0 }
 0x612   : > { %6651 = vmatpush3.bf16.msra.mxu0 %v8714_v58 }
 0x613   : > { %6652 = vmatprep.subr.bf16.mxu0 %v8721_v20 }
 0x616   : > { %6653 = vmatpush3.bf16.msra.mxu0 %v8721_v20  ;;  %v10240_v20 = vld [vmem:[#allocation69_spill] sm:$0xff] }
 0x617   : > { %6654 = vmatprep.subr.bf16.mxu0 %v8728_v60 }
 0x61a   : > { %6655 = vmatpush3.bf16.msra.mxu0 %v8728_v60 }
 0x61b   : > { %6656 = vmatprep.subr.bf16.mxu0 %v8735_v29 }
 0x61e   : > { %6657 = vmatpush3.bf16.msra.mxu0 %v8735_v29 }
 0x61f   : > { %3726 = vmatprep.subr.bf16.mxu0 %v8742_v56 }
 0x641   : > { %v6540_v37 = vpop.f32.mrf.mxu0 }
 0x642   : > { %v2624_v56 = vmul.f32 %v6540_v37, %v10243_v48 }
 0x643   : > { %v2591_v63 = vpop.f32.mrf.mxu0 }
 0x644   : > { %v2622_v18 = vmul.f32 %v10241_v22, %v2591_v63 }
 0x645   : > { %v6541_v60 = vpop.f32.mrf.mxu0 }
 0x646   : > { %v2625_v29 = vmul.f32 %v6541_v60, %v10240_v20  ;;  %v10245_v60 = vld [vmem:[#allocation73_spill] sm:$0xff] }
 0x647   : > { %v2594_v58 = vpop.f32.mrf.mxu0 }
 0x648   : > { %v2623_v55 = vmul.f32 %v10242_v0, %v2594_v58  ;;  %v2631_v36 = vpack.c.bf16 %v2625_v29, %v2624_v56  ;;  %v8759_v58 = vld [vmem:[%s9856_s14 + $0x4] ss:$8 sps:$4 sm:$0xff]   ;;  %v10249_v29 = vld [vmem:[#allocation76_spill] sm:$0xff] }
 0x649   : > { %v6544_v10 = vpop.f32.mrf.mxu0  ;;  %10246 = vst [vmem:[#allocation103_spill] sm:$0xff] %v8759_v58 }
 0x64a   : > { %v2630_v42 = vpack.c.bf16 %v2623_v55, %v2622_v18  ;;  %v2628_v56 = vmul.f32 %v6544_v10, %v10249_v29  ;;  %v2701_v10 = vpack.c.bf16 %v2545_v26, %v2542_v49 }
 0x64b   : > { %v2607_v7 = vpop.f32.mrf.mxu0 }
 0x64c   : > { %6562 = vmatprep.mubr.bf16.mxu1 %v2630_v42  ;;  %v10247_v42 = vld [vmem:[#allocation74_spill] sm:$0xff] }
 0x64d   : > { %v6545_v19 = vpop.f32.mrf.mxu0  ;;  %6563 = vmatmul.mubr.bf16.vlgmr.msra.gmra.mxu1 %v2631_v36  ;;  %v2626_v55 = vmul.f32 %v10247_v42, %v2607_v7  ;;  %v10248_v36 = vld [vmem:[#allocation75_spill] sm:$0xff]  ;;  %v2700_v7 = vpack.c.bf16 %v6517_v45, %v6516_v50 }
 0x64e   : > { %2730 = vmatpush1.bf16.msra.mxu1 %v8752_v57  ;;  %v2629_v63 = vmul.f32 %v6545_v19, %v10245_v60  ;;  %v10250_v57 = vmov 0   ;;  %v2699_v19 = vpack.c.bf16 %v2529_v47, %v2526_v24  ;;  %v3213_v60 = vpop.permute.xlu0 %3212 }
 0x64f   : > { %v2610_v22 = vpop.f32.mrf.mxu0  ;;  %2987 = vmatprep.subr.bf16.mxu1 %v8759_v58  ;;  %v8770_v58 = vld [vmem:[%s9856_s14] ss:$8 sps:$4 sm:$0xff]  }
 0x650   : > { %v2627_v18 = vmul.f32 %v10248_v36, %v2610_v22  ;;  %v2633_v48 = vpack.c.bf16 %v2629_v63, %v2628_v56  ;;  %10251 = vst [vmem:[#allocation104_spill] sm:$0xff] %v8770_v58  ;;  %v3197_v22 = vpop.permute.xlu1 %3196 }
 0x652   : > { %v2632_v37 = vpack.c.bf16 %v2627_v18, %v2626_v55  ;;  %v3211_v24 = vpop.permute.xlu0 %3210 }
 0x654   : > { %6566 = vmatprep.mubr.bf16.mxu1 %v2632_v37 }
 0x655   : > { %6567 = vmatmul.mubr.bf16.gmra.mxu1 %v2633_v48  ;;  %v2702_v48 = vpack.c.bf16 %v6521_v23, %v6520_v41 }
 0x656   : > { %2747 = vmatprep.mubr.bf16.mxu1 %v10250_v57  ;;  %v3209_v45 = vpop.permute.xlu0 %3208 }
 0x65a   : > { %v3207_v41 = vpop.permute.xlu0 %3206 }
 0x65d   : > { %5671 = vmatmul.mubr.msk.bf16.vlgmr.msra.gmra.mxu1 %vm1358_vm1, %v2699_v19 }
 0x65e   : > { %2988 = vmatpush1.bf16.msra.mxu1 %v8770_v58  ;;  %2757 = vmatprep.mubr.bf16.mxu1 %v10250_v57 }
 0x65f   : > { %6010 = vmatprep.subr.bf16.mxu1 %v3213_v60  ;;  %v3195_v60 = vpop.permute.xlu1 %3194 }
 0x663   : > { %v3193_v49 = vpop.permute.xlu1 %3192 }
 0x665   : > { %5672 = vmatmul.mubr.msk.bf16.gmra.mxu1 %vm1358_vm1, %v2700_v7  ;;  %v3205_v7 = vpop.permute.xlu0 %3204 }
 0x666   : > { %2767 = vmatprep.mubr.bf16.mxu1 %v10250_v57 }
 0x667   : > { %v3191_v26 = vpop.permute.xlu1 %3190 }
 0x66d   : > { %5673 = vmatmul.mubr.msk.bf16.gmra.mxu1 %vm1358_vm1, %v2701_v10 }
 0x66e   : > { %2777 = vmatprep.mubr.bf16.mxu1 %v10250_v57 }
 0x675   : > { %5674 = vmatmul.mubr.msk.bf16.gmra.mxu1 %vm1358_vm1, %v2702_v48  ;;  %v3189_v48 = vpop.permute.xlu1 %3188 }
 0x676   : > { %3005 = vmatprep.mubr.bf16.mxu1 %v10250_v57 }
 0x70d   : > { %v6564_v47 = vpop.f32.mrf.mxu1 }
 0x70f   : > { %v2668_v63 = vpop.f32.mrf.mxu1 }
 0x711   : > { %v6565_v50 = vpop.f32.mrf.mxu1 }
 0x712   : > { %v2958_v37 = vpack.c.bf16 %v6565_v50, %v6564_v47  ;;  %v3187_v47 = vpop.permute.xlu1 %3186 }
 0x713   : > { %v2671_v55 = vpop.f32.mrf.mxu1 }
 0x714   : > { %v2957_v18 = vpack.c.bf16 %v2671_v55, %v2668_v63 }
 0x715   : > { %v6568_v56 = vpop.f32.mrf.mxu1 }
 0x716   : > { %5679 = vmatmul.mubr.msk.bf16.vlgmr.msra.gmra.mxu1 %vm1358_vm1, %v2957_v18  ;;  %v3185_v50 = vpop.permute.xlu1 %3184 }
 0x717   : > { %6011 = vmatpush3.bf16.msra.mxu1 %v3197_v22  ;;  %3015 = vmatprep.mubr.bf16.mxu1 %v10250_v57  ;;  %v2684_v23 = vpop.f32.mrf.mxu1 }
 0x718   : > { %6012 = vmatprep.subr.bf16.mxu1 %v3211_v24  ;;  %v3203_v24 = vpop.permute.xlu0 %3202 }
 0x719   : > { %v6569_v19 = vpop.f32.mrf.mxu1 }
 0x71b   : > { %6013 = vmatpush3.bf16.msra.mxu1 %v3195_v60  ;;  %v2687_v10 = vpop.f32.mrf.mxu1  ;;  %v2960_v60 = vpack.c.bf16 %v6569_v19, %v6568_v56 }
 0x71c   : > { %6014 = vmatprep.subr.bf16.mxu1 %v3209_v45  ;;  %v2959_v22 = vpack.c.bf16 %v2687_v10, %v2684_v23  ;;  %v3201_v63 = vpop.permute.xlu0 %3200 }
 0x71d   : > { %v2749_v45 = vpop.f32.mrf.mxu1 }
 0x71e   : > { %5680 = vmatmul.mubr.msk.bf16.gmra.mxu1 %vm1358_vm1, %v2958_v37 }
 0x71f   : > { %6015 = vmatpush3.bf16.msra.mxu1 %v3193_v49  ;;  %3025 = vmatprep.mubr.bf16.mxu1 %v10250_v57  ;;  %v2751_v55 = vpop.f32.mrf.mxu1 }
 0x720   : > { %6016 = vmatprep.subr.bf16.mxu1 %v3207_v41 }
 0x721   : > { %v2753_v18 = vpop.f32.mrf.mxu1 }
 0x723   : > { %6017 = vmatpush3.bf16.msra.mxu1 %v3191_v26  ;;  %v2755_v49 = vpop.f32.mrf.mxu1 }
 0x724   : > { %6018 = vmatprep.subr.bf16.mxu1 %v3205_v7  ;;  %v2918_v7 = vpop.f32.mrf.mxu0 }
 0x725   : > { %v2759_v41 = vpop.f32.mrf.mxu1  ;;  %v2919_v51 = vadd.f32 %v2918_v7, %v2749_v45 }
 0x726   : > { %5681 = vmatmul.mubr.msk.bf16.gmra.mxu1 %vm1358_vm1, %v2959_v22 }
 0x727   : > { %6019 = vmatpush3.bf16.msra.mxu1 %v3189_v48  ;;  %3035 = vmatprep.mubr.bf16.mxu1 %v10250_v57  ;;  %v2761_v23 = vpop.f32.mrf.mxu1  ;;  %v2920_v48 = vpop.f32.mrf.mxu0 }
 0x728   : > { %6020 = vmatprep.subr.bf16.mxu1 %v3203_v24  ;;  %v2921_v15 = vadd.f32 %v2920_v48, %v2751_v55 }
 0x729   : > { %v2763_v26 = vpop.f32.mrf.mxu1  ;;  %v2922_v24 = vpop.f32.mrf.mxu0 }
 0x72a   : > { %v2923_v6 = vadd.f32 %v2922_v24, %v2753_v18 }
 0x72b   : > { %6021 = vmatpush3.bf16.msra.mxu1 %v3187_v47  ;;  %v2765_v37 = vpop.f32.mrf.mxu1  ;;  %v2924_v56 = vpop.f32.mrf.mxu0 }
 0x72c   : > { %6022 = vmatprep.subr.bf16.mxu1 %v3201_v63  ;;  %v2925_v31 = vadd.f32 %v2924_v56, %v2755_v49 }
 0x72d   : > { %v2769_v10 = vpop.f32.mrf.mxu1  ;;  %v2928_v63 = vpop.f32.mrf.mxu0 }
 0x72e   : > { %5682 = vmatmul.mubr.msk.bf16.gmra.mxu1 %vm1358_vm1, %v2960_v60  ;;  %v2929_v7 = vadd.f32 %v2928_v63, %v2759_v41 }
 0x72f   : > { %6023 = vmatpush3.bf16.msra.mxu1 %v3185_v50  ;;  %v2771_v22 = vpop.f32.mrf.mxu1  ;;  %v2930_v60 = vpop.f32.mrf.mxu0 }
 0x731   : > { %v2773_v47 = vpop.f32.mrf.mxu1  ;;  %v2932_v57 = vpop.f32.mrf.mxu0 }
 0x733   : > { %v2775_v19 = vpop.f32.mrf.mxu1  ;;  %v2934_v36 = vpop.f32.mrf.mxu0 }
 0x735   : > { %v2779_v58 = vpop.f32.mrf.mxu1  ;;  %v2938_v0 = vpop.f32.mrf.mxu0 }
 0x736   : > { %v2939_v56 = vadd.f32 %v2938_v0, %v2769_v10 }
 0x737   : > { %v2781_v50 = vpop.f32.mrf.mxu1  ;;  %v2940_v30 = vpop.f32.mrf.mxu0 }
 0x738   : > { %v2941_v63 = vadd.f32 %v2940_v30, %v2771_v22 }
 0x739   : > { %v8787_v29 = vpop.f32.mrf.mxu1  ;;  %v2942_v45 = vpop.f32.mrf.mxu0 }
 0x73b   : > { %v8789_v42 = vpop.f32.mrf.mxu1  ;;  %v2944_v49 = vpop.f32.mrf.mxu0 }
 0x7d6   : > { %v3007_v20 = vpop.f32.mrf.mxu1 }
 0x7d7   : > { %v8791_v40 = vadd.f32 %v3007_v20, %v2919_v51  ;;  %v2931_v51 = vadd.f32 %v2930_v60, %v2761_v23  ;;  %v2948_v23 = vpop.f32.mrf.mxu0 }
 0x7d8   : > { %v3009_v52 = vpop.f32.mrf.mxu1  ;;  %v2949_v22 = vadd.f32 %v2948_v23, %v2779_v58 }
 0x7d9   : > { %v8793_v9 = vadd.f32 %v3009_v52, %v2921_v15 }
 0x7da   : > { %v3011_v1 = vpop.f32.mrf.mxu1 }
 0x7db   : > { %v3062_v59 = vmax.f32 %v8791_v40, %v8793_v9  ;;  %v8797_v54 = vadd.f32 %v3011_v1, %v2923_v6  ;;  %v2933_v6 = vadd.f32 %v2932_v57, %v2763_v26  ;;  %v2935_v1 = vadd.f32 %v2934_v36, %v2765_v37  ;;  %v2950_v36 = vpop.f32.mrf.mxu0 }
 0x7dc   : > { %v3013_v25 = vpop.f32.mrf.mxu1  ;;  %v2943_v37 = vadd.f32 %v2942_v45, %v2773_v47 }
 0x7dd   : > { %v8799_v53 = vadd.f32 %v3013_v25, %v2925_v31  ;;  %3063 = vmax.xlane.f32.xlu0 %v3062_v59  ;;  %v2952_v0 = vpop.f32.mrf.mxu0 }
 0x7de   : > { %v3017_v55 = vpop.f32.mrf.mxu1 }
 0x7df   : > { %v3065_v52 = vmax.f32 %v8797_v54, %v8799_v53  ;;  %v8803_v20 = vadd.f32 %v3017_v55, %v2929_v7 }
 0x7e0   : > { %v3019_v15 = vpop.f32.mrf.mxu1 }
 0x7e1   : > { %v8805_v18 = vadd.f32 %v3019_v15, %v2931_v51  ;;  %3066 = vmax.xlane.f32.xlu1 %v3065_v52  ;;  %v2945_v51 = vadd.f32 %v2944_v49, %v2775_v19  ;;  %v2954_v19 = vpop.f32.mrf.mxu0  ;;  %v2953_v49 = vadd.f32 %v2952_v0, %v8787_v29  ;;  %v10253_v29 = vld [vmem:[#allocation45_spill] sm:$0xff] }
 0x7e2   : > { %v3021_v48 = vpop.f32.mrf.mxu1 }
 0x7e3   : > { %v3068_v25 = vmax.f32 %v8803_v20, %v8805_v18  ;;  %v8809_v59 = vadd.f32 %v3021_v48, %v2933_v6  ;;  %v2951_v6 = vadd.f32 %v2950_v36, %v2781_v50  ;;  %v10260_v36 = vld [vmem:[#allocation54_spill] sm:$0xff] }
 0x7e4   : > { %v3023_v31 = vpop.f32.mrf.mxu1 }
 0x7e5   : > { %v8811_v41 = vadd.f32 %v3023_v31, %v2935_v1  ;;  %3069 = vmax.xlane.f32.xlu0 %v3068_v25 }
 0x7e6   : > { %v3027_v24 = vpop.f32.mrf.mxu1 }
 0x7e7   : > { %v3071_v60 = vmax.f32 %v8809_v59, %v8811_v41  ;;  %v8815_v7 = vadd.f32 %v3027_v24, %v2939_v56  ;;  %v2955_v24 = vadd.f32 %v2954_v19, %v8789_v42  ;;  %v10258_v42 = vld [vmem:[#allocation78_spill] sm:$0xff] }
 0x7e8   : > { %v3029_v55 = vpop.f32.mrf.mxu1 }
 0x7e9   : > { %v8817_v57 = vadd.f32 %v3029_v55, %v2941_v63  ;;  %3072 = vmax.xlane.f32.xlu1 %v3071_v60  ;;  %v10252_v60 = vld [vmem:[#allocation19_spill] sm:$0xff]  ;;  %v10259_v55 = vld [vmem:[#allocation44_spill] sm:$0xff] }
 0x7ea   : > { %v3031_v26 = vpop.f32.mrf.mxu1 }
 0x7eb   : > { %v3074_v52 = vmax.f32 %v8815_v7, %v8817_v57  ;;  %v8821_v48 = vadd.f32 %v3031_v26, %v2943_v37  ;;  %v10261_v26 = vld [vmem:[#allocation43_spill] sm:$0xff]  ;;  %v10262_v37 = vld [vmem:[#allocation80_spill] sm:$0xff] }
 0x7ec   : > { %v3033_v15 = vpop.f32.mrf.mxu1 }
 0x7ed   : > { %v8823_v30 = vadd.f32 %v3033_v15, %v2945_v51  ;;  %3075 = vmax.xlane.f32.xlu0 %v3074_v52  ;;  %v10263_v51 = vld [vmem:[#allocation41_spill] sm:$0xff]  ;;  %v10264_v52 = vld [vmem:[#allocation48_spill] sm:$0xff] }
 0x7ee   : > { %v3037_v10 = vpop.f32.mrf.mxu1 }
 0x7ef   : > { %v3077_v1 = vmax.f32 %v8821_v48, %v8823_v30  ;;  %v8827_v31 = vadd.f32 %v3037_v10, %v2949_v22 }
 0x7f0   : > { %v3039_v25 = vpop.f32.mrf.mxu1 }
 0x7f1   : > { %v8829_v47 = vadd.f32 %v3039_v25, %v2951_v6  ;;  %3078 = vmax.xlane.f32.xlu1 %v3077_v1 }
 0x7f2   : > { %v3041_v45 = vpop.f32.mrf.mxu1 }
 0x7f3   : > { %v3080_v56 = vmax.f32 %v8827_v31, %v8829_v47  ;;  %v8835_v50 = vadd.f32 %v3041_v45, %v2953_v49 }
 0x7f4   : > { %v3043_v58 = vpop.f32.mrf.mxu1 }
 0x7f5   : > { %v8837_v23 = vadd.f32 %v3043_v58, %v2955_v24  ;;  %3081 = vmax.xlane.f32.xlu0 %v3080_v56 }
 0x7f7   : > { %v3083_v63 = vmax.f32 %v8835_v50, %v8837_v23 }
 0x7f9   : > { %3084 = vmax.xlane.f32.xlu1 %v3083_v63 }
 0x80a   : > { %3182 = vrot.lane.b32.xlu1 %v10252_v60, %s7314_s0 }
 0x80b   : > { %3198 = vrot.lane.b32.xlu0 %v10253_v29, %s7314_s0 }
 0x80e   : > { %3815 = vrot.lane.b32.xlu1 %v10164_v39, %s7315_s26 }
 0x80f   : > { %3799 = vrot.lane.b32.xlu0 %v7829_v35, %s7315_s26 }
 0x812   : > { %3813 = vrot.lane.b32.xlu1 %v8095_v43, %s7315_s26 }
 0x813   : > { %3797 = vrot.lane.b32.xlu0 %v8105_v44, %s7315_s26 }
 0x816   : > { %3811 = vrot.lane.b32.xlu1 %v7871_v34, %s7315_s26 }
 0x817   : > { %3795 = vrot.lane.b32.xlu0 %v7813_v27, %s7315_s26 }
 0x81a   : > { %3809 = vrot.lane.b32.xlu1 %v8115_v3, %s7315_s26 }
 0x81b   : > { %3793 = vrot.lane.b32.xlu0 %v8125_v32, %s7315_s26 }
 0x81e   : > { %3807 = vrot.lane.b32.xlu1 %v7857_v13, %s7315_s26 }
 0x81f   : > { %3791 = vrot.lane.b32.xlu0 %v7795_v17, %s7315_s26 }
 0x822   : > { %3805 = vrot.lane.b32.xlu1 %v8136_v38, %s7315_s26 }
 0x823   : > { %3789 = vrot.lane.b32.xlu0 %v8144_v28, %s7315_s26 }
 0x826   : > { %3803 = vrot.lane.b32.xlu1 %v7843_v46, %s7315_s26 }
 0x827   : > { %3787 = vrot.lane.b32.xlu0 %v7759_v5, %s7315_s26 }
 0x82a   : > { %3801 = vrot.lane.b32.xlu1 %v8152_v4, %s7315_s26 }
 0x82b   : > { %3785 = vrot.lane.b32.xlu0 %v8160_v14, %s7315_s26 }
 0x82e   : > { %4351 = vrot.lane.b32.xlu1 %v7739_v62, %s7316_s23  ;;  %v10254_v62 = vld [vmem:[#allocation77_spill] sm:$0xff] }
 0x82f   : > { %4349 = vrot.lane.b32.xlu0 %v7735_v61, %s7316_s23  ;;  %v10255_v61 = vld [vmem:[#allocation46_spill] sm:$0xff] }
 0x832   : > { %4355 = vrot.lane.b32.xlu1 %v7772_v8, %s7316_s23  ;;  %v10256_v8 = vld [vmem:[#allocation61_spill] sm:$0xff] }
 0x833   : > { %4353 = vrot.lane.b32.xlu0 %v7778_v11, %s7316_s23  ;;  %v10257_v11 = vld [vmem:[#allocation79_spill] sm:$0xff] }
 0x836   : > { %4161 = vrot.lane.b32.xlu1 %v7929_v21, %s7315_s26 }
 0x837   : > { %4177 = vrot.lane.b32.xlu0 %v10165_v16, %s7315_s26 }
 0x83a   : > { %4159 = vrot.lane.b32.xlu1 %v8178_v2, %s7315_s26 }
 0x83b   : > { %4175 = vrot.lane.b32.xlu0 %v10254_v62, %s7315_s26 }
 0x83e   : > { %4157 = vrot.lane.b32.xlu1 %v10255_v61, %s7315_s26 }
 0x83f   : > { %4173 = vrot.lane.b32.xlu0 %v10256_v8, %s7315_s26 }
 0x842   : > { %4155 = vrot.lane.b32.xlu1 %v10257_v11, %s7315_s26 }
 0x843   : > { %4171 = vrot.lane.b32.xlu0 %v10258_v42, %s7315_s26 }
 0x846   : > { %4153 = vrot.lane.b32.xlu1 %v10259_v55, %s7315_s26 }
 0x847   : > { %4169 = vrot.lane.b32.xlu0 %v10260_v36, %s7315_s26 }
 0x84a   : > { %4151 = vrot.lane.b32.xlu1 %v10261_v26, %s7315_s26 }
 0x84b   : > { %4167 = vrot.lane.b32.xlu0 %v10262_v37, %s7315_s26 }
 0x84e   : > { %4149 = vrot.lane.b32.xlu1 %v10263_v51, %s7315_s26 }
 0x84f   : > { %4165 = vrot.lane.b32.xlu0 %v10264_v52, %s7315_s26 }
 0x866   : > { %v3064_v15 = vpop.xlane.xlu0 %3063 }
 0x867   : > { %v3086_v0 = vsub.f32 %v8791_v40, %v3064_v15  ;;  %v3087_v10 = vsub.f32 %v8793_v9, %v3064_v15 }
 0x869   : > { %v3102_v22 = vmul.f32 1.442695, %v3086_v0  ;;  %v3104_v6 = vmul.f32 1.442695, %v3087_v10 }
 0x86a   : > { %v3067_v1 = vpop.xlane.xlu1 %3066 }
 0x86b   : > { %7036 = vpow2.f32 %v3102_v22  ;;  %v3088_v25 = vsub.f32 %v8797_v54, %v3067_v1  ;;  %v3089_v19 = vsub.f32 %v8799_v53, %v3067_v1 }
 0x86c   : > { %7038 = vpow2.f32 %v3104_v6 }
 0x86d   : > { %v3106_v45 = vmul.f32 1.442695, %v3088_v25  ;;  %v3108_v49 = vmul.f32 1.442695, %v3089_v19 }
 0x86e   : > { %v3070_v24 = vpop.xlane.xlu0 %3069 }
 0x86f   : > { %7040 = vpow2.f32 %v3106_v45  ;;  %v3090_v56 = vsub.f32 %v8803_v20, %v3070_v24  ;;  %v3091_v58 = vsub.f32 %v8805_v18, %v3070_v24 }
 0x870   : > { %7042 = vpow2.f32 %v3108_v49 }
 0x871   : > { %v3110_v40 = vmul.f32 1.442695, %v3090_v56  ;;  %v3112_v9 = vmul.f32 1.442695, %v3091_v58 }
 0x872   : > { %v3073_v63 = vpop.xlane.xlu1 %3072 }
 0x873   : > { %7044 = vpow2.f32 %v3110_v40  ;;  %v3092_v15 = vsub.f32 %v8809_v59, %v3073_v63  ;;  %v3093_v54 = vsub.f32 %v8811_v41, %v3073_v63 }
 0x874   : > { %7046 = vpow2.f32 %v3112_v9 }
 0x875   : > { %v3114_v53 = vmul.f32 1.442695, %v3092_v15  ;;  %v3116_v0 = vmul.f32 1.442695, %v3093_v54 }
 0x876   : > { %v3076_v10 = vpop.xlane.xlu0 %3075 }
 0x877   : > { %7048 = vpow2.f32 %v3114_v53  ;;  %v3094_v22 = vsub.f32 %v8815_v7, %v3076_v10  ;;  %v3095_v20 = vsub.f32 %v8817_v57, %v3076_v10 }
 0x878   : > { %v7037_v6 = vpop.eup %7036  ;;  %7050 = vpow2.f32 %v3116_v0 }
 0x879   : > { %v7039_v18 = vpop.eup %7038  ;;  %v3118_v1 = vmul.f32 1.442695, %v3094_v22  ;;  %v3120_v25 = vmul.f32 1.442695, %v3095_v20 }
 0x87a   : > { %v3079_v19 = vpop.xlane.xlu1 %3078  ;;  %v8923_v45 = vadd.f32 %v7039_v18, %v7037_v6 }
 0x87b   : > { %7052 = vpow2.f32 %v3118_v1  ;;  %v3096_v59 = vsub.f32 %v8821_v48, %v3079_v19  ;;  %v3097_v41 = vsub.f32 %v8823_v30, %v3079_v19 }
 0x87c   : > { %10265 = vst [vmem:[#allocation19_spill] sm:$0xff] %v8923_v45  ;;  %v7041_v49 = vpop.eup %7040  ;;  %7054 = vpow2.f32 %v3120_v25  ;;  %v8935_v25 = vpop.f32.mrf.mxu0 }
 0x87d   : > { %v7043_v24 = vpop.eup %7042  ;;  %v3122_v56 = vmul.f32 1.442695, %v3096_v59  ;;  %v3124_v7 = vmul.f32 1.442695, %v3097_v41 }
 0x87e   : > { %v3082_v58 = vpop.xlane.xlu0 %3081  ;;  %v3159_v57 = vpack.c.bf16 %v7043_v24, %v7039_v18  ;;  %v8927_v40 = vadd.f32 %v7043_v24, %v7041_v49  ;;  %v3158_v24 = vpack.c.bf16 %v7041_v49, %v7037_v6  ;;  %v8951_v6 = vld [vmem:[%s9853_s11 + $0x30] sm:$0xff]  }
 0x87f   : > { %7056 = vpow2.f32 %v3122_v56  ;;  %v3098_v9 = vsub.f32 %v8827_v31, %v3082_v58  ;;  %v3099_v63 = vsub.f32 %v8829_v47, %v3082_v58  ;;  %10271 = vst [vmem:[#allocation105_spill] sm:$0xff] %v8951_v6 }
 0x880   : > { %10266 = vst [vmem:[#allocation45_spill] sm:$0xff] %v8927_v40  ;;  %v7045_v15 = vpop.eup %7044  ;;  %7058 = vpow2.f32 %v3124_v7  ;;  %3262 = vmatprep.mubr.bf16.mxu1 %v3159_v57  ;;  %v3446_v7 = vpop.f32.mrf.mxu0  ;;  %v10292_v40 = vld [vmem:[#allocation85_spill] sm:$0xff] }
 0x881   : > { %v7047_v48 = vpop.eup %7046  ;;  %v3126_v54 = vmul.f32 1.442695, %v3098_v9  ;;  %v3128_v30 = vmul.f32 1.442695, %v3099_v63 }
 0x882   : > { %v3199_v53 = vpop.permute.xlu0 %3198  ;;  %v3085_v0 = vpop.xlane.xlu1 %3084  ;;  %v8931_v10 = vadd.f32 %v7047_v48, %v7045_v15 }
 0x883   : > { %7060 = vpow2.f32 %v3126_v54  ;;  %v3100_v22 = vsub.f32 %v8835_v50, %v3085_v0  ;;  %v3101_v20 = vsub.f32 %v8837_v23, %v3085_v0  ;;  %6024 = vmatprep.subr.bf16.mxu1 %v3199_v53  ;;  %v8942_v50 = vld [vmem:[%s9853_s11 + $0x38] sm:$0xff]   ;;  %v6589_v9 = vpop.f32.mrf.mxu0 }
 0x884   : > { %10267 = vst [vmem:[#allocation77_spill] sm:$0xff] %v8931_v10  ;;  %v7049_v18 = vpop.eup %7048  ;;  %7062 = vpow2.f32 %v3128_v30  ;;  %10269 = vst [vmem:[#allocation61_spill] sm:$0xff] %v8942_v50  ;;  %v8960_v30 = vld [vmem:[%s9853_s11 + $0x28] sm:$0xff]  }
 0x885   : > { %v7051_v31 = vpop.eup %7050  ;;  %v3130_v47 = vmul.f32 1.442695, %v3100_v22  ;;  %v3132_v1 = vmul.f32 1.442695, %v3101_v20  ;;  %v3160_v54 = vpack.c.bf16 %v7049_v18, %v7045_v15  ;;  %10273 = vst [vmem:[#allocation107_spill] sm:$0xff] %v8960_v30  ;;  %v3449_v22 = vpop.f32.mrf.mxu0  ;;  %v8969_v15 = vld [vmem:[%s9853_s11 + $0x20] sm:$0xff]  }
 0x886   : > { %v3183_v19 = vpop.permute.xlu1 %3182  ;;  %v8937_v59 = vadd.f32 %v7051_v31, %v7049_v18  ;;  %v3161_v56 = vpack.c.bf16 %v7051_v31, %v7047_v48  ;;  %10275 = vst [vmem:[#allocation109_spill] sm:$0xff] %v8969_v15 }
 0x887   : > { %7064 = vpow2.f32 %v3130_v47  ;;  %6025 = vmatpush3.bf16.msra.mxu1 %v3183_v19  ;;  %v6592_v47 = vpop.f32.mrf.mxu0 }
 0x888   : > { %10268 = vst [vmem:[#allocation46_spill] sm:$0xff] %v8937_v59  ;;  %v7053_v41 = vpop.eup %7052  ;;  %7066 = vpow2.f32 %v3132_v1  ;;  %6594 = vmatprep.subr.bf16.mxu1 %v8942_v50  ;;  %v10290_v59 = vld [vmem:[#allocation31_spill] sm:$0xff] }
 0x889   : > { %v7055_v23 = vpop.eup %7054 }
 0x88a   : > { %3263 = vmatmul.mubr.bf16.vlgmr.msra.gmra.mxu1 %v3158_v24  ;;  %v8945_v58 = vadd.f32 %v7055_v23, %v7053_v41  ;;  %v8978_v24 = vld [vmem:[%s9853_s11 + $0x18] sm:$0xff]  }
 0x88b   : > { %3270 = vmatprep.mubr.bf16.mxu1 %v3161_v56  ;;  %6595 = vmatpush3.bf16.msra.mxu1 %v8942_v50  ;;  %10277 = vst [vmem:[#allocation111_spill] sm:$0xff] %v8978_v24  ;;  %v3462_v56 = vpop.f32.mrf.mxu0 }
 0x88c   : > { %10270 = vst [vmem:[#allocation79_spill] sm:$0xff] %v8945_v58  ;;  %v7057_v57 = vpop.eup %7056  ;;  %6596 = vmatprep.subr.bf16.mxu1 %v8951_v6  ;;  %v10291_v58 = vld [vmem:[#allocation47_spill] sm:$0xff] }
 0x88d   : > { %v7059_v49 = vpop.eup %7058  ;;  %v3162_v19 = vpack.c.bf16 %v7057_v57, %v7053_v41  ;;  %v3478_v41 = vmul.f32 %v10206_v33, %v3449_v22  ;;  %v10280_v22 = vld [vmem:[#allocation50_spill] sm:$0xff] }
 0x88e   : > { %v8954_v63 = vadd.f32 %v7059_v49, %v7057_v57  ;;  %v3163_v0 = vpack.c.bf16 %v7059_v49, %v7055_v23  ;;  %v8985_v49 = vld [vmem:[%s9853_s11 + $0x10] sm:$0xff]   ;;  %v6593_v57 = vpop.f32.mrf.mxu0  ;;  %v10340_v33 = vld [vmem:[#allocation102_spill] sm:$0xff] }
 0x88f   : > { %6597 = vmatpush3.bf16.msra.mxu1 %v8951_v6  ;;  %10278 = vst [vmem:[#allocation112_spill] sm:$0xff] %v8985_v49 }
 0x890   : > { %10272 = vst [vmem:[#allocation106_spill] sm:$0xff] %v8954_v63  ;;  %v7061_v48 = vpop.eup %7060  ;;  %6598 = vmatprep.subr.bf16.mxu1 %v8960_v30  ;;  %v10288_v63 = vld [vmem:[#allocation84_spill] sm:$0xff] }
 0x891   : > { %v7063_v53 = vpop.eup %7062 }
 0x892   : > { %3271 = vmatmul.mubr.bf16.gmra.mxu1 %v3160_v54  ;;  %v8963_v20 = vadd.f32 %v7063_v53, %v7061_v48  ;;  %v3477_v54 = vmul.f32 %v10205_v12, %v3446_v7  ;;  %v9002_v7 = vld [vmem:[%s9853_s11] sm:$0xff]  }
 0x893   : > { %3278 = vmatprep.mubr.bf16.mxu1 %v3163_v0  ;;  %6599 = vmatpush3.bf16.msra.mxu1 %v8960_v30  ;;  %v8994_v0 = vld [vmem:[%s9853_s11 + $0x8] sm:$0xff]   ;;  %10281 = vst [vmem:[#allocation114_spill] sm:$0xff] %v9002_v7 }
 0x894   : > { %10274 = vst [vmem:[#allocation108_spill] sm:$0xff] %v8963_v20  ;;  %v7065_v31 = vpop.eup %7064  ;;  %6600 = vmatprep.subr.bf16.mxu1 %v8969_v15  ;;  %10279 = vst [vmem:[#allocation113_spill] sm:$0xff] %v8994_v0  ;;  %v10283_v20 = vld [vmem:[#allocation53_spill] sm:$0xff] }
 0x895   : > { %v7067_v18 = vpop.eup %7066  ;;  %v3479_v10 = vmul.f32 %v8935_v25, %v10283_v20  ;;  %v10339_v20 = vld [vmem:[#allocation72_spill] sm:$0xff] }
 0x896   : > { %v8972_v1 = vadd.f32 %v7067_v18, %v7065_v31  ;;  %v3165_v23 = vpack.c.bf16 %v7067_v18, %v7063_v53  ;;  %v3164_v53 = vpack.c.bf16 %v7065_v31, %v7061_v48  ;;  %v3485_v18 = vpack.c.bf16 %v3478_v41, %v3477_v54  ;;  %v10282_v48 = vld [vmem:[#allocation59_spill] sm:$0xff]  ;;  %v10284_v41 = vld [vmem:[#allocation56_spill] sm:$0xff] }
 0x897   : > { %6601 = vmatpush3.bf16.msra.mxu1 %v8969_v15  ;;  %v3481_v54 = vmul.f32 %v10284_v41, %v3462_v56  ;;  %v10289_v56 = vld [vmem:[#allocation55_spill] sm:$0xff] }
 0x898   : > { %10276 = vst [vmem:[#allocation110_spill] sm:$0xff] %v8972_v1  ;;  %6602 = vmatprep.subr.bf16.mxu1 %v8978_v24  ;;  %v10287_v1 = vld [vmem:[#allocation57_spill] sm:$0xff]  ;;  %v10338_v41 = vld [vmem:[#allocation71_spill] sm:$0xff] }
 0x899   : > { %v3484_v25 = vmul.f32 %v6593_v57, %v10287_v1  ;;  %v10295_v57 = vld [vmem:[#allocation33_spill] sm:$0xff] }
 0x89a   : > { %3279 = vmatmul.mubr.bf16.gmra.mxu1 %v3162_v19  ;;  %v3465_v19 = vpop.f32.mrf.mxu0 }
 0x89b   : > { %3286 = vmatprep.mubr.bf16.mxu1 %v3165_v23  ;;  %6603 = vmatpush3.bf16.msra.mxu1 %v8978_v24  ;;  %v3480_v23 = vmul.f32 %v6589_v9, %v10280_v22  ;;  %v3482_v31 = vmul.f32 %v10282_v48, %v3465_v19  ;;  %v9013_v9 = vld [vmem:[%s9850_s8 + $0x38] sm:$0xff]   ;;  %v10286_v19 = vld [vmem:[#allocation27_spill] sm:$0xff] }
 0x89c   : > { %6604 = vmatprep.subr.bf16.mxu1 %v8985_v49  ;;  %10285 = vst [vmem:[#allocation115_spill] sm:$0xff] %v9013_v9 }
 0x89f   : > { %6605 = vmatpush3.bf16.msra.mxu1 %v8985_v49  ;;  %v10341_v49 = vld [vmem:[#allocation73_spill] sm:$0xff] }
 0x8a0   : > { %6606 = vmatprep.subr.bf16.mxu1 %v8994_v0 }
 0x8a2   : > { %3287 = vmatmul.mubr.bf16.gmra.mxu1 %v3164_v53  ;;  %v3486_v53 = vpack.c.bf16 %v3480_v23, %v3479_v10  ;;  %v3483_v10 = vmul.f32 %v6592_v47, %v10289_v56  ;;  %v10297_v47 = vld [vmem:[#allocation34_spill] sm:$0xff]  ;;  %v10336_v56 = vld [vmem:[#allocation69_spill] sm:$0xff] }
 0x8a3   : > { %6607 = vmatpush3.bf16.msra.mxu1 %v8994_v0  ;;  %6610 = vmatprep.mubr.bf16.mxu1 %v3485_v18  ;;  %v3487_v18 = vpack.c.bf16 %v3482_v31, %v3481_v54  ;;  %v10293_v31 = vld [vmem:[#allocation32_spill] sm:$0xff]  ;;  %v10294_v54 = vld [vmem:[#allocation86_spill] sm:$0xff] }
 0x8a4   : > { %6608 = vmatprep.subr.bf16.mxu1 %v9002_v7  ;;  %v3488_v23 = vpack.c.bf16 %v3484_v25, %v3483_v10  ;;  %v10300_v25 = vld [vmem:[#allocation89_spill] sm:$0xff]  ;;  %v10302_v10 = vld [vmem:[#allocation90_spill] sm:$0xff] }
 0x8a7   : > { %6609 = vmatpush3.bf16.msra.mxu1 %v9002_v7 }
 0x8a8   : > { %6842 = vmatprep.subr.msk.bf16.mxu1 %vm1358_vm1, %v9013_v9 }
 0x8aa   : > { %6611 = vmatmul.mubr.bf16.vlgmr.msra.gmra.mxu1 %v3486_v53  ;;  %v10298_v53 = vld [vmem:[#allocation88_spill] sm:$0xff] }
 0x8ab   : > { %6614 = vmatprep.mubr.bf16.mxu1 %v3487_v18  ;;  %6619 = vmatpush3.bf16.xpose.msra.mxu1 %v10286_v19  ;;  %v10299_v18 = vld [vmem:[#allocation35_spill] sm:$0xff]  ;;  %v10337_v19 = vld [vmem:[#allocation70_spill] sm:$0xff] }
 0x8ac   : > { %6843 = vmatprep.subr.msk.bf16.mxu1 %vm1358_vm1, %v10288_v63  ;;  %v10296_v63 = vld [vmem:[#allocation87_spill] sm:$0xff] }
 0x8b2   : > { %6615 = vmatmul.mubr.bf16.gmra.mxu1 %v3488_v23  ;;  %v3816_v23 = vpop.permute.xlu1 %3815 }
 0x8b3   : > { %6621 = vmatpush3.bf16.xpose.msra.mxu1 %v10290_v59  ;;  %6634 = vmatprep.mubr.msk.bf16.mxu1 %vm1358_vm1, %v10291_v58 }
 0x8b4   : > { %6844 = vmatprep.subr.msk.bf16.mxu1 %vm1358_vm1, %v10292_v40  ;;  %v10301_v40 = vld [vmem:[#allocation36_spill] sm:$0xff] }
 0x8bb   : > { %6623 = vmatpush3.bf16.xpose.msra.mxu1 %v10293_v31 }
 0x8bc   : > { %6845 = vmatprep.subr.msk.bf16.mxu1 %vm1358_vm1, %v10294_v54  ;;  %v10303_v54 = vld [vmem:[#allocation37_spill] sm:$0xff] }
 0x8c3   : > { %6625 = vmatpush3.bf16.xpose.msra.mxu1 %v10295_v57 }
 0x8c4   : > { %6846 = vmatprep.subr.msk.bf16.mxu1 %vm1358_vm1, %v10296_v63  ;;  %v3800_v63 = vpop.permute.xlu0 %3799 }
 0x8c5   : > { %v3839_v45 = vsel %vm1358_vm1, %v3800_v63, 0 }
 0x8cb   : > { %6627 = vmatpush3.bf16.xpose.msra.mxu1 %v10297_v47  ;;  %v10304_v47 = vld [vmem:[#allocation91_spill] sm:$0xff] }
 0x8cc   : > { %6847 = vmatprep.subr.msk.bf16.mxu1 %vm1358_vm1, %v10298_v53  ;;  %v3814_v53 = vpop.permute.xlu1 %3813 }
 0x8d3   : > { %6629 = vmatpush3.bf16.xpose.msra.mxu1 %v10299_v18  ;;  %v10305_v18 = vld [vmem:[#allocation92_spill] sm:$0xff] }
 0x8d4   : > { %6848 = vmatprep.subr.msk.bf16.mxu1 %vm1358_vm1, %v10300_v25  ;;  %v3798_v25 = vpop.permute.xlu0 %3797 }
 0x8d8   : > { %v3796_v63 = vpop.permute.xlu0 %3795 }
 0x8db   : > { %6631 = vmatpush3.bf16.xpose.msra.mxu1 %v10301_v40  ;;  %v10306_v40 = vld [vmem:[#allocation95_spill] sm:$0xff] }
 0x8dc   : > { %6849 = vmatprep.subr.msk.bf16.mxu1 %vm1358_vm1, %v10302_v10  ;;  %v3836_v10 = vsel %vm1358_vm1, %v3798_v25, 0 }
 0x8e3   : > { %6633 = vmatpush3.bf16.xpose.msra.mxu1 %v10303_v54  ;;  %v3833_v54 = vsel %vm1358_vm1, %v3796_v63, 0 }
 0x8e4   : > { %6850 = vmatprep.subr.msk.bf16.mxu1 %vm1358_vm1, %v3816_v23  ;;  %v3812_v23 = vpop.permute.xlu1 %3811 }
 0x8e8   : > { %v3810_v57 = vpop.permute.xlu1 %3809 }
 0x8ea   : > { %6635 = vmatmul.mubr.msk.bf16.vlgmr.msra.gmra.mxu1 %vm1358_vm1, %v10304_v47 }
 0x8eb   : > { %6638 = vmatprep.mubr.msk.bf16.mxu1 %vm1358_vm1, %v10305_v18  ;;  %6099 = vmatpush3.bf16.xpose.msra.mxu1 %v3839_v45  ;;  %v3794_v45 = vpop.permute.xlu0 %3793 }
 0x8ec   : > { %6851 = vmatprep.subr.msk.bf16.mxu1 %vm1358_vm1, %v3814_v53  ;;  %v3830_v53 = vsel %vm1358_vm1, %v3794_v45, 0  ;;  %v3808_v25 = vpop.permute.xlu1 %3807 }
 0x8f0   : > { %v3806_v59 = vpop.permute.xlu1 %3805 }
 0x8f2   : > { %6639 = vmatmul.mubr.msk.bf16.gmra.mxu1 %vm1358_vm1, %v10306_v40 }
 0x8f3   : > { %6101 = vmatpush3.bf16.xpose.msra.mxu1 %v3836_v10  ;;  %6114 = vmatprep.mubr.msk.bf16.mxu1 %vm1358_vm1, %v10291_v58  ;;  %v3792_v10 = vpop.permute.xlu0 %3791 }
 0x8f4   : > { %6852 = vmatprep.subr.msk.bf16.mxu1 %vm1358_vm1, %v3812_v23  ;;  %v3827_v31 = vsel %vm1358_vm1, %v3792_v10, 0 }
 0x8f7   : > { %v3790_v23 = vpop.permute.xlu0 %3789 }
 0x8f8   : > { %v3824_v63 = vsel %vm1358_vm1, %v3790_v23, 0  ;;  %v7233_v23 = vld [vmem:[%s9849_s7 + $0x30] sm:$0xff]  }
 0x8fb   : > { %6103 = vmatpush3.bf16.xpose.msra.mxu1 %v3833_v54  ;;  %v3804_v54 = vpop.permute.xlu1 %3803 }
 0x8fc   : > { %6853 = vmatprep.subr.msk.bf16.mxu1 %vm1358_vm1, %v3810_v57  ;;  %v3788_v57 = vpop.permute.xlu0 %3787 }
 0x8fd   : > { %v3821_v45 = vsel %vm1358_vm1, %v3788_v57, 0 }
 0x903   : > { %6105 = vmatpush3.bf16.xpose.msra.mxu1 %v3830_v53  ;;  %v3802_v53 = vpop.permute.xlu1 %3801 }
 0x904   : > { %6854 = vmatprep.subr.msk.bf16.mxu1 %vm1358_vm1, %v3808_v25  ;;  %v3786_v25 = vpop.permute.xlu0 %3785 }
 0x905   : > { %v3818_v10 = vsel %vm1358_vm1, %v3786_v25, 0  ;;  %v10312_v25 = vld [vmem:[#allocation14_spill] sm:$0xff] }
 0x908   : > { %v9098_v57 = vpop.permute.xlu0 %4349 }
 0x909   : > { %10310 = vst [vmem:[#allocation84_spill] sm:$0xff] %v9098_v57 }
 0x90b   : > { %6107 = vmatpush3.bf16.xpose.msra.mxu1 %v3827_v31  ;;  %v10307_v31 = vld [vmem:[#allocation10_spill] sm:$0xff] }
 0x90c   : > { %6855 = vmatprep.subr.msk.bf16.mxu1 %vm1358_vm1, %v3806_v59  ;;  %v7232_v59 = vld [vmem:[%s9849_s7 + $0x38] sm:$0xff]  }
 0x913   : > { %6109 = vmatpush3.bf16.xpose.msra.mxu1 %v3824_v63  ;;  %v10308_v63 = vld [vmem:[#allocation11_spill] sm:$0xff] }
 0x914   : > { %6856 = vmatprep.subr.msk.bf16.mxu1 %vm1358_vm1, %v3804_v54  ;;  %v10309_v54 = vld [vmem:[#allocation12_spill] sm:$0xff] }
 0x91b   : > { %6111 = vmatpush3.bf16.xpose.msra.mxu1 %v3821_v45  ;;  %v10311_v45 = vld [vmem:[#allocation13_spill] sm:$0xff] }
 0x91c   : > { %6857 = vmatprep.subr.msk.bf16.mxu1 %vm1358_vm1, %v3802_v53 }
 0x923   : > { %6113 = vmatpush3.bf16.xpose.msra.mxu1 %v3818_v10 }
 0x924   : > { %6858 = vmatprep.subr.msk.bf16.mxu1 %vm1358_vm1, %v7232_v59  ;;  %v7237_v59 = vld [vmem:[%s9849_s7 + $0x10] sm:$0xff]  }
 0x92a   : > { %6115 = vmatmul.mubr.msk.bf16.vlgmr.msra.gmra.mxu1 %vm1358_vm1, %v10291_v58  ;;  %v7234_v58 = vld [vmem:[%s9849_s7 + $0x28] sm:$0xff]  }
 0x92b   : > { %6116 = vmatprep.mubr.msk.bf16.mxu1 %vm1358_vm1, %v10304_v47  ;;  %6667 = vmatpush3.bf16.xpose.msra.mxu1 %v10307_v31 }
 0x92c   : > { %6859 = vmatprep.subr.msk.bf16.mxu1 %vm1358_vm1, %v7233_v23 }
 0x932   : > { %6117 = vmatmul.mubr.msk.bf16.gmra.mxu1 %vm1358_vm1, %v10304_v47  ;;  %v7235_v47 = vld [vmem:[%s9849_s7 + $0x20] sm:$0xff]  }
 0x933   : > { %6118 = vmatprep.mubr.msk.bf16.mxu1 %vm1358_vm1, %v10305_v18  ;;  %6669 = vmatpush3.bf16.xpose.msra.mxu1 %v10308_v63 }
 0x934   : > { %6860 = vmatprep.subr.msk.bf16.mxu1 %vm1358_vm1, %v7234_v58  ;;  %v10316_v58 = vld [vmem:[#allocation15_spill] sm:$0xff] }
 0x93a   : > { %6119 = vmatmul.mubr.msk.bf16.gmra.mxu1 %vm1358_vm1, %v10305_v18  ;;  %v7236_v18 = vld [vmem:[%s9849_s7 + $0x18] sm:$0xff]  }
 0x93b   : > { %6120 = vmatprep.mubr.msk.bf16.mxu1 %vm1358_vm1, %v10306_v40  ;;  %6671 = vmatpush3.bf16.xpose.msra.mxu1 %v10309_v54 }
 0x93c   : > { %6861 = vmatprep.subr.msk.bf16.mxu1 %vm1358_vm1, %v7235_v47  ;;  %v7238_v47 = vld [vmem:[%s9849_s7 + $0x8] sm:$0xff]  }
 0x942   : > { %6121 = vmatmul.mubr.msk.bf16.gmra.mxu1 %vm1358_vm1, %v10306_v40 }
 0x943   : > { %6673 = vmatpush3.bf16.xpose.msra.mxu1 %v10311_v45  ;;  %6682 = vmatprep.mubr.msk.bf16.mxu1 %vm1358_vm1, %v9098_v57 }
 0x944   : > { %6862 = vmatprep.subr.msk.bf16.mxu1 %vm1358_vm1, %v7236_v18 }
 0x94a   : > { %v6026_v53 = vpop.f32.mrf.mxu1 }
 0x94b   : > { %6675 = vmatpush3.bf16.xpose.msra.mxu1 %v10312_v25 }
 0x94c   : > { %v6027_v10 = vpop.f32.mrf.mxu1  ;;  %6863 = vmatprep.subr.msk.bf16.mxu1 %vm1358_vm1, %v7237_v59  ;;  %v10319_v59 = vld [vmem:[#allocation16_spill] sm:$0xff] }
 0x94d   : > { %v9114_v40 = vadd.f32 %v6027_v10, %v6026_v53 }
 0x94e   : > { %v9116_v31 = vpop.f32.mrf.mxu1 }
 0x94f   : > { %10313 = vst [vmem:[#allocation47_spill] sm:$0xff] %v9114_v40  ;;  %10314 = vst [vmem:[#allocation85_spill] sm:$0xff] %v9116_v31 }
 0x950   : > { %v9118_v23 = vpop.f32.mrf.mxu1 }
 0x951   : > { %10315 = vst [vmem:[#allocation86_spill] sm:$0xff] %v9118_v23 }
 0x952   : > { %v6032_v63 = vpop.f32.mrf.mxu1 }
 0x953   : > { %6677 = vmatpush3.bf16.xpose.msra.mxu1 %v10316_v58  ;;  %v7239_v58 = vld [vmem:[%s9849_s7] sm:$0xff]  }
 0x954   : > { %v6033_v54 = vpop.f32.mrf.mxu1  ;;  %6864 = vmatprep.subr.msk.bf16.mxu1 %vm1358_vm1, %v7238_v47 }
 0x955   : > { %v9125_v45 = vadd.f32 %v6033_v54, %v6032_v63 }
 0x956   : > { %v6035_v18 = vpop.f32.mrf.mxu1 }
 0x957   : > { %10317 = vst [vmem:[#allocation87_spill] sm:$0xff] %v9125_v45  ;;  %v10322_v45 = vld [vmem:[#allocation17_spill] sm:$0xff] }
 0x958   : > { %v6036_v25 = vpop.f32.mrf.mxu1 }
 0x959   : > { %v9127_v53 = vadd.f32 %v6036_v25, %v6035_v18  ;;  %v7240_v25 = vld [vmem:[%s9854_s12 + $0x38] sm:$0xff]  }
 0x95a   : > { %v6038_v10 = vpop.f32.mrf.mxu1 }
 0x95b   : > { %10318 = vst [vmem:[#allocation88_spill] sm:$0xff] %v9127_v53  ;;  %6679 = vmatpush3.bf16.xpose.msra.mxu1 %v10319_v59 }
 0x95c   : > { %v6039_v40 = vpop.f32.mrf.mxu1  ;;  %6865 = vmatprep.subr.msk.bf16.mxu1 %vm1358_vm1, %v7239_v58  ;;  %v9144_v58 = vpop.permute.xlu1 %4351 }
 0x95d   : > { %v9134_v23 = vadd.f32 %v6039_v40, %v6038_v10  ;;  %10324 = vst [vmem:[#allocation92_spill] sm:$0xff] %v9144_v58  ;;  %v9148_v10 = vpop.permute.xlu0 %4353 }
 0x95e   : > { %v6041_v31 = vpop.f32.mrf.mxu1  ;;  %10326 = vst [vmem:[#allocation10_spill] sm:$0xff] %v9148_v10 }
 0x95f   : > { %10320 = vst [vmem:[#allocation89_spill] sm:$0xff] %v9134_v23 }
 0x960   : > { %v6042_v47 = vpop.f32.mrf.mxu1 }
 0x961   : > { %v9136_v63 = vadd.f32 %v6042_v47, %v6041_v31  ;;  %v10327_v31 = vld [vmem:[#allocation93_spill] sm:$0xff]  ;;  %v9157_v47 = vpop.permute.xlu1 %4355 }
 0x962   : > { %v6044_v54 = vpop.f32.mrf.mxu1  ;;  %10329 = vst [vmem:[#allocation11_spill] sm:$0xff] %v9157_v47 }
 0x963   : > { %10321 = vst [vmem:[#allocation90_spill] sm:$0xff] %v9136_v63  ;;  %6681 = vmatpush3.bf16.xpose.msra.mxu1 %v10322_v45  ;;  %v10328_v45 = vld [vmem:[#allocation94_spill] sm:$0xff] }
 0x964   : > { %v6045_v18 = vpop.f32.mrf.mxu1  ;;  %6738 = vmatprep.subr.bf16.mxu1 %v7240_v25 }
 0x965   : > { %v9142_v59 = vadd.f32 %v6045_v18, %v6044_v54  ;;  %v10332_v54 = vld [vmem:[#allocation98_spill] sm:$0xff]  ;;  %v10333_v18 = vld [vmem:[#allocation99_spill] sm:$0xff] }
 0x966   : > { %v6047_v53 = vpop.f32.mrf.mxu1 }
 0x967   : > { %10323 = vst [vmem:[#allocation91_spill] sm:$0xff] %v9142_v59 }
 0x968   : > { %v6048_v57 = vpop.f32.mrf.mxu1 }
 0x969   : > { %v9146_v40 = vadd.f32 %v6048_v57, %v6047_v53  ;;  %v10330_v57 = vld [vmem:[#allocation96_spill] sm:$0xff]  ;;  %v10331_v53 = vld [vmem:[#allocation97_spill] sm:$0xff] }
 0x96a   : > { %6683 = vmatmul.mubr.msk.bf16.vlgmr.msra.gmra.mxu1 %vm1358_vm1, %v9144_v58 }
 0x96b   : > { %10325 = vst [vmem:[#allocation95_spill] sm:$0xff] %v9146_v40  ;;  %6686 = vmatprep.mubr.msk.bf16.mxu1 %vm1358_vm1, %v9148_v10  ;;  %6739 = vmatpush3.bf16.msra.mxu1 %v7240_v25  ;;  %v10334_v25 = vld [vmem:[#allocation100_spill] sm:$0xff] }
 0x96c   : > { %6740 = vmatprep.subr.bf16.mxu1 %v10327_v31 }
 0x96f   : > { %6741 = vmatpush3.bf16.msra.mxu1 %v10327_v31  ;;  %v10335_v31 = vld [vmem:[#allocation101_spill] sm:$0xff] }
 0x970   : > { %6742 = vmatprep.subr.bf16.mxu1 %v10328_v45 }
 0x972   : > { %6687 = vmatmul.mubr.msk.bf16.gmra.mxu1 %vm1358_vm1, %v9157_v47 }
 0x973   : > { %6743 = vmatpush3.bf16.msra.mxu1 %v10328_v45  ;;  %v6612_v45 = vpop.f32.mrf.mxu1 }
 0x974   : > { %6744 = vmatprep.subr.bf16.mxu1 %v10330_v57 }
 0x977   : > { %6745 = vmatpush3.bf16.msra.mxu1 %v10330_v57  ;;  %v3523_v57 = vpop.f32.mrf.mxu1 }
 0x978   : > { %6746 = vmatprep.subr.bf16.mxu1 %v10331_v53 }
 0x979   : > { %v6613_v40 = vpop.f32.mrf.mxu1 }
 0x97b   : > { %6747 = vmatpush3.bf16.msra.mxu1 %v10331_v53  ;;  %v3526_v59 = vpop.f32.mrf.mxu1 }
 0x97c   : > { %6748 = vmatprep.subr.bf16.mxu1 %v10332_v54 }
 0x97d   : > { %v6616_v63 = vpop.f32.mrf.mxu1 }
 0x97f   : > { %6749 = vmatpush3.bf16.msra.mxu1 %v10332_v54  ;;  %v3539_v53 = vpop.f32.mrf.mxu1 }
 0x980   : > { %6750 = vmatprep.subr.bf16.mxu1 %v10333_v18 }
 0x981   : > { %v6617_v23 = vpop.f32.mrf.mxu1 }
 0x983   : > { %6751 = vmatpush3.bf16.msra.mxu1 %v10333_v18  ;;  %v3542_v47 = vpop.f32.mrf.mxu1 }
 0x984   : > { %6752 = vmatprep.subr.bf16.mxu1 %v10334_v25 }
 0x987   : > { %6753 = vmatpush3.bf16.msra.mxu1 %v10334_v25 }
 0x988   : > { %4683 = vmatprep.subr.bf16.mxu1 %v10335_v31 }
 0x9aa   : > { %v6636_v10 = vpop.f32.mrf.mxu1 }
 0x9ab   : > { %v3621_v31 = vmul.f32 %v6636_v10, %v10339_v20 }
 0x9ac   : > { %v3588_v54 = vpop.f32.mrf.mxu1 }
 0x9ad   : > { %v3619_v9 = vmul.f32 %v10337_v19, %v3588_v54  ;;  %v10344_v19 = vld [vmem:[#allocation75_spill] sm:$0xff] }
 0x9ae   : > { %v6637_v58 = vpop.f32.mrf.mxu1 }
 0x9af   : > { %v3622_v1 = vmul.f32 %v6637_v58, %v10336_v56  ;;  %v10342_v58 = vld [vmem:[#allocation103_spill] sm:$0xff]  ;;  %v10343_v56 = vld [vmem:[#allocation74_spill] sm:$0xff] }
 0x9b0   : > { %v3591_v18 = vpop.f32.mrf.mxu1 }
 0x9b1   : > { %v3620_v25 = vmul.f32 %v10338_v41, %v3591_v18  ;;  %v3628_v22 = vpack.c.bf16 %v3622_v1, %v3621_v31  ;;  %v10345_v41 = vld [vmem:[#allocation76_spill] sm:$0xff]  ;;  %v10346_v1 = vmov 0  }
 0x9b2   : > { %v6640_v48 = vpop.f32.mrf.mxu1 }
 0x9b3   : > { %v3627_v7 = vpack.c.bf16 %v3620_v25, %v3619_v9  ;;  %v3625_v10 = vmul.f32 %v6640_v48, %v10345_v41 }
 0x9b4   : > { %v3604_v0 = vpop.f32.mrf.mxu1 }
 0x9b5   : > { %6658 = vmatprep.mubr.bf16.mxu0 %v3627_v7  ;;  %v3623_v54 = vmul.f32 %v10343_v56, %v3604_v0  ;;  %v3697_v0 = vpack.c.bf16 %v6613_v40, %v6612_v45 }
 0x9b6   : > { %v6641_v12 = vpop.f32.mrf.mxu1  ;;  %6659 = vmatmul.mubr.bf16.vlgmr.msra.gmra.mxu0 %v3628_v22  ;;  %v3696_v22 = vpack.c.bf16 %v3526_v59, %v3523_v57 }
 0x9b7   : > { %3727 = vmatpush1.bf16.msra.mxu0 %v10340_v33  ;;  %v3626_v24 = vmul.f32 %v6641_v12, %v10341_v49  ;;  %v4178_v33 = vpop.permute.xlu0 %4177  ;;  %v10347_v12 = vld [vmem:[#allocation104_spill] sm:$0xff] }
 0x9b8   : > { %v3607_v15 = vpop.f32.mrf.mxu1  ;;  %3968 = vmatprep.subr.bf16.mxu0 %v10342_v58 }
 0x9b9   : > { %v3624_v18 = vmul.f32 %v10344_v19, %v3607_v15  ;;  %v3630_v9 = vpack.c.bf16 %v3626_v24, %v3625_v10  ;;  %v3698_v15 = vpack.c.bf16 %v3542_v47, %v3539_v53  ;;  %v4162_v24 = vpop.permute.xlu1 %4161 }
 0x9bb   : > { %v3629_v20 = vpack.c.bf16 %v3624_v18, %v3623_v54  ;;  %v4176_v7 = vpop.permute.xlu0 %4175 }
 0x9bd   : > { %6662 = vmatprep.mubr.bf16.mxu0 %v3629_v20  ;;  %v3699_v20 = vpack.c.bf16 %v6617_v23, %v6616_v63  ;;  %v4160_v57 = vpop.permute.xlu1 %4159 }
 0x9be   : > { %6663 = vmatmul.mubr.bf16.gmra.mxu0 %v3630_v9 }
 0x9bf   : > { %3744 = vmatprep.mubr.bf16.mxu0 %v10346_v1  ;;  %v4174_v45 = vpop.permute.xlu0 %4173 }
 0x9c1   : > { %v4158_v47 = vpop.permute.xlu1 %4157 }
 0x9c3   : > { %v4172_v23 = vpop.permute.xlu0 %4171 }
 0x9c5   : > { %v4156_v53 = vpop.permute.xlu1 %4155 }
 0x9c6   : > { %5691 = vmatmul.mubr.msk.bf16.vlgmr.msra.gmra.mxu0 %vm1358_vm1, %v3696_v22 }
 0x9c7   : > { %3969 = vmatpush1.bf16.msra.mxu0 %v10347_v12  ;;  %3754 = vmatprep.mubr.bf16.mxu0 %v10346_v1  ;;  %v4170_v10 = vpop.permute.xlu0 %4169 }
 0x9c8   : > { %6122 = vmatprep.subr.bf16.mxu0 %v4178_v33 }
 0x9c9   : > { %v4154_v22 = vpop.permute.xlu1 %4153 }
 0x9cb   : > { %v4168_v12 = vpop.permute.xlu0 %4167 }
 0x9ce   : > { %5692 = vmatmul.mubr.msk.bf16.gmra.mxu0 %vm1358_vm1, %v3697_v0  ;;  %v4152_v0 = vpop.permute.xlu1 %4151 }
 0x9cf   : > { %3764 = vmatprep.mubr.bf16.mxu0 %v10346_v1 }
 0x9d6   : > { %5693 = vmatmul.mubr.msk.bf16.gmra.mxu0 %vm1358_vm1, %v3698_v15  ;;  %v4166_v15 = vpop.permute.xlu0 %4165 }
 0x9d7   : > { %3774 = vmatprep.mubr.bf16.mxu0 %v10346_v1 }
 0x9de   : > { %5694 = vmatmul.mubr.msk.bf16.gmra.mxu0 %vm1358_vm1, %v3699_v20 }
 0x9df   : > { %3986 = vmatprep.mubr.bf16.mxu0 %v10346_v1 }
 0xa76   : > { %v6660_v48 = vpop.f32.mrf.mxu0 }
 0xa78   : > { %v3665_v59 = vpop.f32.mrf.mxu0 }
 0xa7a   : > { %v6661_v40 = vpop.f32.mrf.mxu0 }
 0xa7b   : > { %v3939_v54 = vpack.c.bf16 %v6661_v40, %v6660_v48 }
 0xa7c   : > { %v3668_v25 = vpop.f32.mrf.mxu0 }
 0xa7d   : > { %v3938_v31 = vpack.c.bf16 %v3668_v25, %v3665_v59 }
 0xa7e   : > { %v6664_v58 = vpop.f32.mrf.mxu0 }
 0xa7f   : > { %5699 = vmatmul.mubr.msk.bf16.vlgmr.msra.gmra.mxu0 %vm1358_vm1, %v3938_v31 }
 0xa80   : > { %6123 = vmatpush3.bf16.msra.mxu0 %v4162_v24  ;;  %3996 = vmatprep.mubr.bf16.mxu0 %v10346_v1  ;;  %v3681_v63 = vpop.f32.mrf.mxu0  ;;  %v4150_v24 = vpop.permute.xlu1 %4149 }
 0xa81   : > { %6124 = vmatprep.subr.bf16.mxu0 %v4176_v7 }
 0xa82   : > { %v6665_v18 = vpop.f32.mrf.mxu0 }
 0xa83   : > { %v3941_v20 = vpack.c.bf16 %v6665_v18, %v6664_v58 }
 0xa84   : > { %6125 = vmatpush3.bf16.msra.mxu0 %v4160_v57  ;;  %v3684_v9 = vpop.f32.mrf.mxu0 }
 0xa85   : > { %6126 = vmatprep.subr.bf16.mxu0 %v4174_v45  ;;  %v3940_v33 = vpack.c.bf16 %v3684_v9, %v3681_v63 }
 0xa86   : > { %v3746_v7 = vpop.f32.mrf.mxu0 }
 0xa87   : > { %5700 = vmatmul.mubr.msk.bf16.gmra.mxu0 %vm1358_vm1, %v3939_v54 }
 0xa88   : > { %6127 = vmatpush3.bf16.msra.mxu0 %v4158_v47  ;;  %4006 = vmatprep.mubr.bf16.mxu0 %v10346_v1  ;;  %v3748_v48 = vpop.f32.mrf.mxu0  ;;  %v3899_v47 = vpop.f32.mrf.mxu1 }
 0xa89   : > { %6128 = vmatprep.subr.bf16.mxu0 %v4172_v23  ;;  %v3900_v19 = vadd.f32 %v3899_v47, %v3746_v7 }
 0xa8a   : > { %v3750_v59 = vpop.f32.mrf.mxu0  ;;  %v3901_v63 = vpop.f32.mrf.mxu1 }
 0xa8b   : > { %v3902_v56 = vadd.f32 %v3901_v63, %v3748_v48 }
 0xa8c   : > { %6129 = vmatpush3.bf16.msra.mxu0 %v4156_v53  ;;  %v3752_v57 = vpop.f32.mrf.mxu0  ;;  %v3903_v54 = vpop.f32.mrf.mxu1 }
 0xa8d   : > { %6130 = vmatprep.subr.bf16.mxu0 %v4170_v10  ;;  %v3904_v51 = vadd.f32 %v3903_v54, %v3750_v59 }
 0xa8e   : > { %v3756_v40 = vpop.f32.mrf.mxu0  ;;  %v3905_v58 = vpop.f32.mrf.mxu1 }
 0xa8f   : > { %5701 = vmatmul.mubr.msk.bf16.gmra.mxu0 %vm1358_vm1, %v3940_v33  ;;  %v3906_v37 = vadd.f32 %v3905_v58, %v3752_v57 }
 0xa90   : > { %6131 = vmatpush3.bf16.msra.mxu0 %v4154_v22  ;;  %4016 = vmatprep.mubr.bf16.mxu0 %v10346_v1  ;;  %v3758_v45 = vpop.f32.mrf.mxu0  ;;  %v3909_v9 = vpop.f32.mrf.mxu1 }
 0xa91   : > { %6132 = vmatprep.subr.bf16.mxu0 %v4168_v12  ;;  %v3910_v47 = vadd.f32 %v3909_v9, %v3756_v40 }
 0xa92   : > { %v3760_v25 = vpop.f32.mrf.mxu0  ;;  %v3911_v33 = vpop.f32.mrf.mxu1 }
 0xa94   : > { %6133 = vmatpush3.bf16.msra.mxu0 %v4152_v0  ;;  %v3762_v31 = vpop.f32.mrf.mxu0  ;;  %v3913_v0 = vpop.f32.mrf.mxu1 }
 0xa95   : > { %6134 = vmatprep.subr.bf16.mxu0 %v4166_v15 }
 0xa96   : > { %v3766_v23 = vpop.f32.mrf.mxu0 }
 0xa97   : > { %5702 = vmatmul.mubr.msk.bf16.gmra.mxu0 %vm1358_vm1, %v3941_v20  ;;  %v3915_v20 = vpop.f32.mrf.mxu1 }
 0xa98   : > { %6135 = vmatpush3.bf16.msra.mxu0 %v4150_v24  ;;  %v3768_v53 = vpop.f32.mrf.mxu0 }
 0xa99   : > { %v3919_v1 = vpop.f32.mrf.mxu1 }
 0xa9a   : > { %v3770_v10 = vpop.f32.mrf.mxu0  ;;  %v3920_v58 = vadd.f32 %v3919_v1, %v3766_v23 }
 0xa9b   : > { %v3921_v50 = vpop.f32.mrf.mxu1 }
 0xa9c   : > { %v3772_v18 = vpop.f32.mrf.mxu0  ;;  %v3922_v9 = vadd.f32 %v3921_v50, %v3768_v53 }
 0xa9d   : > { %v3923_v7 = vpop.f32.mrf.mxu1 }
 0xa9e   : > { %v3776_v22 = vpop.f32.mrf.mxu0 }
 0xa9f   : > { %v3925_v57 = vpop.f32.mrf.mxu1 }
 0xaa0   : > { %v3778_v12 = vpop.f32.mrf.mxu0 }
 0xaa2   : > { %v9200_v15 = vpop.f32.mrf.mxu0 }
 0xaa4   : > { %v9202_v24 = vpop.f32.mrf.mxu0 }
 0xb3f   : > { %v3988_v41 = vpop.f32.mrf.mxu0 }
 0xb40   : > { %v9204_v30 = vadd.f32 %v3988_v41, %v3900_v19  ;;  %v3912_v41 = vadd.f32 %v3911_v33, %v3758_v45  ;;  %v3929_v45 = vpop.f32.mrf.mxu1 }
 0xb41   : > { %v3990_v49 = vpop.f32.mrf.mxu0  ;;  %v3930_v53 = vadd.f32 %v3929_v45, %v3776_v22 }
 0xb42   : > { %v9206_v6 = vadd.f32 %v3990_v49, %v3902_v56 }
 0xb43   : > { %v3992_v52 = vpop.f32.mrf.mxu0 }
 0xb44   : > { %v4043_v26 = vmax.f32 %v9204_v30, %v9206_v6  ;;  %v9210_v55 = vadd.f32 %v3992_v52, %v3904_v51  ;;  %v3914_v51 = vadd.f32 %v3913_v0, %v3760_v25  ;;  %v3916_v52 = vadd.f32 %v3915_v20, %v3762_v31  ;;  %v3931_v31 = vpop.f32.mrf.mxu1 }
 0xb45   : > { %v3994_v36 = vpop.f32.mrf.mxu0  ;;  %v3924_v20 = vadd.f32 %v3923_v7, %v3770_v10 }
 0xb46   : > { %v9212_v42 = vadd.f32 %v3994_v36, %v3906_v37  ;;  %4044 = vmax.xlane.f32.xlu0 %v4043_v26  ;;  %v3933_v1 = vpop.f32.mrf.mxu1 }
 0xb47   : > { %v3998_v48 = vpop.f32.mrf.mxu0 }
 0xb48   : > { %v4046_v49 = vmax.f32 %v9210_v55, %v9212_v42  ;;  %v9216_v56 = vadd.f32 %v3998_v48, %v3910_v47 }
 0xb49   : > { %v4000_v19 = vpop.f32.mrf.mxu0 }
 0xb4a   : > { %v9218_v59 = vadd.f32 %v4000_v19, %v3912_v41  ;;  %4047 = vmax.xlane.f32.xlu1 %v4046_v49  ;;  %v3926_v41 = vadd.f32 %v3925_v57, %v3772_v18  ;;  %v3935_v18 = vpop.f32.mrf.mxu1  ;;  %v3934_v57 = vadd.f32 %v3933_v1, %v9200_v15 }
 0xb4b   : > { %v4002_v63 = vpop.f32.mrf.mxu0 }
 0xb4c   : > { %v4049_v36 = vmax.f32 %v9216_v56, %v9218_v59  ;;  %v9222_v37 = vadd.f32 %v4002_v63, %v3914_v51  ;;  %v3932_v51 = vadd.f32 %v3931_v31, %v3778_v12 }
 0xb4d   : > { %v4004_v26 = vpop.f32.mrf.mxu0 }
 0xb4e   : > { %v9224_v40 = vadd.f32 %v4004_v26, %v3916_v52  ;;  %4050 = vmax.xlane.f32.xlu0 %v4049_v36 }
 0xb4f   : > { %v4008_v54 = vpop.f32.mrf.mxu0 }
 0xb50   : > { %v4052_v33 = vmax.f32 %v9222_v37, %v9224_v40  ;;  %v9228_v47 = vadd.f32 %v4008_v54, %v3920_v58  ;;  %v3936_v54 = vadd.f32 %v3935_v18, %v9202_v24 }
 0xb51   : > { %v4010_v48 = vpop.f32.mrf.mxu0 }
 0xb52   : > { %v9230_v25 = vadd.f32 %v4010_v48, %v3922_v9  ;;  %4053 = vmax.xlane.f32.xlu1 %v4052_v33 }
 0xb53   : > { %v4012_v0 = vpop.f32.mrf.mxu0 }
 0xb54   : > { %v4055_v49 = vmax.f32 %v9228_v47, %v9230_v25  ;;  %v9234_v63 = vadd.f32 %v4012_v0, %v3924_v20 }
 0xb55   : > { %v4014_v19 = vpop.f32.mrf.mxu0 }
 0xb56   : > { %v9236_v50 = vadd.f32 %v4014_v19, %v3926_v41  ;;  %4056 = vmax.xlane.f32.xlu0 %v4055_v49 }
 0xb57   : > { %v4018_v23 = vpop.f32.mrf.mxu0 }
 0xb58   : > { %v4058_v52 = vmax.f32 %v9234_v63, %v9236_v50  ;;  %v9240_v26 = vadd.f32 %v4018_v23, %v3930_v53 }
 0xb59   : > { %v4020_v36 = vpop.f32.mrf.mxu0 }
 0xb5a   : > { %v9242_v10 = vadd.f32 %v4020_v36, %v3932_v51  ;;  %4059 = vmax.xlane.f32.xlu1 %v4058_v52 }
 0xb5b   : > { %v4022_v7 = vpop.f32.mrf.mxu0 }
 0xb5c   : > { %v4061_v58 = vmax.f32 %v9240_v26, %v9242_v10  ;;  %v9248_v12 = vadd.f32 %v4022_v7, %v3934_v57 }
 0xb5d   : > { %v4024_v22 = vpop.f32.mrf.mxu0 }
 0xb5e   : > { %v9250_v45 = vadd.f32 %v4024_v22, %v3936_v54  ;;  %4062 = vmax.xlane.f32.xlu0 %v4061_v58 }
 0xb60   : > { %v4064_v9 = vmax.f32 %v9248_v12, %v9250_v45 }
 0xb62   : > { %4065 = vmax.xlane.f32.xlu1 %v4064_v9 }
 0xb73   : > { %4147 = vrot.lane.b32.xlu1 %v10252_v60, %s7315_s26 }
 0xb74   : > { %4163 = vrot.lane.b32.xlu0 %v10253_v29, %s7315_s26 }
 0xb77   : > { %4772 = vrot.lane.b32.xlu1 %v10164_v39, %s7316_s23 }
 0xb78   : > { %4756 = vrot.lane.b32.xlu0 %v7829_v35, %s7316_s23  ;;  %v10352_v35 = vld [vmem:[#allocation80_spill] sm:$0xff] }
 0xb7b   : > { %4770 = vrot.lane.b32.xlu1 %v8095_v43, %s7316_s23 }
 0xb7c   : > { %4754 = vrot.lane.b32.xlu0 %v8105_v44, %s7316_s23 }
 0xb7f   : > { %4768 = vrot.lane.b32.xlu1 %v7871_v34, %s7316_s23 }
 0xb80   : > { %4752 = vrot.lane.b32.xlu0 %v7813_v27, %s7316_s23  ;;  %v10351_v27 = vld [vmem:[#allocation43_spill] sm:$0xff] }
 0xb83   : > { %4766 = vrot.lane.b32.xlu1 %v8115_v3, %s7316_s23 }
 0xb84   : > { %4750 = vrot.lane.b32.xlu0 %v8125_v32, %s7316_s23 }
 0xb87   : > { %4764 = vrot.lane.b32.xlu1 %v7857_v13, %s7316_s23  ;;  %v10354_v13 = vld [vmem:[#allocation48_spill] sm:$0xff] }
 0xb88   : > { %4748 = vrot.lane.b32.xlu0 %v7795_v17, %s7316_s23  ;;  %v10349_v17 = vld [vmem:[#allocation44_spill] sm:$0xff] }
 0xb8b   : > { %4762 = vrot.lane.b32.xlu1 %v8136_v38, %s7316_s23 }
 0xb8c   : > { %4746 = vrot.lane.b32.xlu0 %v8144_v28, %s7316_s23 }
 0xb8f   : > { %4760 = vrot.lane.b32.xlu1 %v7843_v46, %s7316_s23  ;;  %v10353_v46 = vld [vmem:[#allocation41_spill] sm:$0xff] }
 0xb90   : > { %4744 = vrot.lane.b32.xlu0 %v7759_v5, %s7316_s23  ;;  %v10348_v5 = vld [vmem:[#allocation78_spill] sm:$0xff] }
 0xb93   : > { %4758 = vrot.lane.b32.xlu1 %v8152_v4, %s7316_s23 }
 0xb94   : > { %4742 = vrot.lane.b32.xlu0 %v8160_v14, %s7316_s23 }
 0xb97   : > { %5118 = vrot.lane.b32.xlu1 %v7929_v21, %s7316_s23  ;;  %v10350_v21 = vld [vmem:[#allocation54_spill] sm:$0xff] }
 0xb98   : > { %5134 = vrot.lane.b32.xlu0 %v10165_v16, %s7316_s23 }
 0xb9b   : > { %5116 = vrot.lane.b32.xlu1 %v8178_v2, %s7316_s23 }
 0xb9c   : > { %5132 = vrot.lane.b32.xlu0 %v10254_v62, %s7316_s23 }
 0xb9f   : > { %5114 = vrot.lane.b32.xlu1 %v10255_v61, %s7316_s23 }
 0xba0   : > { %5130 = vrot.lane.b32.xlu0 %v10256_v8, %s7316_s23 }
 0xba3   : > { %5112 = vrot.lane.b32.xlu1 %v10257_v11, %s7316_s23 }
 0xba4   : > { %5128 = vrot.lane.b32.xlu0 %v10348_v5, %s7316_s23  ;;  %v6684_v5 = vpop.f32.mrf.mxu1 }
 0xba7   : > { %5110 = vrot.lane.b32.xlu1 %v10349_v17, %s7316_s23 }
 0xba8   : > { %5126 = vrot.lane.b32.xlu0 %v10350_v21, %s7316_s23 }
 0xbab   : > { %5108 = vrot.lane.b32.xlu1 %v10351_v27, %s7316_s23 }
 0xbac   : > { %5124 = vrot.lane.b32.xlu0 %v10352_v35, %s7316_s23 }
 0xbaf   : > { %5106 = vrot.lane.b32.xlu1 %v10353_v46, %s7316_s23  ;;  %v10355_v46 = vld [vmem:[#allocation61_spill] sm:$0xff] }
 0xbb0   : > { %5122 = vrot.lane.b32.xlu0 %v10354_v13, %s7316_s23 }
 0xbcf   : > { %v4045_v34 = vpop.xlane.xlu0 %4044 }
 0xbd0   : > { %v4067_v43 = vsub.f32 %v9204_v30, %v4045_v34  ;;  %v4068_v44 = vsub.f32 %v9206_v6, %v4045_v34 }
 0xbd2   : > { %v4083_v3 = vmul.f32 1.442695, %v4067_v43  ;;  %v4085_v32 = vmul.f32 1.442695, %v4068_v44  ;;  %v10356_v44 = vld [vmem:[#allocation105_spill] sm:$0xff] }
 0xbd3   : > { %v4048_v38 = vpop.xlane.xlu1 %4047 }
 0xbd4   : > { %7068 = vpow2.f32 %v4083_v3  ;;  %v4069_v28 = vsub.f32 %v9210_v55, %v4048_v38  ;;  %v4070_v4 = vsub.f32 %v9212_v42, %v4048_v38 }
 0xbd5   : > { %7070 = vpow2.f32 %v4085_v32 }
 0xbd6   : > { %v4087_v14 = vmul.f32 1.442695, %v4069_v28  ;;  %v4089_v2 = vmul.f32 1.442695, %v4070_v4 }
 0xbd7   : > { %v4051_v39 = vpop.xlane.xlu0 %4050 }
 0xbd8   : > { %7072 = vpow2.f32 %v4087_v14  ;;  %v4071_v16 = vsub.f32 %v9216_v56, %v4051_v39  ;;  %v4072_v62 = vsub.f32 %v9218_v59, %v4051_v39  ;;  %v10357_v14 = vld [vmem:[#allocation107_spill] sm:$0xff] }
 0xbd9   : > { %7074 = vpow2.f32 %v4089_v2 }
 0xbda   : > { %v4091_v61 = vmul.f32 1.442695, %v4071_v16  ;;  %v4093_v8 = vmul.f32 1.442695, %v4072_v62 }
 0xbdb   : > { %v4054_v11 = vpop.xlane.xlu1 %4053 }
 0xbdc   : > { %7076 = vpow2.f32 %v4091_v61  ;;  %v4073_v6 = vsub.f32 %v9222_v37, %v4054_v11  ;;  %v4074_v55 = vsub.f32 %v9224_v40, %v4054_v11 }
 0xbdd   : > { %7078 = vpow2.f32 %v4093_v8  ;;  %v10358_v8 = vld [vmem:[#allocation109_spill] sm:$0xff] }
 0xbde   : > { %v4095_v42 = vmul.f32 1.442695, %v4073_v6  ;;  %v4097_v30 = vmul.f32 1.442695, %v4074_v55 }
 0xbdf   : > { %v4057_v15 = vpop.xlane.xlu0 %4056 }
 0xbe0   : > { %7080 = vpow2.f32 %v4095_v42  ;;  %v4075_v24 = vsub.f32 %v9228_v47, %v4057_v15  ;;  %v4076_v56 = vsub.f32 %v9230_v25, %v4057_v15 }
 0xbe1   : > { %v7069_v33 = vpop.eup %7068  ;;  %7082 = vpow2.f32 %v4097_v30  ;;  %v10359_v30 = vld [vmem:[#allocation111_spill] sm:$0xff] }
 0xbe2   : > { %v7071_v59 = vpop.eup %7070  ;;  %v4099_v48 = vmul.f32 1.442695, %v4075_v24  ;;  %v4101_v31 = vmul.f32 1.442695, %v4076_v56  ;;  %v10360_v56 = vld [vmem:[#allocation112_spill] sm:$0xff] }
 0xbe3   : > { %v4060_v0 = vpop.xlane.xlu1 %4059  ;;  %v9328_v20 = vadd.f32 %v7071_v59, %v7069_v33 }
 0xbe4   : > { %7084 = vpow2.f32 %v4099_v48  ;;  %v4077_v37 = vsub.f32 %v9234_v63, %v4060_v0  ;;  %v4078_v40 = vsub.f32 %v9236_v50, %v4060_v0 }
 0xbe5   : > { %v7073_v41 = vpop.eup %7072  ;;  %7086 = vpow2.f32 %v4101_v31  ;;  %v10362_v31 = vld [vmem:[#allocation51_spill] sm:$0xff] }
 0xbe6   : > { %v7075_v49 = vpop.eup %7074  ;;  %v4103_v19 = vmul.f32 1.442695, %v4077_v37  ;;  %v4105_v47 = vmul.f32 1.442695, %v4078_v40  ;;  %v4139_v35 = vpack.c.bf16 %v7073_v41, %v7069_v33  ;;  %v10361_v33 = vld [vmem:[#allocation52_spill] sm:$0xff]  ;;  %v10363_v40 = vld [vmem:[#allocation113_spill] sm:$0xff] }
 0xbe7   : > { %v4063_v1 = vpop.xlane.xlu0 %4062  ;;  %v4140_v25 = vpack.c.bf16 %v7075_v49, %v7071_v59  ;;  %v9332_v23 = vadd.f32 %v7075_v49, %v7073_v41 }
 0xbe8   : > { %7088 = vpow2.f32 %v4103_v19  ;;  %v4079_v53 = vsub.f32 %v9240_v26, %v4063_v1  ;;  %v4080_v51 = vsub.f32 %v9242_v10, %v4063_v1  ;;  %v10364_v19 = vld [vmem:[#allocation50_spill] sm:$0xff] }
 0xbe9   : > { %v7077_v52 = vpop.eup %7076  ;;  %7090 = vpow2.f32 %v4105_v47  ;;  %4227 = vmatprep.mubr.bf16.mxu0 %v4140_v25  ;;  %v10365_v1 = vld [vmem:[#allocation114_spill] sm:$0xff]  ;;  %v10366_v25 = vld [vmem:[#allocation59_spill] sm:$0xff] }
 0xbea   : > { %v7079_v63 = vpop.eup %7078  ;;  %v4107_v36 = vmul.f32 1.442695, %v4079_v53  ;;  %v4109_v50 = vmul.f32 1.442695, %v4080_v51  ;;  %v10367_v51 = vld [vmem:[#allocation53_spill] sm:$0xff] }
 0xbeb   : > { %v4164_v18 = vpop.permute.xlu0 %4163  ;;  %v4066_v7 = vpop.xlane.xlu1 %4065  ;;  %v9336_v57 = vadd.f32 %v7079_v63, %v7077_v52 }
 0xbec   : > { %7092 = vpow2.f32 %v4107_v36  ;;  %v4081_v54 = vsub.f32 %v9248_v12, %v4066_v7  ;;  %v4082_v58 = vsub.f32 %v9250_v45, %v4066_v7  ;;  %6136 = vmatprep.subr.bf16.mxu0 %v4164_v18  ;;  %v4403_v45 = vpop.f32.mrf.mxu1  ;;  %v10369_v18 = vld [vmem:[#allocation115_spill] sm:$0xff] }
 0xbed   : > { %v7081_v22 = vpop.eup %7080  ;;  %7094 = vpow2.f32 %v4109_v50  ;;  %v4434_v0 = vmul.f32 %v10362_v31, %v4403_v45  ;;  %v7244_v45 = vld [vmem:[%s9850_s8 + $0x18] sm:$0xff]  }
 0xbee   : > { %v7083_v26 = vpop.eup %7082  ;;  %v4111_v10 = vmul.f32 1.442695, %v4081_v54  ;;  %v4113_v9 = vmul.f32 1.442695, %v4082_v58  ;;  %v6685_v32 = vpop.f32.mrf.mxu1  ;;  %v4141_v4 = vpack.c.bf16 %v7081_v22, %v7077_v52  ;;  %v4436_v52 = vmul.f32 %v6684_v5, %v10367_v51  ;;  %v10370_v54 = vld [vmem:[#allocation27_spill] sm:$0xff]  ;;  %v10371_v58 = vld [vmem:[#allocation57_spill] sm:$0xff] }
 0xbef   : > { %v4148_v17 = vpop.permute.xlu1 %4147  ;;  %v9340_v21 = vadd.f32 %v7083_v26, %v7081_v22  ;;  %v4142_v13 = vpack.c.bf16 %v7083_v26, %v7079_v63  ;;  %v4437_v47 = vmul.f32 %v6685_v32, %v10364_v19  ;;  %v10368_v63 = vld [vmem:[#allocation56_spill] sm:$0xff]  ;;  %v7246_v32 = vld [vmem:[%s9850_s8 + $0x8] sm:$0xff]  }
 0xbf0   : > { %7096 = vpow2.f32 %v4111_v10  ;;  %6137 = vmatpush3.bf16.msra.mxu0 %v4148_v17  ;;  %v4406_v16 = vpop.f32.mrf.mxu1  ;;  %v7241_v26 = vld [vmem:[%s9850_s8 + $0x30] sm:$0xff]   ;;  %v10372_v10 = vld [vmem:[#allocation55_spill] sm:$0xff] }
 0xbf1   : > { %v7085_v27 = vpop.eup %7084  ;;  %7098 = vpow2.f32 %v4113_v9  ;;  %6690 = vmatprep.subr.bf16.mxu0 %v10355_v46  ;;  %v4435_v59 = vmul.f32 %v10361_v33, %v4406_v16  ;;  %v4443_v50 = vpack.c.bf16 %v4437_v47, %v4436_v52  ;;  %v10373_v17 = vld [vmem:[#allocation31_spill] sm:$0xff] }
 0xbf2   : > { %v7087_v12 = vpop.eup %7086  ;;  %v6688_v6 = vpop.f32.mrf.mxu1 }
 0xbf3   : > { %4228 = vmatmul.mubr.bf16.vlgmr.msra.gmra.mxu0 %v4139_v35  ;;  %v9343_v34 = vadd.f32 %v7087_v12, %v7085_v27  ;;  %v4442_v41 = vpack.c.bf16 %v4435_v59, %v4434_v0  ;;  %v4440_v9 = vmul.f32 %v6688_v6, %v10372_v10  ;;  %v7242_v35 = vld [vmem:[%s9850_s8 + $0x28] sm:$0xff]  }
 0xbf4   : > { %4235 = vmatprep.mubr.bf16.mxu0 %v4142_v13  ;;  %6691 = vmatpush3.bf16.msra.mxu0 %v10355_v46  ;;  %v4419_v24 = vpop.f32.mrf.mxu1  ;;  %v10375_v46 = vld [vmem:[#allocation32_spill] sm:$0xff]  ;;  %v10376_v13 = vld [vmem:[#allocation33_spill] sm:$0xff] }
 0xbf5   : > { %v7089_v43 = vpop.eup %7088  ;;  %6692 = vmatprep.subr.bf16.mxu0 %v10356_v44  ;;  %v4438_v36 = vmul.f32 %v10368_v63, %v4419_v24 }
 0xbf6   : > { %v7091_v3 = vpop.eup %7090  ;;  %v4143_v42 = vpack.c.bf16 %v7089_v43, %v7085_v27  ;;  %v6689_v48 = vpop.f32.mrf.mxu1  ;;  %v10374_v27 = vld [vmem:[#allocation84_spill] sm:$0xff] }
 0xbf7   : > { %v9347_v38 = vadd.f32 %v7091_v3, %v7089_v43  ;;  %v4144_v39 = vpack.c.bf16 %v7091_v3, %v7087_v12  ;;  %v4441_v22 = vmul.f32 %v6689_v48, %v10371_v58  ;;  %v7243_v12 = vld [vmem:[%s9850_s8 + $0x20] sm:$0xff]   ;;  %v10378_v3 = vld [vmem:[#allocation35_spill] sm:$0xff] }
 0xbf8   : > { %6693 = vmatpush3.bf16.msra.mxu0 %v10356_v44  ;;  %v4422_v49 = vpop.f32.mrf.mxu1  ;;  %v10377_v43 = vld [vmem:[#allocation34_spill] sm:$0xff]  ;;  %v7245_v44 = vld [vmem:[%s9850_s8 + $0x10] sm:$0xff]  }
 0xbf9   : > { %v7093_v28 = vpop.eup %7092  ;;  %6694 = vmatprep.subr.bf16.mxu0 %v10357_v14  ;;  %v4439_v53 = vmul.f32 %v10366_v25, %v4422_v49  ;;  %v4445_v5 = vpack.c.bf16 %v4441_v22, %v4440_v9 }
 0xbfa   : > { %v7095_v2 = vpop.eup %7094 }
 0xbfb   : > { %4236 = vmatmul.mubr.bf16.gmra.mxu0 %v4141_v4  ;;  %v9351_v62 = vadd.f32 %v7095_v2, %v7093_v28  ;;  %v4444_v7 = vpack.c.bf16 %v4439_v53, %v4438_v36  ;;  %v7247_v4 = vld [vmem:[%s9850_s8] sm:$0xff]  }
 0xbfc   : > { %4243 = vmatprep.mubr.bf16.mxu0 %v4144_v39  ;;  %6695 = vmatpush3.bf16.msra.mxu0 %v10357_v14  ;;  %v4773_v14 = vpop.permute.xlu1 %4772  ;;  %v4757_v39 = vpop.permute.xlu0 %4756 }
 0xbfd   : > { %v7097_v61 = vpop.eup %7096  ;;  %6696 = vmatprep.subr.bf16.mxu0 %v10358_v8  ;;  %v4796_v16 = vsel %vm1358_vm1, %v4757_v39, 0 }
 0xbfe   : > { %v7099_v11 = vpop.eup %7098  ;;  %v4145_v37 = vpack.c.bf16 %v7097_v61, %v7093_v28  ;;  %v10379_v28 = vld [vmem:[#allocation36_spill] sm:$0xff] }
 0xbff   : > { %v9355_v55 = vadd.f32 %v7099_v11, %v7097_v61  ;;  %v4146_v15 = vpack.c.bf16 %v7099_v11, %v7095_v2  ;;  %v10380_v2 = vld [vmem:[#allocation37_spill] sm:$0xff]  ;;  %v10381_v61 = vld [vmem:[#allocation92_spill] sm:$0xff]  ;;  %v10382_v11 = vld [vmem:[#allocation10_spill] sm:$0xff] }
 0xc00   : > { %6697 = vmatpush3.bf16.msra.mxu0 %v10358_v8  ;;  %v4771_v8 = vpop.permute.xlu1 %4770  ;;  %v4755_v6 = vpop.permute.xlu0 %4754 }
 0xc01   : > { %6698 = vmatprep.subr.bf16.mxu0 %v10359_v30 }
 0xc03   : > { %4244 = vmatmul.mubr.bf16.gmra.mxu0 %v4143_v42  ;;  %v4793_v42 = vsel %vm1358_vm1, %v4755_v6, 0 }
 0xc04   : > { %4251 = vmatprep.mubr.bf16.mxu0 %v4146_v15  ;;  %6699 = vmatpush3.bf16.msra.mxu0 %v10359_v30  ;;  %v10383_v30 = vld [vmem:[#allocation11_spill] sm:$0xff]  ;;  %v4769_v15 = vpop.permute.xlu1 %4768  ;;  %v4753_v24 = vpop.permute.xlu0 %4752 }
 0xc05   : > { %6700 = vmatprep.subr.bf16.mxu0 %v10360_v56 }
 0xc08   : > { %6701 = vmatpush3.bf16.msra.mxu0 %v10360_v56  ;;  %v4790_v56 = vsel %vm1358_vm1, %v4753_v24, 0  ;;  %v4767_v33 = vpop.permute.xlu1 %4766  ;;  %v4751_v59 = vpop.permute.xlu0 %4750 }
 0xc09   : > { %6702 = vmatprep.subr.bf16.mxu0 %v10363_v40  ;;  %v4787_v48 = vsel %vm1358_vm1, %v4751_v59, 0  ;;  %v10386_v59 = vld [vmem:[#allocation71_spill] sm:$0xff] }
 0xc0b   : > { %4252 = vmatmul.mubr.bf16.gmra.mxu0 %v4145_v37 }
 0xc0c   : > { %6703 = vmatpush3.bf16.msra.mxu0 %v10363_v40  ;;  %6706 = vmatprep.mubr.bf16.mxu0 %v4442_v41  ;;  %v4765_v31 = vpop.permute.xlu1 %4764  ;;  %v4749_v0 = vpop.permute.xlu0 %4748 }
 0xc0d   : > { %6704 = vmatprep.subr.bf16.mxu0 %v10365_v1  ;;  %v4784_v37 = vsel %vm1358_vm1, %v4749_v0, 0 }
 0xc10   : > { %6705 = vmatpush3.bf16.msra.mxu0 %v10365_v1  ;;  %v4763_v40 = vpop.permute.xlu1 %4762  ;;  %v4747_v41 = vpop.permute.xlu0 %4746 }
 0xc11   : > { %6866 = vmatprep.subr.msk.bf16.mxu0 %vm1358_vm1, %v10369_v18  ;;  %v4781_v49 = vsel %vm1358_vm1, %v4747_v41, 0 }
 0xc13   : > { %6707 = vmatmul.mubr.bf16.vlgmr.msra.gmra.mxu0 %v4443_v50 }
 0xc14   : > { %6710 = vmatprep.mubr.bf16.mxu0 %v4444_v7  ;;  %6715 = vmatpush3.bf16.xpose.msra.mxu0 %v10370_v54  ;;  %v4761_v19 = vpop.permute.xlu1 %4760  ;;  %v4745_v47 = vpop.permute.xlu0 %4744 }
 0xc15   : > { %6867 = vmatprep.subr.msk.bf16.mxu0 %vm1358_vm1, %v7241_v26  ;;  %v4778_v1 = vsel %vm1358_vm1, %v4745_v47, 0  ;;  %v7248_v47 = vld [vmem:[%s9855_s13] ss:$8 sps:$4 sm:$0xff]  }
 0xc18   : > { %v4759_v25 = vpop.permute.xlu1 %4758  ;;  %v4743_v53 = vpop.permute.xlu0 %4742 }
 0xc19   : > { %v4775_v51 = vsel %vm1358_vm1, %v4743_v53, 0 }
 0xc1b   : > { %6711 = vmatmul.mubr.bf16.gmra.mxu0 %v4445_v5 }
 0xc1c   : > { %6717 = vmatpush3.bf16.xpose.msra.mxu0 %v10373_v17  ;;  %6730 = vmatprep.mubr.msk.bf16.mxu0 %vm1358_vm1, %v10374_v27 }
 0xc1d   : > { %6868 = vmatprep.subr.msk.bf16.mxu0 %vm1358_vm1, %v7242_v35 }
 0xc24   : > { %6719 = vmatpush3.bf16.xpose.msra.mxu0 %v10375_v46 }
 0xc25   : > { %6869 = vmatprep.subr.msk.bf16.mxu0 %vm1358_vm1, %v7243_v12 }
 0xc2c   : > { %6721 = vmatpush3.bf16.xpose.msra.mxu0 %v10376_v13 }
 0xc2d   : > { %6870 = vmatprep.subr.msk.bf16.mxu0 %vm1358_vm1, %v7244_v45 }
 0xc34   : > { %6723 = vmatpush3.bf16.xpose.msra.mxu0 %v10377_v43 }
 0xc35   : > { %6871 = vmatprep.subr.msk.bf16.mxu0 %vm1358_vm1, %v7245_v44 }
 0xc3c   : > { %6725 = vmatpush3.bf16.xpose.msra.mxu0 %v10378_v3 }
 0xc3d   : > { %6872 = vmatprep.subr.msk.bf16.mxu0 %vm1358_vm1, %v7246_v32 }
 0xc44   : > { %6727 = vmatpush3.bf16.xpose.msra.mxu0 %v10379_v28 }
 0xc45   : > { %6873 = vmatprep.subr.msk.bf16.mxu0 %vm1358_vm1, %v7247_v4 }
 0xc4c   : > { %6729 = vmatpush3.bf16.xpose.msra.mxu0 %v10380_v2 }
 0xc4d   : > { %6874 = vmatprep.subr.msk.bf16.mxu0 %vm1358_vm1, %v4773_v14 }
 0xc53   : > { %6731 = vmatmul.mubr.msk.bf16.vlgmr.msra.gmra.mxu0 %vm1358_vm1, %v10381_v61 }
 0xc54   : > { %6734 = vmatprep.mubr.msk.bf16.mxu0 %vm1358_vm1, %v10382_v11  ;;  %6211 = vmatpush3.bf16.xpose.msra.mxu0 %v4796_v16 }
 0xc55   : > { %6875 = vmatprep.subr.msk.bf16.mxu0 %vm1358_vm1, %v4771_v8 }
 0xc5b   : > { %6735 = vmatmul.mubr.msk.bf16.gmra.mxu0 %vm1358_vm1, %v10383_v30 }
 0xc5c   : > { %6213 = vmatpush3.bf16.xpose.msra.mxu0 %v4793_v42  ;;  %6226 = vmatprep.mubr.msk.bf16.mxu0 %vm1358_vm1, %v10374_v27 }
 0xc5d   : > { %6876 = vmatprep.subr.msk.bf16.mxu0 %vm1358_vm1, %v4769_v15 }
 0xc64   : > { %6215 = vmatpush3.bf16.xpose.msra.mxu0 %v4790_v56  ;;  %v10385_v56 = vld [vmem:[#allocation70_spill] sm:$0xff] }
 0xc65   : > { %6877 = vmatprep.subr.msk.bf16.mxu0 %vm1358_vm1, %v4767_v33 }
 0xc6c   : > { %6217 = vmatpush3.bf16.xpose.msra.mxu0 %v4787_v48 }
 0xc6d   : > { %6878 = vmatprep.subr.msk.bf16.mxu0 %vm1358_vm1, %v4765_v31  ;;  %v10387_v31 = vld [vmem:[#allocation72_spill] sm:$0xff] }
 0xc74   : > { %6219 = vmatpush3.bf16.xpose.msra.mxu0 %v4784_v37 }
 0xc75   : > { %6879 = vmatprep.subr.msk.bf16.mxu0 %vm1358_vm1, %v4763_v40 }
 0xc7c   : > { %6221 = vmatpush3.bf16.xpose.msra.mxu0 %v4781_v49 }
 0xc7d   : > { %6880 = vmatprep.subr.msk.bf16.mxu0 %vm1358_vm1, %v4761_v19 }
 0xc84   : > { %6223 = vmatpush3.bf16.xpose.msra.mxu0 %v4778_v1  ;;  %v10388_v1 = vld [vmem:[#allocation73_spill] sm:$0xff] }
 0xc85   : > { %6881 = vmatprep.subr.msk.bf16.mxu0 %vm1358_vm1, %v4759_v25 }
 0xc8c   : > { %6225 = vmatpush3.bf16.xpose.msra.mxu0 %v4775_v51  ;;  %v7249_v51 = vld [vmem:[%s9856_s14 + $0x4] ss:$8 sps:$4 sm:$0xff]  }
 0xc93   : > { %6227 = vmatmul.mubr.msk.bf16.vlgmr.msra.gmra.mxu0 %vm1358_vm1, %v10374_v27 }
 0xc94   : > { %6228 = vmatprep.mubr.msk.bf16.mxu0 %vm1358_vm1, %v10381_v61 }
 0xc9b   : > { %6229 = vmatmul.mubr.msk.bf16.gmra.mxu0 %vm1358_vm1, %v10381_v61 }
 0xc9c   : > { %6230 = vmatprep.mubr.msk.bf16.mxu0 %vm1358_vm1, %v10382_v11 }
 0xca3   : > { %6231 = vmatmul.mubr.msk.bf16.gmra.mxu0 %vm1358_vm1, %v10382_v11 }
 0xca4   : > { %6232 = vmatprep.mubr.msk.bf16.mxu0 %vm1358_vm1, %v10383_v30 }
 0xcab   : > { %6233 = vmatmul.mubr.msk.bf16.gmra.mxu0 %vm1358_vm1, %v10383_v30  ;;  %v10384_v30 = vld [vmem:[#allocation69_spill] sm:$0xff] }
 0xcb3   : > { %v6138_v52 = vpop.f32.mrf.mxu0 }
 0xcb5   : > { %v6139_v63 = vpop.f32.mrf.mxu0 }
 0xcb6   : > { %v9452_v36 = vadd.f32 %v6139_v63, %v6138_v52  ;;  %v10389_v52 = vld [vmem:[#allocation74_spill] sm:$0xff] }
 0xcb7   : > { %v6141_v50 = vpop.f32.mrf.mxu0 }
 0xcb9   : > { %v6142_v18 = vpop.f32.mrf.mxu0 }
 0xcba   : > { %v9454_v7 = vadd.f32 %v6142_v18, %v6141_v50  ;;  %v10390_v50 = vld [vmem:[#allocation75_spill] sm:$0xff] }
 0xcbb   : > { %v6144_v54 = vpop.f32.mrf.mxu0 }
 0xcbd   : > { %v6145_v58 = vpop.f32.mrf.mxu0 }
 0xcbe   : > { %v9456_v22 = vadd.f32 %v6145_v58, %v6144_v54  ;;  %v10391_v54 = vld [vmem:[#allocation76_spill] sm:$0xff] }
 0xcbf   : > { %v6147_v26 = vpop.f32.mrf.mxu0 }
 0xcc1   : > { %v6148_v10 = vpop.f32.mrf.mxu0 }
 0xcc2   : > { %v9458_v9 = vadd.f32 %v6148_v10, %v6147_v26 }
 0xcc3   : > { %v6150_v5 = vpop.f32.mrf.mxu0 }
 0xcc5   : > { %v6151_v17 = vpop.f32.mrf.mxu0 }
 0xcc6   : > { %v9460_v27 = vadd.f32 %v6151_v17, %v6150_v5  ;;  %v10392_v5 = vmov 0  }
 0xcc7   : > { %v6153_v35 = vpop.f32.mrf.mxu0 }
 0xcc9   : > { %v6154_v46 = vpop.f32.mrf.mxu0 }
 0xcca   : > { %v9462_v12 = vadd.f32 %v6154_v46, %v6153_v35  ;;  %v5135_v35 = vpop.permute.xlu0 %5134  ;;  %v7250_v46 = vld [vmem:[%s9856_s14] ss:$8 sps:$4 sm:$0xff]  }
 0xccb   : > { %v6156_v13 = vpop.f32.mrf.mxu0 }
 0xccd   : > { %v6157_v45 = vpop.f32.mrf.mxu0 }
 0xcce   : > { %v9464_v43 = vadd.f32 %v6157_v45, %v6156_v13 }
 0xccf   : > { %v6159_v44 = vpop.f32.mrf.mxu0 }
 0xcd1   : > { %v6160_v3 = vpop.f32.mrf.mxu0 }
 0xcd2   : > { %v9466_v32 = vadd.f32 %v6160_v3, %v6159_v44  ;;  %v5119_v3 = vpop.permute.xlu1 %5118 }
 0xcd3   : > { %v6708_v28 = vpop.f32.mrf.mxu0 }
 0xcd5   : > { %v4480_v4 = vpop.f32.mrf.mxu0 }
 0xcd7   : > { %v6709_v14 = vpop.f32.mrf.mxu0 }
 0xcd8   : > { %v4654_v13 = vpack.c.bf16 %v6709_v14, %v6708_v28 }
 0xcd9   : > { %v4483_v2 = vpop.f32.mrf.mxu0 }
 0xcda   : > { %v4653_v17 = vpack.c.bf16 %v4483_v2, %v4480_v4  ;;  %v5133_v4 = vpop.permute.xlu0 %5132 }
 0xcdb   : > { %v6712_v39 = vpop.f32.mrf.mxu0 }
 0xcdd   : > { %v4496_v16 = vpop.f32.mrf.mxu0 }
 0xcde   : > { %v5131_v14 = vpop.permute.xlu0 %5130 }
 0xcdf   : > { %v6713_v61 = vpop.f32.mrf.mxu0 }
 0xce0   : > { %v4656_v44 = vpack.c.bf16 %v6713_v61, %v6712_v39 }
 0xce1   : > { %v4499_v8 = vpop.f32.mrf.mxu0 }
 0xce2   : > { %v4655_v45 = vpack.c.bf16 %v4499_v8, %v4496_v16  ;;  %v5129_v39 = vpop.permute.xlu0 %5128 }
 0xd13   : > { %v6732_v11 = vpop.f32.mrf.mxu0 }
 0xd14   : > { %v4578_v0 = vmul.f32 %v6732_v11, %v10387_v31 }
 0xd15   : > { %v4545_v6 = vpop.f32.mrf.mxu0 }
 0xd16   : > { %v4576_v33 = vmul.f32 %v10385_v56, %v4545_v6  ;;  %v5117_v6 = vpop.permute.xlu1 %5116 }
 0xd17   : > { %v6733_v42 = vpop.f32.mrf.mxu0 }
 0xd18   : > { %v4579_v15 = vmul.f32 %v6733_v42, %v10384_v30 }
 0xd19   : > { %v4548_v24 = vpop.f32.mrf.mxu0 }
 0xd1a   : > { %v4577_v48 = vmul.f32 %v10386_v59, %v4548_v24  ;;  %v4585_v41 = vpack.c.bf16 %v4579_v15, %v4578_v0  ;;  %v5115_v16 = vpop.permute.xlu1 %5114 }
 0xd1b   : > { %v6736_v37 = vpop.f32.mrf.mxu0 }
 0xd1c   : > { %v4584_v40 = vpack.c.bf16 %v4577_v48, %v4576_v33  ;;  %v4582_v58 = vmul.f32 %v6736_v37, %v10391_v54  ;;  %v5127_v33 = vpop.permute.xlu0 %5126 }
 0xd1d   : > { %v4561_v49 = vpop.f32.mrf.mxu0 }
 0xd1e   : > { %6754 = vmatprep.mubr.bf16.mxu1 %v4584_v40  ;;  %v4580_v63 = vmul.f32 %v10389_v52, %v4561_v49  ;;  %v5113_v8 = vpop.permute.xlu1 %5112 }
 0xd1f   : > { %v6737_v19 = vpop.f32.mrf.mxu0  ;;  %6755 = vmatmul.mubr.bf16.vlgmr.msra.gmra.mxu1 %v4585_v41 }
 0xd20   : > { %4684 = vmatpush1.bf16.msra.mxu1 %v7248_v47  ;;  %v4583_v25 = vmul.f32 %v6737_v19, %v10388_v1  ;;  %v5125_v0 = vpop.permute.xlu0 %5124 }
 0xd21   : > { %v4564_v53 = vpop.f32.mrf.mxu0  ;;  %4925 = vmatprep.subr.bf16.mxu1 %v7249_v51 }
 0xd22   : > { %v4581_v18 = vmul.f32 %v10390_v50, %v4564_v53  ;;  %v4587_v10 = vpack.c.bf16 %v4583_v25, %v4582_v58  ;;  %v5111_v48 = vpop.permute.xlu1 %5110 }
 0xd24   : > { %v4586_v26 = vpack.c.bf16 %v4581_v18, %v4580_v63  ;;  %v5123_v40 = vpop.permute.xlu0 %5122 }
 0xd26   : > { %6758 = vmatprep.mubr.bf16.mxu1 %v4586_v26  ;;  %v5109_v37 = vpop.permute.xlu1 %5108 }
 0xd27   : > { %6759 = vmatmul.mubr.bf16.gmra.mxu1 %v4587_v10 }
 0xd28   : > { %4701 = vmatprep.mubr.bf16.mxu1 %v10392_v5 }
 0xd2a   : > { %v5107_v49 = vpop.permute.xlu1 %5106 }
 0xd2f   : > { %5711 = vmatmul.mubr.msk.bf16.vlgmr.msra.gmra.mxu1 %vm1358_vm1, %v4653_v17 }
 0xd30   : > { %4926 = vmatpush1.bf16.msra.mxu1 %v7250_v46  ;;  %4711 = vmatprep.mubr.bf16.mxu1 %v10392_v5 }
 0xd31   : > { %6234 = vmatprep.subr.bf16.mxu1 %v5135_v35 }
 0xd37   : > { %5712 = vmatmul.mubr.msk.bf16.gmra.mxu1 %vm1358_vm1, %v4654_v13 }
 0xd38   : > { %4721 = vmatprep.mubr.bf16.mxu1 %v10392_v5 }
 0xd3f   : > { %5713 = vmatmul.mubr.msk.bf16.gmra.mxu1 %vm1358_vm1, %v4655_v45 }
 0xd40   : > { %4731 = vmatprep.mubr.bf16.mxu1 %v10392_v5 }
 0xd47   : > { %5714 = vmatmul.mubr.msk.bf16.gmra.mxu1 %vm1358_vm1, %v4656_v44 }
 0xd48   : > { %4943 = vmatprep.mubr.bf16.mxu1 %v10392_v5 }
 0xd53   : > { %v4856_v50 = vpop.f32.mrf.mxu0 }
 0xd55   : > { %v4858_v54 = vpop.f32.mrf.mxu0 }
 0xd57   : > { %v4860_v26 = vpop.f32.mrf.mxu0 }
 0xddf   : > { %v6756_v2 = vpop.f32.mrf.mxu1 }
 0xde1   : > { %v4622_v11 = vpop.f32.mrf.mxu1 }
 0xde3   : > { %v6757_v28 = vpop.f32.mrf.mxu1 }
 0xde4   : > { %v4896_v24 = vpack.c.bf16 %v6757_v28, %v6756_v2 }
 0xde5   : > { %v4625_v42 = vpop.f32.mrf.mxu1 }
 0xde6   : > { %v4895_v30 = vpack.c.bf16 %v4625_v42, %v4622_v11 }
 0xde7   : > { %v6760_v15 = vpop.f32.mrf.mxu1 }
 0xde8   : > { %5719 = vmatmul.mubr.msk.bf16.vlgmr.msra.gmra.mxu1 %vm1358_vm1, %v4895_v30 }
 0xde9   : > { %6235 = vmatpush3.bf16.msra.mxu1 %v5119_v3  ;;  %4953 = vmatprep.mubr.bf16.mxu1 %v10392_v5  ;;  %v4638_v61 = vpop.f32.mrf.mxu1 }
 0xdea   : > { %6236 = vmatprep.subr.bf16.mxu1 %v5133_v4 }
 0xdeb   : > { %v6761_v56 = vpop.f32.mrf.mxu1 }
 0xdec   : > { %v4898_v41 = vpack.c.bf16 %v6761_v56, %v6760_v15 }
 0xded   : > { %6237 = vmatpush3.bf16.msra.mxu1 %v5117_v6  ;;  %v4641_v59 = vpop.f32.mrf.mxu1 }
 0xdee   : > { %6238 = vmatprep.subr.bf16.mxu1 %v5131_v14  ;;  %v4897_v31 = vpack.c.bf16 %v4641_v59, %v4638_v61 }
 0xdef   : > { %v4703_v19 = vpop.f32.mrf.mxu1 }
 0xdf0   : > { %5720 = vmatmul.mubr.msk.bf16.gmra.mxu1 %vm1358_vm1, %v4896_v24  ;;  %v4857_v28 = vadd.f32 %v4856_v50, %v4703_v19 }
 0xdf1   : > { %6239 = vmatpush3.bf16.msra.mxu1 %v5115_v16  ;;  %4963 = vmatprep.mubr.bf16.mxu1 %v10392_v5  ;;  %v4705_v47 = vpop.f32.mrf.mxu1 }
 0xdf2   : > { %6240 = vmatprep.subr.bf16.mxu1 %v5129_v39  ;;  %v4859_v14 = vadd.f32 %v4858_v54, %v4705_v47 }
 0xdf3   : > { %v4707_v1 = vpop.f32.mrf.mxu1 }
 0xdf4   : > { %v4861_v61 = vadd.f32 %v4860_v26, %v4707_v1 }
 0xdf5   : > { %6241 = vmatpush3.bf16.msra.mxu1 %v5113_v8  ;;  %v4709_v25 = vpop.f32.mrf.mxu1 }
 0xdf6   : > { %6242 = vmatprep.subr.bf16.mxu1 %v5127_v33 }
 0xdf7   : > { %v4713_v53 = vpop.f32.mrf.mxu1 }
 0xdf8   : > { %5721 = vmatmul.mubr.msk.bf16.gmra.mxu1 %vm1358_vm1, %v4897_v31 }
 0xdf9   : > { %6243 = vmatpush3.bf16.msra.mxu1 %v5111_v48  ;;  %4973 = vmatprep.mubr.bf16.mxu1 %v10392_v5  ;;  %v4715_v51 = vpop.f32.mrf.mxu1  ;;  %v4862_v5 = vpop.f32.mrf.mxu0 }
 0xdfa   : > { %6244 = vmatprep.subr.bf16.mxu1 %v5125_v0  ;;  %v4863_v8 = vadd.f32 %v4862_v5, %v4709_v25 }
 0xdfb   : > { %v4717_v52 = vpop.f32.mrf.mxu1  ;;  %v4866_v35 = vpop.f32.mrf.mxu0 }
 0xdfc   : > { %v4867_v0 = vadd.f32 %v4866_v35, %v4713_v53 }
 0xdfd   : > { %6245 = vmatpush3.bf16.msra.mxu1 %v5109_v37  ;;  %v4719_v63 = vpop.f32.mrf.mxu1  ;;  %v4868_v13 = vpop.f32.mrf.mxu0 }
 0xdfe   : > { %6246 = vmatprep.subr.bf16.mxu1 %v5123_v40  ;;  %v4869_v37 = vadd.f32 %v4868_v13, %v4715_v51 }
 0xdff   : > { %v4723_v18 = vpop.f32.mrf.mxu1  ;;  %v4870_v44 = vpop.f32.mrf.mxu0 }
 0xe00   : > { %5722 = vmatmul.mubr.msk.bf16.gmra.mxu1 %vm1358_vm1, %v4898_v41  ;;  %v4871_v25 = vadd.f32 %v4870_v44, %v4717_v52 }
 0xe01   : > { %6247 = vmatpush3.bf16.msra.mxu1 %v5107_v49  ;;  %v4725_v58 = vpop.f32.mrf.mxu1  ;;  %v4872_v4 = vpop.f32.mrf.mxu0 }
 0xe02   : > { %v4873_v50 = vadd.f32 %v4872_v4, %v4719_v63 }
 0xe03   : > { %v4727_v10 = vpop.f32.mrf.mxu1  ;;  %v4876_v11 = vpop.f32.mrf.mxu0 }
 0xe04   : > { %v4877_v13 = vadd.f32 %v4876_v11, %v4723_v18 }
 0xe05   : > { %v4729_v17 = vpop.f32.mrf.mxu1  ;;  %v4878_v16 = vpop.f32.mrf.mxu0 }
 0xe07   : > { %v4733_v46 = vpop.f32.mrf.mxu1  ;;  %v4880_v48 = vpop.f32.mrf.mxu0 }
 0xe08   : > { %v4881_v4 = vadd.f32 %v4880_v48, %v4727_v10 }
 0xe09   : > { %v4735_v45 = vpop.f32.mrf.mxu1  ;;  %v4882_v47 = vpop.f32.mrf.mxu0 }
 0xe0b   : > { %v9501_v3 = vpop.f32.mrf.mxu1  ;;  %v4886_v51 = vpop.f32.mrf.mxu0 }
 0xe0d   : > { %v9503_v2 = vpop.f32.mrf.mxu1  ;;  %v4888_v63 = vpop.f32.mrf.mxu0 }
 0xea8   : > { %v4945_v6 = vpop.f32.mrf.mxu1 }
 0xea9   : > { %v9505_v30 = vadd.f32 %v4945_v6, %v4857_v28  ;;  %v4879_v6 = vadd.f32 %v4878_v16, %v4725_v58  ;;  %v4890_v58 = vpop.f32.mrf.mxu0  ;;  %v4887_v16 = vadd.f32 %v4886_v51, %v4733_v46  ;;  %v10398_v51 = vld [vmem:[#allocation110_spill] sm:$0xff] }
 0xeaa   : > { %v4947_v42 = vpop.f32.mrf.mxu1 }
 0xeab   : > { %v9507_v15 = vadd.f32 %v4947_v42, %v4859_v14 }
 0xeac   : > { %v4949_v39 = vpop.f32.mrf.mxu1 }
 0xead   : > { %v5000_v24 = vmax.f32 %v9505_v30, %v9507_v15  ;;  %v9511_v33 = vadd.f32 %v4949_v39, %v4861_v61  ;;  %v4883_v39 = vadd.f32 %v4882_v47, %v4729_v17  ;;  %v4892_v17 = vpop.f32.mrf.mxu0 }
 0xeae   : > { %v4951_v56 = vpop.f32.mrf.mxu1 }
 0xeaf   : > { %v9513_v59 = vadd.f32 %v4951_v56, %v4863_v8  ;;  %5001 = vmax.xlane.f32.xlu0 %v5000_v24  ;;  %v4889_v56 = vadd.f32 %v4888_v63, %v4735_v45 }
 0xeb0   : > { %v4955_v31 = vpop.f32.mrf.mxu1 }
 0xeb1   : > { %v5003_v40 = vmax.f32 %v9511_v33, %v9513_v59  ;;  %v9517_v49 = vadd.f32 %v4955_v31, %v4867_v0 }
 0xeb2   : > { %v4957_v41 = vpop.f32.mrf.mxu1 }
 0xeb3   : > { %v9519_v19 = vadd.f32 %v4957_v41, %v4869_v37  ;;  %5004 = vmax.xlane.f32.xlu1 %v5003_v40  ;;  %v4891_v40 = vadd.f32 %v4890_v58, %v9501_v3  ;;  %v4893_v41 = vadd.f32 %v4892_v17, %v9503_v2  ;;  %v10393_v3 = vld [vmem:[#allocation19_spill] sm:$0xff]  ;;  %v10394_v2 = vld [vmem:[#allocation45_spill] sm:$0xff] }
 0xeb4   : > { %v4959_v1 = vpop.f32.mrf.mxu1 }
 0xeb5   : > { %v5006_v54 = vmax.f32 %v9517_v49, %v9519_v19  ;;  %v9523_v5 = vadd.f32 %v4959_v1, %v4871_v25 }
 0xeb6   : > { %v4961_v26 = vpop.f32.mrf.mxu1 }
 0xeb7   : > { %v9525_v53 = vadd.f32 %v4961_v26, %v4873_v50  ;;  %5007 = vmax.xlane.f32.xlu0 %v5006_v54  ;;  %v10395_v50 = vld [vmem:[#allocation79_spill] sm:$0xff]  ;;  %v10396_v54 = vld [vmem:[#allocation46_spill] sm:$0xff] }
 0xeb8   : > { %v4965_v35 = vpop.f32.mrf.mxu1  ;;  %v10397_v26 = vld [vmem:[#allocation106_spill] sm:$0xff] }
 0xeb9   : > { %v5009_v28 = vmax.f32 %v9523_v5, %v9525_v53  ;;  %v9529_v42 = vadd.f32 %v4965_v35, %v4877_v13  ;;  %v10399_v35 = vld [vmem:[#allocation77_spill] sm:$0xff]  ;;  %v10408_v13 = vld [vmem:[#allocation26_spill] sm:$0xff] }
 0xeba   : > { %v4967_v14 = vpop.f32.mrf.mxu1 }
 0xebb   : > { %v9531_v52 = vadd.f32 %v4967_v14, %v4879_v6  ;;  %5010 = vmax.xlane.f32.xlu1 %v5009_v28 }
 0xebc   : > { %v4969_v44 = vpop.f32.mrf.mxu1 }
 0xebd   : > { %v5012_v61 = vmax.f32 %v9529_v42, %v9531_v52  ;;  %v9535_v24 = vadd.f32 %v4969_v44, %v4881_v4 }
 0xebe   : > { %v4971_v8 = vpop.f32.mrf.mxu1 }
 0xebf   : > { %v9537_v18 = vadd.f32 %v4971_v8, %v4883_v39  ;;  %5013 = vmax.xlane.f32.xlu0 %v5012_v61 }
 0xec0   : > { %v4975_v11 = vpop.f32.mrf.mxu1 }
 0xec1   : > { %v5015_v31 = vmax.f32 %v9535_v24, %v9537_v18  ;;  %v9541_v37 = vadd.f32 %v4975_v11, %v4887_v16 }
 0xec2   : > { %v4977_v0 = vpop.f32.mrf.mxu1 }
 0xec3   : > { %v9543_v10 = vadd.f32 %v4977_v0, %v4889_v56  ;;  %5016 = vmax.xlane.f32.xlu1 %v5015_v31 }
 0xec4   : > { %v4979_v48 = vpop.f32.mrf.mxu1 }
 0xec5   : > { %v5018_v47 = vmax.f32 %v9541_v37, %v9543_v10  ;;  %v9549_v45 = vadd.f32 %v4979_v48, %v4891_v40 }
 0xec6   : > { %v4981_v46 = vpop.f32.mrf.mxu1 }
 0xec7   : > { %v9551_v1 = vadd.f32 %v4981_v46, %v4893_v41  ;;  %5019 = vmax.xlane.f32.xlu0 %v5018_v47 }
 0xec9   : > { %v5021_v25 = vmax.f32 %v9549_v45, %v9551_v1 }
 0xecb   : > { %5022 = vmax.xlane.f32.xlu1 %v5021_v25 }
 0xedc   : > { %5104 = vrot.lane.b32.xlu1 %v10252_v60, %s7316_s23  ;;  %v10400_v60 = vld [vmem:[#allocation108_spill] sm:$0xff] }
 0xedd   : > { %5120 = vrot.lane.b32.xlu0 %v10253_v29, %s7316_s23  ;;  %v10401_v29 = vld [vmem:[#allocation25_spill] sm:$0xff] }
 0xefc   : > { %3135 = vadd.xlane.f32.xlu0 %v10393_v3 }
 0xf00   : > { %3138 = vadd.xlane.f32.xlu1 %v10394_v2  ;;  %3147 = vadd.xlane.f32.xlu0 %v10395_v50 }
 0xf04   : > { %3144 = vadd.xlane.f32.xlu1 %v10396_v54  ;;  %3150 = vadd.xlane.f32.xlu0 %v10397_v26 }
 0xf08   : > { %3156 = vadd.xlane.f32.xlu1 %v10398_v51  ;;  %3141 = vadd.xlane.f32.xlu0 %v10399_v35 }
 0xf0c   : > { %4119 = vadd.xlane.f32.xlu1 %v9332_v23  ;;  %3153 = vadd.xlane.f32.xlu0 %v10400_v60  ;;  %v10402_v23 = vld [vmem:[#allocation28_spill] sm:$0xff] }
 0xf10   : > { %4131 = vadd.xlane.f32.xlu1 %v9347_v38  ;;  %4116 = vadd.xlane.f32.xlu0 %v9328_v20  ;;  %v10403_v38 = vld [vmem:[#allocation30_spill] sm:$0xff]  ;;  %v10404_v20 = vld [vmem:[#allocation23_spill] sm:$0xff] }
 0xf14   : > { %4125 = vadd.xlane.f32.xlu1 %v9340_v21  ;;  %4128 = vadd.xlane.f32.xlu0 %v9343_v34  ;;  %v10405_v21 = vld [vmem:[#allocation24_spill] sm:$0xff]  ;;  %v10406_v34 = vld [vmem:[#allocation22_spill] sm:$0xff] }
 0xf18   : > { %4137 = vadd.xlane.f32.xlu1 %v9355_v55  ;;  %4122 = vadd.xlane.f32.xlu0 %v9336_v57  ;;  %v10407_v55 = vld [vmem:[#allocation29_spill] sm:$0xff] }
 0xf1c   : > { %4134 = vadd.xlane.f32.xlu0 %v9351_v62 }
 0xf29   : > { %3321 = vrot.lane.b32.xlu1 %v10401_v29, %s7314_s0 }
 0xf2d   : > { %3327 = vrot.lane.b32.xlu1 %v10402_v23, %s7314_s0 }
 0xf31   : > { %3329 = vrot.lane.b32.xlu1 %v10403_v38, %s7314_s0 }
 0xf32   : > { %3319 = vrot.lane.b32.xlu0 %v10404_v20, %s7314_s0 }
 0xf35   : > { %3325 = vrot.lane.b32.xlu1 %v10405_v21, %s7314_s0 }
 0xf36   : > { %3323 = vrot.lane.b32.xlu0 %v10406_v34, %s7314_s0 }
 0xf38   : > { %v5002_v57 = vpop.xlane.xlu0 %5001 }
 0xf39   : > { %v5025_v62 = vsub.f32 %v9507_v15, %v5002_v57  ;;  %3333 = vrot.lane.b32.xlu1 %v10407_v55, %s7314_s0 }
 0xf3a   : > { %3331 = vrot.lane.b32.xlu0 %v10408_v13, %s7314_s0  ;;  %s7317_s0 = smov 16  }
 0xf3b   : > { %v5042_v28 = vmul.f32 1.442695, %v5025_v62 }
 0xf3c   : > { %v5005_v6 = vpop.xlane.xlu1 %5004 }
 0xf3d   : > { %v5027_v14 = vsub.f32 %v9513_v59, %v5005_v6  ;;  %4278 = vrot.lane.b32.xlu1 %v10401_v29, %s7315_s26  ;;  %7100 = vpow2.f32 %v5042_v28  ;;  %v5026_v15 = vsub.f32 %v9511_v33, %v5005_v6  ;;  %v5024_v59 = vsub.f32 %v9505_v30, %v5002_v57 }
 0xf3e   : > { %4276 = vrot.lane.b32.xlu0 %v10404_v20, %s7315_s26 }
 0xf3f   : > { %v5046_v63 = vmul.f32 1.442695, %v5027_v14  ;;  %v5044_v8 = vmul.f32 1.442695, %v5026_v15  ;;  %v5040_v58 = vmul.f32 1.442695, %v5024_v59 }
 0xf40   : > { %v5008_v44 = vpop.xlane.xlu0 %5007 }
 0xf41   : > { %4286 = vrot.lane.b32.xlu1 %v10403_v38, %s7315_s26  ;;  %7102 = vpow2.f32 %v5046_v63  ;;  %v5029_v39 = vsub.f32 %v9519_v19, %v5008_v44  ;;  %v5028_v19 = vsub.f32 %v9517_v49, %v5008_v44 }
 0xf42   : > { %4284 = vrot.lane.b32.xlu0 %v10402_v23, %s7315_s26  ;;  %7104 = vpow2.f32 %v5044_v8 }
 0xf43   : > { %v5050_v11 = vmul.f32 1.442695, %v5029_v39  ;;  %v5048_v40 = vmul.f32 1.442695, %v5028_v19 }
 0xf44   : > { %v5011_v4 = vpop.xlane.xlu1 %5010 }
 0xf45   : > { %v5031_v61 = vsub.f32 %v9525_v53, %v5011_v4  ;;  %4282 = vrot.lane.b32.xlu1 %v10405_v21, %s7315_s26  ;;  %v5030_v30 = vsub.f32 %v9523_v5, %v5011_v4 }
 0xf46   : > { %4280 = vrot.lane.b32.xlu0 %v10406_v34, %s7315_s26 }
 0xf47   : > { %v5054_v33 = vmul.f32 1.442695, %v5031_v61  ;;  %v5052_v5 = vmul.f32 1.442695, %v5030_v30 }
 0xf48   : > { %v5014_v16 = vpop.xlane.xlu0 %5013 }
 0xf49   : > { %4290 = vrot.lane.b32.xlu1 %v10407_v55, %s7315_s26  ;;  %7106 = vpow2.f32 %v5054_v33  ;;  %v5033_v56 = vsub.f32 %v9531_v52, %v5014_v16  ;;  %v5032_v47 = vsub.f32 %v9529_v42, %v5014_v16 }
 0xf4a   : > { %4288 = vrot.lane.b32.xlu0 %v10408_v13, %s7315_s26  ;;  %7108 = vpow2.f32 %v5040_v58  ;;  %v9619_v0 = vpop.eup %7100  ;;  %s7318_s26 = smov 32  }
 0xf4b   : > { %7110 = vpow2.f32 %v5050_v11  ;;  %v5058_v52 = vmul.f32 1.442695, %v5033_v56  ;;  %v5056_v51 = vmul.f32 1.442695, %v5032_v47  ;;  %v10411_v47 = vld [vmem:[#allocation21_spill] sm:$0xff] }
 0xf4c   : > { %v5017_v53 = vpop.xlane.xlu1 %5016  ;;  %7112 = vpow2.f32 %v5052_v5 }
 0xf4d   : > { %v5035_v31 = vsub.f32 %v9537_v18, %v5017_v53  ;;  %5235 = vrot.lane.b32.xlu1 %v10401_v29, %s7316_s23  ;;  %v5034_v18 = vsub.f32 %v9535_v24, %v5017_v53 }
 0xf4e   : > { %5233 = vrot.lane.b32.xlu0 %v10404_v20, %s7316_s23  ;;  %v9623_v17 = vpop.eup %7102 }
 0xf4f   : > { %v5062_v48 = vmul.f32 1.442695, %v5035_v31  ;;  %v5097_v41 = vpack.c.bf16 %v9623_v17, %v9619_v0  ;;  %v5060_v24 = vmul.f32 1.442695, %v5034_v18  ;;  %v7105_v50 = vpop.eup %7104  ;;  %v10410_v18 = vld [vmem:[#allocation20_spill] sm:$0xff] }
 0xf50   : > { %v5020_v49 = vpop.xlane.xlu0 %5019  ;;  %v5075_v56 = vadd.f32 %v7105_v50, %v9623_v17 }
 0xf51   : > { %5243 = vrot.lane.b32.xlu1 %v10403_v38, %s7316_s23  ;;  %5184 = vmatprep.mubr.bf16.mxu1 %v5097_v41  ;;  %7114 = vpow2.f32 %v5062_v48  ;;  %v5037_v3 = vsub.f32 %v9543_v10, %v5020_v49  ;;  %v5036_v6 = vsub.f32 %v9541_v37, %v5020_v49  ;;  %v10409_v41 = vld [vmem:[#allocation49_spill] sm:$0xff] }
 0xf52   : > { %5241 = vrot.lane.b32.xlu0 %v10402_v23, %s7316_s23  ;;  %7116 = vpow2.f32 %v5048_v40 }
 0xf53   : > { %7118 = vpow2.f32 %v5058_v52  ;;  %v5066_v60 = vmul.f32 1.442695, %v5037_v3  ;;  %v5064_v15 = vmul.f32 1.442695, %v5036_v6 }
 0xf54   : > { %v5121_v46 = vpop.permute.xlu0 %5120  ;;  %v5023_v25 = vpop.xlane.xlu1 %5022  ;;  %7120 = vpow2.f32 %v5060_v24 }
 0xf55   : > { %v5039_v2 = vsub.f32 %v9551_v1, %v5023_v25  ;;  %5239 = vrot.lane.b32.xlu1 %v10405_v21, %s7316_s23  ;;  %6248 = vmatprep.subr.bf16.mxu1 %v5121_v46  ;;  %v5038_v57 = vsub.f32 %v9549_v45, %v5023_v25  ;;  %v10412_v46 = vld [vmem:[#allocation42_spill] sm:$0xff] }
 0xf56   : > { %5237 = vrot.lane.b32.xlu0 %v10406_v34, %s7316_s23  ;;  %v7107_v26 = vpop.eup %7106 }
 0xf57   : > { %v5070_v54 = vmul.f32 1.442695, %v5039_v2  ;;  %v7109_v35 = vpop.eup %7108  ;;  %v5068_v28 = vmul.f32 1.442695, %v5038_v57  ;;  %v10413_v2 = vld [vmem:[#allocation39_spill] sm:$0xff] }
 0xf58   : > { %v5105_v42 = vpop.permute.xlu1 %5104  ;;  %v7111_v10 = vpop.eup %7110  ;;  %v5096_v1 = vpack.c.bf16 %v7105_v50, %v7109_v35  ;;  %v5072_v19 = vadd.f32 %v7109_v35, %v9619_v0  ;;  %v10416_v35 = vld [vmem:[#allocation18_spill] sm:$0xff] }
 0xf59   : > { %5247 = vrot.lane.b32.xlu1 %v10407_v55, %s7316_s23  ;;  %6249 = vmatpush3.bf16.msra.mxu1 %v5105_v42  ;;  %7122 = vpow2.f32 %v5070_v54  ;;  %v5099_v62 = vpack.c.bf16 %v7107_v26, %v7111_v10  ;;  %v7113_v14 = vpop.eup %7112  ;;  %v10414_v54 = vld [vmem:[#allocation40_spill] sm:$0xff] }
 0xf5a   : > { %5245 = vrot.lane.b32.xlu0 %v10408_v13, %s7316_s23  ;;  %7124 = vpow2.f32 %v5056_v51  ;;  %v5081_v5 = vadd.f32 %v7113_v14, %v7107_v26  ;;  %v10415_v51 = vld [vmem:[#allocation38_spill] sm:$0xff] }
 0xf5b   : > { %7126 = vpow2.f32 %v5066_v60 }
 0xf5c   : > { %5185 = vmatmul.mubr.bf16.vlgmr.msra.gmra.mxu1 %v5096_v1  ;;  %7128 = vpow2.f32 %v5068_v28 }
 0xf5d   : > { %5192 = vmatprep.mubr.bf16.mxu1 %v5099_v62  ;;  %7130 = vpow2.f32 %v5064_v15 }
 0xf5e   : > { %v7115_v63 = vpop.eup %7114 }
 0xf5f   : > { %v7117_v44 = vpop.eup %7116 }
 0xf60   : > { %v7119_v59 = vpop.eup %7118  ;;  %v5098_v4 = vpack.c.bf16 %v7113_v14, %v7117_v44  ;;  %v5078_v53 = vadd.f32 %v7117_v44, %v7111_v10  ;;  %v10417_v14 = vld [vmem:[#allocation85_spill] sm:$0xff] }
 0xf61   : > { %v5101_v45 = vpack.c.bf16 %v7115_v63, %v7119_v59  ;;  %v7121_v39 = vpop.eup %7120 }
 0xf62   : > { %v5087_v40 = vadd.f32 %v7121_v39, %v7115_v63  ;;  %v10418_v63 = vld [vmem:[#allocation86_spill] sm:$0xff] }
 0xf63   : > { %v6031_v15 = vadd.f32 %v10418_v63, %v10417_v14 }
 0xf64   : > { %5193 = vmatmul.mubr.bf16.gmra.mxu1 %v5098_v4 }
 0xf65   : > { %5200 = vmatprep.mubr.bf16.mxu1 %v5101_v45 }
 0xf66   : > { %v7123_v61 = vpop.eup %7122 }
 0xf67   : > { %v7125_v8 = vpop.eup %7124 }
 0xf68   : > { %v7127_v33 = vpop.eup %7126  ;;  %v5100_v37 = vpack.c.bf16 %v7121_v39, %v7125_v8  ;;  %v5084_v31 = vadd.f32 %v7125_v8, %v7119_v59  ;;  %v10419_v8 = vld [vmem:[#allocation89_spill] sm:$0xff] }
 0xf69   : > { %v5103_v58 = vpack.c.bf16 %v7123_v61, %v7127_v33  ;;  %v7129_v11 = vpop.eup %7128 }
 0xf6a   : > { %v7131_v30 = vpop.eup %7130  ;;  %v5093_v3 = vadd.f32 %v7129_v11, %v7123_v61 }
 0xf6b   : > { %v5102_v16 = vpack.c.bf16 %v7129_v11, %v7131_v30  ;;  %v5090_v48 = vadd.f32 %v7131_v30, %v7127_v33 }
 0xf6c   : > { %5201 = vmatmul.mubr.bf16.gmra.mxu1 %v5100_v37 }
 0xf6d   : > { %5208 = vmatprep.mubr.bf16.mxu1 %v5103_v58 }
 0xf74   : > { %5209 = vmatmul.mubr.bf16.gmra.mxu1 %v5102_v16  ;;  %v10420_v16 = vld [vmem:[#allocation47_spill] sm:$0xff] }
 0xf79   : > { %5073 = vadd.xlane.f32.xlu0 %v5072_v19 }
 0xf7d   : > { %5079 = vadd.xlane.f32.xlu0 %v5078_v53  ;;  %5076 = vadd.xlane.f32.xlu1 %v5075_v56  ;;  %v10421_v56 = vld [vmem:[#allocation90_spill] sm:$0xff] }
 0xf81   : > { %5085 = vadd.xlane.f32.xlu0 %v5084_v31  ;;  %5082 = vadd.xlane.f32.xlu1 %v5081_v5 }
 0xf85   : > { %5091 = vadd.xlane.f32.xlu0 %v5090_v48  ;;  %v3136_v49 = vpop.xlane.xlu0 %3135  ;;  %5088 = vadd.xlane.f32.xlu1 %v5087_v40 }
 0xf89   : > { %2263 = vadd.xlane.f32.xlu0 %v10409_v41  ;;  %v3148_v52 = vpop.xlane.xlu0 %3147  ;;  %2266 = vadd.xlane.f32.xlu1 %v10410_v18  ;;  %v3139_v0 = vpop.xlane.xlu1 %3138 }
 0xf8a   : > { %7132 = vrcp.f32 %v3139_v0 }
 0xf8b   : > { %7134 = vrcp.f32 %v3148_v52  ;;  %v10422_v52 = vld [vmem:[#allocation87_spill] sm:$0xff] }
 0xf8c   : > { %7136 = vrcp.f32 %v3136_v49 }
 0xf8d   : > { %2275 = vadd.xlane.f32.xlu0 %v10411_v47  ;;  %v3151_v17 = vpop.xlane.xlu0 %3150  ;;  %2272 = vadd.xlane.f32.xlu1 %v10412_v46  ;;  %v3145_v25 = vpop.xlane.xlu1 %3144  ;;  %v10423_v47 = vld [vmem:[#allocation88_spill] sm:$0xff] }
 0xf8e   : > { %7138 = vrcp.f32 %v3151_v17 }
 0xf91   : > { %2278 = vadd.xlane.f32.xlu0 %v10413_v2  ;;  %v3142_v24 = vpop.xlane.xlu0 %3141  ;;  %5094 = vadd.xlane.f32.xlu1 %v5093_v3  ;;  %v3157_v50 = vpop.xlane.xlu1 %3156 }
 0xf92   : > { %7140 = vrcp.f32 %v3142_v24 }
 0xf93   : > { %7142 = vrcp.f32 %v3145_v25 }
 0xf95   : > { %2269 = vadd.xlane.f32.xlu0 %v10414_v54  ;;  %v3154_v26 = vpop.xlane.xlu0 %3153  ;;  %2284 = vadd.xlane.f32.xlu1 %v10415_v51  ;;  %v4120_v42 = vpop.xlane.xlu1 %4119  ;;  %v10425_v51 = vld [vmem:[#allocation95_spill] sm:$0xff] }
 0xf96   : > { %7144 = vrcp.f32 %v3154_v26 }
 0xf97   : > { %v7133_v62 = vpop.eup %7132  ;;  %7146 = vrcp.f32 %v3157_v50  ;;  %v10424_v50 = vld [vmem:[#allocation91_spill] sm:$0xff] }
 0xf98   : > { %v3304_v44 = vmul.f32 %v7133_v62, %v6031_v15  ;;  %v7135_v59 = vpop.eup %7134 }
 0xf99   : > { %2281 = vadd.xlane.f32.xlu0 %v10416_v35  ;;  %v4117_v60 = vpop.xlane.xlu0 %4116  ;;  %v4132_v10 = vpop.xlane.xlu1 %4131  ;;  %v3307_v33 = vmul.f32 %v7135_v59, %v10419_v8 }
 0xf9a   : > { %7148 = vrcp.f32 %v4117_v60  ;;  %v7137_v61 = vpop.eup %7136 }
 0xf9b   : > { %7150 = vrcp.f32 %v4120_v42  ;;  %v7139_v37 = vpop.eup %7138  ;;  %v3303_v19 = vmul.f32 %v7137_v61, %v10420_v16 }
 0xf9c   : > { %v3308_v31 = vmul.f32 %v7139_v37, %v10421_v56 }
 0xf9d   : > { %v4129_v1 = vpop.xlane.xlu0 %4128  ;;  %v4126_v57 = vpop.xlane.xlu1 %4125 }
 0xf9e   : > { %7152 = vrcp.f32 %v4129_v1 }
 0xf9f   : > { %v7141_v53 = vpop.eup %7140  ;;  %7154 = vrcp.f32 %v4132_v10 }
 0xfa0   : > { %v7143_v5 = vpop.eup %7142  ;;  %v3305_v18 = vmul.f32 %v7141_v53, %v10422_v52 }
 0xfa1   : > { %v4123_v6 = vpop.xlane.xlu0 %4122  ;;  %v4138_v28 = vpop.xlane.xlu1 %4137  ;;  %v3306_v17 = vmul.f32 %v7143_v5, %v10423_v47 }
 0xfa2   : > { %7156 = vrcp.f32 %v4123_v6 }
 0xfa3   : > { %v7145_v0 = vpop.eup %7144  ;;  %7158 = vrcp.f32 %v4126_v57 }
 0xfa4   : > { %v7147_v46 = vpop.eup %7146  ;;  %v3309_v54 = vmul.f32 %v7145_v0, %v10424_v50 }
 0xfa5   : > { %v4135_v4 = vpop.xlane.xlu0 %4134  ;;  %v3322_v45 = vpop.permute.xlu1 %3321  ;;  %v3310_v42 = vmul.f32 %v7147_v46, %v10425_v51 }
 0xfa6   : > { %v3344_v39 = vadd.f32 %v3322_v45, %v3304_v44  ;;  %7160 = vrcp.f32 %v4135_v4 }
 0xfa7   : > { %v7149_v26 = vpop.eup %7148  ;;  %7162 = vrcp.f32 %v4138_v28 }
 0xfa8   : > { %3361 = vrot.lane.b32.xlu1 %v3344_v39, %s7317_s0  ;;  %v7151_v35 = vpop.eup %7150  ;;  %v4268_v62 = vmul.f32 %v7149_v26, %v9452_v36 }
 0xfa9   : > { %v3320_v58 = vpop.permute.xlu0 %3319  ;;  %v3328_v11 = vpop.permute.xlu1 %3327  ;;  %v4269_v14 = vmul.f32 %v7151_v35, %v9454_v7  ;;  %v7000_v35 = vld [vmem:[%s9847_s5 + $0x18] sm:$0xff]  }
 0xfaa   : > { %v3347_v30 = vadd.f32 %v3328_v11, %v3307_v33  ;;  %v3343_v48 = vadd.f32 %v3320_v58, %v3303_v19  ;;  %6762 = vmatprep.subr.bf16.mxu0 %v7000_v35  ;;  %6778 = vmatprep.subr.bf16.mxu1 %v7000_v35 }
 0xfab   : > { %v7153_v6 = vpop.eup %7152  ;;  %6763 = vmatpush3.bf16.msra.mxu0 %v7000_v35  ;;  %6782 = vmatpush3.bf16.msra.mxu1 %v7000_v35 }
 0xfac   : > { %3367 = vrot.lane.b32.xlu1 %v3347_v30, %s7317_s0  ;;  %v7155_v63 = vpop.eup %7154  ;;  %v4272_v4 = vmul.f32 %v7153_v6, %v9460_v27 }
 0xfad   : > { %v3324_v40 = vpop.permute.xlu0 %3323  ;;  %v3330_v49 = vpop.permute.xlu1 %3329  ;;  %v4273_v36 = vmul.f32 %v7155_v63, %v9462_v12  ;;  %v10427_v63 = vld [vmem:[#allocation60_spill] sm:$0xff] }
 0xfae   : > { %v3348_v41 = vadd.f32 %v3330_v49, %v3308_v31  ;;  %v3345_v25 = vadd.f32 %v3324_v40, %v3305_v18 }
 0xfaf   : > { %3359 = vrot.lane.b32.xlu0 %v3343_v48, %s7317_s0  ;;  %v7157_v45 = vpop.eup %7156 }
 0xfb0   : > { %3369 = vrot.lane.b32.xlu1 %v3348_v41, %s7317_s0  ;;  %v7159_v39 = vpop.eup %7158  ;;  %v4270_v7 = vmul.f32 %v7157_v45, %v9456_v22  ;;  %v10428_v45 = vld [vmem:[#allocation64_spill] sm:$0xff] }
 0xfb1   : > { %v3332_v3 = vpop.permute.xlu0 %3331  ;;  %v3326_v2 = vpop.permute.xlu1 %3325  ;;  %v4271_v11 = vmul.f32 %v7159_v39, %v9458_v9 }
 0xfb2   : > { %v3346_v24 = vadd.f32 %v3326_v2, %v3306_v17  ;;  %v3349_v60 = vadd.f32 %v3332_v3, %v3309_v54 }
 0xfb3   : > { %3363 = vrot.lane.b32.xlu0 %v3345_v25, %s7317_s0  ;;  %v7161_v58 = vpop.eup %7160 }
 0xfb4   : > { %3365 = vrot.lane.b32.xlu1 %v3346_v24, %s7317_s0  ;;  %v7163_v30 = vpop.eup %7162  ;;  %v4274_v56 = vmul.f32 %v7161_v58, %v9464_v43 }
 0xfb5   : > { %v4277_v10 = vpop.permute.xlu0 %4276  ;;  %v3334_v1 = vpop.permute.xlu1 %3333  ;;  %v4275_v12 = vmul.f32 %v7163_v30, %v9466_v32 }
 0xfb6   : > { %v3350_v57 = vadd.f32 %v3334_v1, %v3310_v42  ;;  %v4300_v28 = vadd.f32 %v4277_v10, %v4268_v62 }
 0xfb7   : > { %3371 = vrot.lane.b32.xlu0 %v3349_v60, %s7317_s0 }
 0xfb8   : > { %3373 = vrot.lane.b32.xlu1 %v3350_v57, %s7317_s0  ;;  %s500_s0 = sand.u32 1, %s7303_s19  }
 0xfb9   : > { %v4285_v15 = vpop.permute.xlu0 %4284  ;;  %v4279_v44 = vpop.permute.xlu1 %4278  ;;  %s9802_s22 = scalar_lea.sflag [#allocation4], %s500_s0 }
 0xfba   : > { %v4301_v59 = vadd.f32 %v4279_v44, %v4269_v14  ;;  %v4304_v61 = vadd.f32 %v4285_v15, %v4272_v4  ;;  %v10426_v14 = vld [vmem:[#allocation58_spill] sm:$0xff]  ;;  %v7001_v44 = vld [vmem:[%s9847_s5 + $0x10] sm:$0xff]  }
 0xfbb   : > { %4316 = vrot.lane.b32.xlu0 %v4300_v28, %s7318_s26  ;;  %v5919_v28 = vadd.f32 %v10427_v63, %v10426_v14  ;;  %6764 = vmatprep.subr.bf16.mxu0 %v7001_v44  ;;  %v10434_v63 = vld [vmem:[#allocation82_spill] sm:$0xff] }
 0xfbc   : > { %4318 = vrot.lane.b32.xlu1 %v4301_v59, %s7318_s26  ;;  %6779 = vmatprep.subr.bf16.mxu1 %v7001_v44 }
 0xfbd   : > { %v4281_v8 = vpop.permute.xlu0 %4280  ;;  %v4287_v33 = vpop.permute.xlu1 %4286  ;;  %6765 = vmatpush3.bf16.msra.mxu0 %v7001_v44  ;;  %6783 = vmatpush3.bf16.msra.mxu1 %v7001_v44 }
 0xfbe   : > { %v4305_v37 = vadd.f32 %v4287_v33, %v4273_v36  ;;  %v4302_v27 = vadd.f32 %v4281_v8, %v4270_v7 }
 0xfbf   : > { %4324 = vrot.lane.b32.xlu0 %v4304_v61, %s7318_s26 }
 0xfc0   : > { %4326 = vrot.lane.b32.xlu1 %v4305_v37, %s7318_s26 }
 0xfc1   : > { %v4283_v16 = vpop.permute.xlu1 %4282  ;;  %v4289_v19 = vpop.permute.xlu0 %4288 }
 0xfc2   : > { %v4303_v53 = vadd.f32 %v4283_v16, %v4271_v11  ;;  %v4306_v31 = vadd.f32 %v4289_v19, %v4274_v56  ;;  %v10430_v16 = vld [vmem:[#allocation65_spill] sm:$0xff] }
 0xfc3   : > { %4320 = vrot.lane.b32.xlu0 %v4302_v27, %s7318_s26  ;;  %v10429_v27 = vld [vmem:[#allocation63_spill] sm:$0xff] }
 0xfc4   : > { %4322 = vrot.lane.b32.xlu1 %v4303_v53, %s7318_s26  ;;  %v5925_v19 = vadd.f32 %v10430_v16, %v10429_v27 }
 0xfc5   : > { %v4291_v5 = vpop.permute.xlu1 %4290  ;;  %v5234_v22 = vpop.permute.xlu0 %5233 }
 0xfc6   : > { %v4307_v48 = vadd.f32 %v4291_v5, %v4275_v12  ;;  %v7002_v12 = vld [vmem:[%s9847_s5 + $0x8] sm:$0xff]  }
 0xfc7   : > { %4328 = vrot.lane.b32.xlu0 %v4306_v31, %s7318_s26  ;;  %6766 = vmatprep.subr.bf16.mxu0 %v7002_v12 }
 0xfc8   : > { %4330 = vrot.lane.b32.xlu1 %v4307_v48, %s7318_s26  ;;  %6780 = vmatprep.subr.bf16.mxu1 %v7002_v12  ;;  %s5534_s26 = sshll.u32 %s500_s0, 6 }
 0xfc9   : > { %v9680_v40 = vpop.permute.xlu1 %5235  ;;  %v9682_v9 = vpop.permute.xlu0 %5241  ;;  %6767 = vmatpush3.bf16.msra.mxu0 %v7002_v12  ;;  %6784 = vmatpush3.bf16.msra.mxu1 %v7002_v12  ;;  %s502_s20 = scalar_lea.vmem [#allocation3], %s5534_s26  ;;  %s7320_s26 = smov [#allocation3]  }
 0xfca   : > { %s5456_s30 = sshll.u32 %s502_s20, 4  ;;  %s7255_s23 = sshll.u32 %s7320_s26, 4  ;;  %s9798_s30 = int_to_ptr.vmem [resolvable:$true] %s5456_s30  ;;  %s7256_s23 = int_to_ptr.vmem [resolvable:$false] %s7255_s23 }
 0xfcb   : > { %s7251_s29 = scalar_lea.vmem %s9798_s30, 1024  ;;  %s7257_s27 = scalar_lea.vmem %s7256_s23, 2048 }
 0xfcc   : > { %p7252_p11 = scmp.ne.s32.totalorder %s9798_s30, %s7251_s29  ;;  %p7258_p0 = scmp.lt.s32.totalorder %s9798_s30, %s7256_s23 }
 0xfcd   : > { %v9684_v49 = vpop.permute.xlu1 %5243  ;;  %v9686_v41 = vpop.permute.xlu0 %5237  ;;  %p7259_p1 = scmp.lt.s32.totalorder %s7257_s27, %s7251_s29 }
 0xfce   : > { %p7253_p12 = pnand %p7252_p11, %p7441_p5 }
 0xfcf   : > { %p7260_p2 = por %p7259_p1, %p7258_p0 }
 0xfd0   : > { %p7254_p13 = pneg %p7253_p12 }
 0xfd1   : > { %v9688_v52 = vpop.permute.xlu1 %5239  ;;  %v9690_v43 = vpop.permute.xlu0 %5245 }
 0xfd2   : > { %p7261_p3 = pnand %p7260_p2, %p7254_p13 }
 0xfd5   : > { %v9692_v18 = vpop.permute.xlu1 %5247 }
0x1002   : > { %v5074_v32 = vpop.xlane.xlu0 %5073 }
0x1003   : > { %7164 = vrcp.f32 %v5074_v32  ;;  %v10433_v32 = vld [vmem:[#allocation68_spill] sm:$0xff] }
0x1006   : > { %v5080_v0 = vpop.xlane.xlu0 %5079  ;;  %v5077_v47 = vpop.xlane.xlu1 %5076 }
0x100a   : > { %v5086_v17 = vpop.xlane.xlu0 %5085  ;;  %v5083_v46 = vpop.xlane.xlu1 %5082 }
0x100e   : > { %v9694_v25 = vpop.xlane.xlu0 %5091  ;;  %v9696_v3 = vpop.xlane.xlu1 %5088 }
0x1010   : > { %v7165_v1 = vpop.eup %7164 }
0x1012   : > { %v2264_v2 = vpop.xlane.xlu0 %2263  ;;  %v2267_v24 = vpop.xlane.xlu1 %2266 }
0x1013   : > { %7166 = vrcp.f32 %v2264_v2 }
0x1014   : > { %7168 = vrcp.f32 %v2267_v24 }
0x1015   : > { %7170 = vrcp.f32 %v5077_v47 }
0x1016   : > { %v2276_v50 = vpop.xlane.xlu0 %2275  ;;  %v2273_v54 = vpop.xlane.xlu1 %2272 }
0x1017   : > { %7172 = vrcp.f32 %v2276_v50 }
0x1018   : > { %7174 = vrcp.f32 %v2273_v54 }
0x1019   : > { %7176 = vrcp.f32 %v5080_v0 }
0x101a   : > { %v2279_v26 = vpop.xlane.xlu0 %2278  ;;  %v9698_v51 = vpop.xlane.xlu1 %5094 }
0x101b   : > { %7178 = vrcp.f32 %v2279_v26 }
0x101c   : > { %v6250_v42 = vpop.f32.mrf.mxu1  ;;  %7180 = vrcp.f32 %v5083_v46 }
0x101e   : > { %v2270_v60 = vpop.xlane.xlu0 %2269  ;;  %v6251_v10 = vpop.f32.mrf.mxu1 }
0x101f   : > { %7182 = vrcp.f32 %v2270_v60  ;;  %v6252_v57 = vadd.f32 %v6251_v10, %v6250_v42  ;;  %v2285_v62 = vpop.xlane.xlu1 %2284 }
0x1020   : > { %v7167_v6 = vpop.eup %7166  ;;  %7184 = vrcp.f32 %v2285_v62  ;;  %v6253_v15 = vpop.f32.mrf.mxu1 }
0x1021   : > { %v7169_v59 = vpop.eup %7168  ;;  %v5225_v4 = vmul.f32 %v7165_v1, %v6252_v57  ;;  %v2367_v36 = vmul.f32 %v7167_v6, %v10428_v45  ;;  %7186 = vrcp.f32 %v5086_v17 }
0x1022   : > { %v2282_v39 = vpop.xlane.xlu0 %2281  ;;  %v6254_v61 = vpop.f32.mrf.mxu1  ;;  %v2368_v8 = vmul.f32 %v7169_v59, %v5919_v28  ;;  %v10435_v28 = vld [vmem:[#allocation83_spill] sm:$0xff] }
0x1023   : > { %v7171_v33 = vpop.eup %7170  ;;  %v5257_v37 = vadd.f32 %v5234_v22, %v5225_v4  ;;  %7188 = vrcp.f32 %v2282_v39  ;;  %v6255_v7 = vadd.f32 %v6254_v61, %v6253_v15  ;;  %v3362_v58 = vpop.permute.xlu1 %3361  ;;  %v2375_v11 = vadd.f32 %v2367_v36, %v10404_v20  ;;  %v10431_v20 = vld [vmem:[#allocation66_spill] sm:$0xff]  ;;  %v10432_v22 = vld [vmem:[#allocation67_spill] sm:$0xff] }
0x1024   : > { %v7173_v30 = vpop.eup %7172  ;;  %v2376_v53 = vadd.f32 %v2368_v8, %v10401_v29  ;;  %v6256_v56 = vpop.f32.mrf.mxu1  ;;  %v5931_v0 = vadd.f32 %v10433_v32, %v10432_v22  ;;  %7190 = vrcp.f32 %v9696_v3  ;;  %v7003_v3 = vld [vmem:[%s9847_s5] sm:$0xff]   ;;  %v5937_v15 = vadd.f32 %v10435_v28, %v10434_v63 }
0x1025   : > { %v7175_v31 = vpop.eup %7174  ;;  %v5226_v5 = vmul.f32 %v7171_v33, %v6255_v7  ;;  %5273 = vrot.lane.b32.xlu0 %v5257_v37, %s7319_s17  ;;  %2383 = vst.msk [vmem:[#allocation2] sm:$0xff] %vm1358_vm1, %v2375_v11  ;;  %v2371_v48 = vmul.f32 %v7173_v30, %v10431_v20  ;;  %6768 = vmatprep.subr.bf16.mxu0 %v7003_v3  ;;  %7192 = vrcp.f32 %v9694_v25  ;;  %v10436_v4 = vld [vmem:[#allocation62_spill] sm:$0xff]  ;;  %v10437_v30 = vld [vmem:[#allocation81_spill] sm:$0xff] }
0x1026   : > { %2384 = vst.msk [vmem:[#allocation2 + $0x8] sm:$0xff] %vm1358_vm1, %v2376_v53  ;;  %v3360_v29 = vpop.permute.xlu0 %3359  ;;  %v6257_v47 = vpop.f32.mrf.mxu1  ;;  %v2370_v17 = vmul.f32 %v7175_v31, %v5925_v19  ;;  %6781 = vmatprep.subr.bf16.mxu1 %v7003_v3  ;;  %6769 = vmatpush3.bf16.msra.mxu0 %v7003_v3  ;;  %7194 = vrcp.f32 %v9698_v51 }
0x1027   : > { %v7177_v46 = vpop.eup %7176  ;;  %v5258_v2 = vadd.f32 %v9680_v40, %v5226_v5  ;;  %3385 = vst.msk [vmem:[#allocation2 + $0x8] sm:$0xff] %vm3383_vm2, %v3362_v58  ;;  %3384 = vst.msk [vmem:[#allocation2] sm:$0xff] %vm3383_vm2, %v3360_v29  ;;  %v6258_v24 = vadd.f32 %v6257_v47, %v6256_v56  ;;  %v3368_v50 = vpop.permute.xlu1 %3367  ;;  %v2379_v54 = vadd.f32 %v2371_v48, %v10402_v23  ;;  %6785 = vmatpush3.bf16.msra.mxu1 %v7003_v3 }
0x1028   : > { %v7179_v26 = vpop.eup %7178  ;;  %v6259_v42 = vpop.f32.mrf.mxu1  ;;  %v2378_v35 = vadd.f32 %v10405_v21, %v2370_v17 }
0x1029   : > { %v5227_v60 = vmul.f32 %v7177_v46, %v6258_v24  ;;  %2387 = vst.msk [vmem:[#allocation2 + $0x20] sm:$0xff] %vm1358_vm1, %v2379_v54  ;;  %5275 = vrot.lane.b32.xlu1 %v5258_v2, %s7319_s17  ;;  %v2372_v40 = vmul.f32 %v7179_v26, %v5931_v0  ;;  %v7181_v1 = vpop.eup %7180 }
0x102a   : > { %3388 = vst.msk [vmem:[#allocation2 + $0x20] sm:$0xff] %vm3383_vm2, %v3368_v50  ;;  %v3364_v10 = vpop.permute.xlu0 %3363  ;;  %v6260_v23 = vpop.f32.mrf.mxu1 }
0x102b   : > { %2386 = vst.msk [vmem:[#allocation2 + $0x18] sm:$0xff] %vm1358_vm1, %v2378_v35  ;;  %v5259_v21 = vadd.f32 %v9686_v41, %v5227_v60  ;;  %v6261_v57 = vadd.f32 %v6260_v23, %v6259_v42  ;;  %v3370_v62 = vpop.permute.xlu1 %3369  ;;  %v2380_v6 = vadd.f32 %v2372_v40, %v10403_v38 }
0x102c   : > { %v7183_v14 = vpop.eup %7182  ;;  %v6262_v44 = vpop.f32.mrf.mxu1 }
0x102d   : > { %v7185_v59 = vpop.eup %7184  ;;  %v2369_v45 = vmul.f32 %v7183_v14, %v10436_v4  ;;  %v5228_v36 = vmul.f32 %v7181_v1, %v6261_v57  ;;  %2388 = vst.msk [vmem:[#allocation2 + $0x28] sm:$0xff] %vm1358_vm1, %v2380_v6  ;;  %5277 = vrot.lane.b32.xlu0 %v5259_v21, %s7319_s17 }
0x102e   : > { %3389 = vst.msk [vmem:[#allocation2 + $0x28] sm:$0xff] %vm3383_vm2, %v3370_v62  ;;  %v3372_v41 = vpop.permute.xlu0 %3371  ;;  %v6263_v25 = vpop.f32.mrf.mxu1  ;;  %v2374_v38 = vmul.f32 %v7185_v59, %v5937_v15 }
0x102f   : > { %v7187_v39 = vpop.eup %7186  ;;  %v2377_v61 = vadd.f32 %v10406_v34, %v2369_v45  ;;  %v5260_v8 = vadd.f32 %v9688_v52, %v5228_v36  ;;  %v6264_v33 = vadd.f32 %v6263_v25, %v6262_v44  ;;  %v3366_v37 = vpop.permute.xlu1 %3365  ;;  %v5723_v45 = vld [vmem:[%s9848_s6] ss:$0 sm:$0xff] }
0x1030   : > { %v7189_v7 = vpop.eup %7188  ;;  %3387 = vst.msk [vmem:[#allocation2 + $0x18] sm:$0xff] %vm3383_vm2, %v3366_v37  ;;  %v6265_v58 = vpop.f32.mrf.mxu1  ;;  %v2382_v11 = vadd.f32 %v10407_v55, %v2374_v38 }
0x1031   : > { %2385 = vst.msk [vmem:[#allocation2 + $0x10] sm:$0xff] %vm1358_vm1, %v2377_v61  ;;  %v2373_v27 = vmul.f32 %v7189_v7, %v10437_v30  ;;  %v5229_v16 = vmul.f32 %v7187_v39, %v6264_v33  ;;  %5279 = vrot.lane.b32.xlu1 %v5260_v8, %s7319_s17  ;;  %v7191_v56 = vpop.eup %7190 }
0x1032   : > { %3386 = vst.msk [vmem:[#allocation2 + $0x10] sm:$0xff] %vm3383_vm2, %v3364_v10  ;;  %v4317_v34 = vpop.permute.xlu0 %4316  ;;  %v6266_v52 = vpop.f32.mrf.mxu1 }
0x1033   : > { %2390 = vst.msk [vmem:[#allocation2 + $0x38] sm:$0xff] %vm1358_vm1, %v2382_v11  ;;  %v2381_v51 = vadd.f32 %v10408_v13, %v2373_v27  ;;  %v5261_v19 = vadd.f32 %v9682_v9, %v5229_v16  ;;  %v6267_v55 = vadd.f32 %v6266_v52, %v6265_v58  ;;  %v3374_v53 = vpop.permute.xlu1 %3373  ;;  %v7193_v22 = vpop.eup %7192 }
0x1034   : > { %4341 = vst.msk [vmem:[#allocation2] sm:$0xff] %vm4340_vm3, %v4317_v34  ;;  %v6268_v12 = vpop.f32.mrf.mxu1 }
0x1035   : > { %3391 = vst.msk [vmem:[#allocation2 + $0x38] sm:$0xff] %vm3383_vm2, %v3374_v53  ;;  %v5230_v31 = vmul.f32 %v7191_v56, %v6267_v55  ;;  %5281 = vrot.lane.b32.xlu0 %v5261_v19, %s7319_s17 }
0x1036   : > { %2389 = vst.msk [vmem:[#allocation2 + $0x30] sm:$0xff] %vm1358_vm1, %v2381_v51  ;;  %v4325_v5 = vpop.permute.xlu0 %4324  ;;  %v6269_v20 = vpop.f32.mrf.mxu1 }
0x1037   : > { %3390 = vst.msk [vmem:[#allocation2 + $0x30] sm:$0xff] %vm3383_vm2, %v3372_v41  ;;  %v5262_v13 = vadd.f32 %v9684_v49, %v5230_v31  ;;  %v6270_v9 = vadd.f32 %v6269_v20, %v6268_v12  ;;  %v4319_v48 = vpop.permute.xlu1 %4318  ;;  %v7195_v49 = vpop.eup %7194 }
0x1038   : > { %4345 = vst.msk [vmem:[#allocation2 + $0x20] sm:$0xff] %vm4340_vm3, %v4325_v5  ;;  %4342 = vst.msk [vmem:[#allocation2 + $0x8] sm:$0xff] %vm4340_vm3, %v4319_v48  ;;  %v6271_v32 = vpop.f32.mrf.mxu1 }
0x1039   : > { %v5231_v0 = vmul.f32 %v7193_v22, %v6270_v9  ;;  %5283 = vrot.lane.b32.xlu1 %v5262_v13, %s7319_s17 }
0x103a   : > { %v4321_v29 = vpop.permute.xlu0 %4320  ;;  %v6272_v47 = vpop.f32.mrf.mxu1 }
0x103b   : > { %v5263_v17 = vadd.f32 %v9690_v43, %v5231_v0  ;;  %4343 = vst.msk [vmem:[#allocation2 + $0x10] sm:$0xff] %vm4340_vm3, %v4321_v29  ;;  %v6273_v46 = vadd.f32 %v6272_v47, %v6271_v32  ;;  %v4327_v2 = vpop.permute.xlu1 %4326 }
0x103c   : > { %4346 = vst.msk [vmem:[#allocation2 + $0x28] sm:$0xff] %vm4340_vm3, %v4327_v2 }
0x103d   : > { %v5232_v24 = vmul.f32 %v7195_v49, %v6273_v46  ;;  %5285 = vrot.lane.b32.xlu0 %v5263_v17, %s7319_s17 }
0x103e   : > { %v4329_v50 = vpop.permute.xlu0 %4328 }
0x103f   : > { %v5264_v54 = vadd.f32 %v9692_v18, %v5232_v24  ;;  %4347 = vst.msk [vmem:[#allocation2 + $0x30] sm:$0xff] %vm4340_vm3, %v4329_v50  ;;  %v4323_v26 = vpop.permute.xlu1 %4322 }
0x1040   : > { %4344 = vst.msk [vmem:[#allocation2 + $0x18] sm:$0xff] %vm4340_vm3, %v4323_v26 }
0x1041   : > { %5287 = vrot.lane.b32.xlu1 %v5264_v54, %s7319_s17 }
0x1043   : > { %v4331_v43 = vpop.permute.xlu1 %4330 }
0x1044   : > { %4348 = vst.msk [vmem:[#allocation2 + $0x38] sm:$0xff] %vm4340_vm3, %v4331_v43 }
0x1097   : > { %v5274_v42 = vpop.permute.xlu0 %5273 }
0x1098   : > { %5298 = vst.msk [vmem:[#allocation2] sm:$0xff] %vm5297_vm4, %v5274_v42 }
0x109b   : > { %v5276_v35 = vpop.permute.xlu1 %5275 }
0x109c   : > { %5299 = vst.msk [vmem:[#allocation2 + $0x8] sm:$0xff] %vm5297_vm4, %v5276_v35 }
0x109f   : > { %v5278_v3 = vpop.permute.xlu0 %5277  ;;  %v5306_v60 = vld [vmem:[#allocation2] sm:$0xff] }
0x10a0   : > { %5300 = vst.msk [vmem:[#allocation2 + $0x10] sm:$0xff] %vm5297_vm4, %v5278_v3 }
0x10a3   : > { %v5280_v18 = vpop.permute.xlu1 %5279  ;;  %v5307_v40 = vld [vmem:[#allocation2 + $0x8] sm:$0xff] }
0x10a4   : > { %5301 = vst.msk [vmem:[#allocation2 + $0x18] sm:$0xff] %vm5297_vm4, %v5280_v18  ;;  %v5314_v10 = vpack.c.bf16 %v5307_v40, %v5306_v60 }
0x10a6   : > { %6770 = vmatprep.mubr.msk.bf16.mxu0 %vm606_vm0, %v5314_v10 }
0x10a7   : > { %v5282_v23 = vpop.permute.xlu0 %5281  ;;  %v5308_v21 = vld [vmem:[#allocation2 + $0x10] sm:$0xff] }
0x10a8   : > { %5302 = vst.msk [vmem:[#allocation2 + $0x20] sm:$0xff] %vm5297_vm4, %v5282_v23 }
0x10ab   : > { %v5284_v1 = vpop.permute.xlu1 %5283  ;;  %v5309_v57 = vld [vmem:[#allocation2 + $0x18] sm:$0xff] }
0x10ac   : > { %5303 = vst.msk [vmem:[#allocation2 + $0x28] sm:$0xff] %vm5297_vm4, %v5284_v1  ;;  %v5315_v62 = vpack.c.bf16 %v5309_v57, %v5308_v21 }
0x10ae   : > { %6771 = vmatmul.mubr.msk.bf16.vlgmr.msra.gmra.mxu0 %vm606_vm0, %v5315_v62 }
0x10af   : > { %v5286_v6 = vpop.permute.xlu0 %5285  ;;  %v5310_v63 = vld [vmem:[#allocation2 + $0x20] sm:$0xff] }
0x10b0   : > { %5304 = vst.msk [vmem:[#allocation2 + $0x30] sm:$0xff] %vm5297_vm4, %v5286_v6 }
0x10b3   : > { %v5288_v14 = vpop.permute.xlu1 %5287  ;;  %v5311_v28 = vld [vmem:[#allocation2 + $0x28] sm:$0xff] }
0x10b4   : > { %5305 = vst.msk [vmem:[#allocation2 + $0x38] sm:$0xff] %vm5297_vm4, %v5288_v14  ;;  %v5316_v15 = vpack.c.bf16 %v5311_v28, %v5310_v63 }
0x10b6   : > { %6774 = vmatprep.mubr.msk.bf16.mxu1 %vm606_vm0, %v5316_v15 }
0x10b7   : > { %v5312_v44 = vld [vmem:[#allocation2 + $0x30] sm:$0xff] }
0x10bb   : > { %v5313_v59 = vld [vmem:[#allocation2 + $0x38] sm:$0xff] }
0x10bc   : > { %v5317_v4 = vpack.c.bf16 %v5313_v59, %v5312_v44 }
0x10be   : > { %6775 = vmatmul.mubr.msk.bf16.vlgmr.msra.gmra.mxu1 %vm606_vm0, %v5317_v4 }
0x116e   : > { %v6772_v36 = vpop.f32.mrf.mxu0 }
0x116f   : > { %v5412_v41 = vadd.f32 %v6772_v36, %v5723_v45 }
0x1170   : > { %v5403_v25 = vpop.f32.mrf.mxu0 }
0x1171   : > { %5436 = vst [vmem:[%s502_s20 + $0x10] sm:$0xff] %v5412_v41  ;;  %v5404_v38 = vadd.f32 %v5723_v45, %v5403_v25 }
0x1172   : > { %v6773_v39 = vpop.f32.mrf.mxu0 }
0x1173   : > { %5434 = vst [vmem:[%s502_s20] sm:$0xff] %v5404_v38  ;;  %v5415_v61 = vadd.f32 %v6773_v39, %v5723_v45 }
0x1174   : > { %v5406_v8 = vpop.f32.mrf.mxu0 }
0x1175   : > { %5437 = vst [vmem:[%s502_s20 + $0x18] sm:$0xff] %v5415_v61  ;;  %v5407_v33 = vadd.f32 %v5723_v45, %v5406_v8 }
0x1177   : > { %5435 = vst [vmem:[%s502_s20 + $0x8] sm:$0xff] %v5407_v33 }
0x117e   : > { %v6776_v37 = vpop.f32.mrf.mxu1 }
0x117f   : > { %v5428_v7 = vadd.f32 %v6776_v37, %v5723_v45 }
0x1180   : > { %v5419_v58 = vpop.f32.mrf.mxu1 }
0x1181   : > { %5440 = vst [vmem:[%s502_s20 + $0x30] sm:$0xff] %v5428_v7  ;;  %v5420_v11 = vadd.f32 %v5723_v45, %v5419_v58 }
0x1182   : > { %v6777_v30 = vpop.f32.mrf.mxu1 }
0x1183   : > { %5438 = vst [vmem:[%s502_s20 + $0x20] sm:$0xff] %v5420_v11  ;;  %v5431_v27 = vadd.f32 %v6777_v30, %v5723_v45 }
0x1184   : > { %v5422_v16 = vpop.f32.mrf.mxu1 }
0x1185   : > { %5441 = vst [vmem:[%s502_s20 + $0x38] sm:$0xff] %v5431_v27  ;;  %v5423_v34 = vadd.f32 %v5723_v45, %v5422_v16 }
0x1187   : > { %5439 = vst [vmem:[%s502_s20 + $0x28] sm:$0xff] %v5423_v34 }
0x1188   : > { %7264 = shalt.err (!%p7261_p3)
}
0x1189   : > { %s7265_s0 = scalar_lea.hbm %s9796_s25, 1024  ;;  %s7269_s16 = scalar_lea.hbm %s9857_s15, 2048 }
0x118a   : > { %p7266_p4 = scmp.ne.s32.totalorder %s9796_s25, %s7265_s0  ;;  %p7270_p9 = scmp.lt.s32.totalorder %s9796_s25, %s9857_s15 }
0x118b   : > { %p7271_p10 = scmp.lt.s32.totalorder %s7269_s16, %s7265_s0 }
0x118c   : > { %p7267_p7 = pnand %p7266_p4, %p7441_p5 }
0x118d   : > { %p7272_p11 = por %p7271_p10, %p7270_p9 }
0x118e   : > { %p7268_p8 = pneg %p7267_p7 }
0x1190   : > { %p7273_p12 = pnand %p7272_p11, %p7268_p8 }
0x1192   : > { %7276 = shalt.err (!%p7273_p12)
}
0x1193   : > { %s7321_s29 = smov 128   ;;  %s7322_s23 = smov 8  }
0x1194   : > { %6882 = dma.vmem_to_hbm [thread:$0]  (%p7441_p5), %s9798_s30, 1024, %s9796_s25, %s9802_s22, %s7321_s29, %s7321_s29, %s7322_s23  }
0x1195 PF: > { %p6888_p13 = scmp.ge.s32.totalorder %s7311_s21, 2  ;;  %s5471_s20 = sand.u32 1, %s7299_s18  }
0x1196   : > { %s5472_s0 = scalar_lea.sflag [#allocation4], %s5471_s20 }
0x1197   : > { %p6885_p0 = pnand %p6888_p13, %p7445_p6 }
0x1199   : > { %p6886_p1 = pneg %p6885_p0 }
0x119b   : > { %7294 = dma.done.wait (%p6886_p1), %s5472_s0, 1024  }
0x119c   : > { %7296 = vsyncadd (%p6886_p1), %s5472_s0, 4294966272  ;;  %s10439_s21 = sld [smem:[#allocation7_spill]]  ;;  %s10442_s18 = smov %s7303_s19 }
0x119d   : > { %s10440_s24 = sld [smem:[#allocation6_spill]] }
0x119e   : > { %s10441_s20 = sld [smem:[#allocation8_spill]] }
0x11a2   : > { %p25_p2 = scmp.ge.s32.totalorder %s10439_s21, 4  }
0x11a3   : > { %s10443_s19 = smov %s10440_s24 }
0x11a4   :  { %27 = sbr.rel (!%p25_p2) target bundleno = 5 (0x5), region = 118 }
0x11a9   :  { %5477 = vsyncpa [#allocation4], 1 }
0x11aa   :  { %5479 = vsyncpa [#allocation4 + $0x1], 1 }

</bundles_post_ra>
